<compile_context>
chip_gen: v5e
topology: v5e:2x2
jax: 0.10.0
libtpu: 0.0.40
codegen_flags: <defaults>
</compile_context>

<pallas_src>
import functools

import jax
import jax.numpy as jnp
from jax.experimental import pallas as pl
from jax.experimental.pallas import tpu as pltpu

DATA_DEPTH = 4
HIDDEN = 32
NEG_SLOPE = 0.01   # nn.LeakyReLU default
BN_EPS = 1e-5      # nn.BatchNorm2d default


def _round_up(x, m):
    return (x + m - 1) // m * m


def _pick_rows_per_chunk(H, W):
    """Rows per conv chunk TH: TH | H, TH*W % 128 == 0 (lane-aligned stores), and
    TH*W <= 2048 to bound vreg pressure (largest such chunk, so the MXU N dim is
    >= 256 whenever possible)."""
    cands = [t for t in range(1, H + 1) if H % t == 0 and (t * W) % 128 == 0]
    if not cands:
        return H                       # single chunk; still correct
    good = [t for t in cands if t * W <= 2048]
    return good[-1] if good else cands[0]


def _fused_encoder_kernel(img_ref, dat_ref,
                          w1_ref, a1_ref, w2_ref, a2_ref,
                          w3_ref, a3_ref, w4_ref, a4_ref,
                          o_ref,
                          buf_a, buf_b,
                          *, H, W, TH, L, S):
    """Whole BasicEncoder forward for one batch element, fully resident in VMEM.

    img_ref : (1, 3, H*W) f32        cover image, channel-major, spatial flattened
    dat_ref : (1, D, H*W) f32        payload
    wX_ref  : (9, CoutX, CinX) bf16  per-tap conv weights, tap = dy*3 + dx
    aX_ref  : (CoutX, 3) f32         columns = [conv bias, bn scale, bn shift]
    o_ref   : (1, 3, H*W) f32        output
    buf_a   : (32, S) bf16           image (ch 0:3)  -> conv2 output (ch 0:32)
    buf_b   : (36, S) bf16           conv1 out (0:32) + data (32:36) -> conv3 out

    Flat scratch index: q = L + h*W + w for the interior; [0, L) and [L+H*W, S) are
    zero halo (vertical padding).  Horizontal padding is handled by lane masks.
    """
    bf16 = jnp.bfloat16
    HW = H * W
    M = TH * W

    # ---- zero only the halo (everything a tap can read outside the interior) ----
    buf_a[:, 0:L] = jnp.zeros((buf_a.shape[0], L), bf16)
    buf_a[:, L + HW:S] = jnp.zeros((buf_a.shape[0], S - L - HW), bf16)
    buf_b[:, 0:L] = jnp.zeros((buf_b.shape[0], L), bf16)
    buf_b[:, L + HW:S] = jnp.zeros((buf_b.shape[0], S - L - HW), bf16)

    # ---- lane-dense interior fills ----------------------------------------------
    buf_a[0:3, L:L + HW] = img_ref[0].astype(bf16)
    buf_b[HIDDEN:HIDDEN + DATA_DEPTH, L:L + HW] = dat_ref[0].astype(bf16)

    # ---- horizontal-edge masks (kill the row-wrap reads of the flat layout) ------
    col = jax.lax.broadcasted_iota(jnp.int32, (1, M), 1) % W
    mask_left = (col != 0).astype(bf16)        # dx == 0 taps (left neighbour)
    mask_right = (col != W - 1).astype(bf16)   # dx == 2 taps (right neighbour)

    def conv3x3(src, cin, w_ref, aux_ref, dst, cout, apply_act):
        """3x3 same conv (+LeakyReLU+eval-BN). dst=None -> write o_ref."""
        bias = aux_ref[:, 0:1]                 # (cout, 1) f32, broadcast along lanes
        scale = aux_ref[:, 1:2]
        shift = aux_ref[:, 2:3]
        # TODO(synk): lax.fori_loop / row-tiled grid axis once H // TH gets large.
        for r0 in range(0, H, TH):
            acc = jnp.zeros((cout, M), jnp.float32)
            for dy in range(3):
                for dx in range(3):
                    base = L + (r0 + dy - 1) * W + (dx - 1)
                    x = src[0:cin, base:base + M]            # (cin, M) bf16
                    if dx == 0:
                        x = x * mask_left
                    elif dx == 2:
                        x = x * mask_right
                    w_tap = w_ref[dy * 3 + dx]               # (cout, cin) bf16
                    acc = acc + jnp.dot(w_tap, x,
                                        preferred_element_type=jnp.float32)
            acc = acc + bias
            if apply_act:
                acc = jnp.where(acc >= 0, acc, NEG_SLOPE * acc)  # LeakyReLU(0.01)
                acc = acc * scale + shift                        # eval BatchNorm
            if dst is None:
                o_ref[0, :, r0 * W:r0 * W + M] = acc.astype(o_ref.dtype)
            else:
                dst[0:cout, L + r0 * W:L + r0 * W + M] = acc.astype(bf16)

    # conv1(image) -> conv2([x, data]) -> conv3 -> conv4 (no act/bn on conv4)
    conv3x3(buf_a, 3, w1_ref, a1_ref, buf_b, HIDDEN, True)
    conv3x3(buf_b, HIDDEN + DATA_DEPTH, w2_ref, a2_ref, buf_a, HIDDEN, True)
    conv3x3(buf_a, HIDDEN, w3_ref, a3_ref, buf_b, HIDDEN, True)
    conv3x3(buf_b, HIDDEN, w4_ref, a4_ref, None, 3, False)


def _pack_weight(w_hwio):
    """(3,3,Cin,Cout) HWIO -> (9, Cout, Cin) bf16 per-tap weights, tap = dy*3 + dx."""
    kh, kw, cin, cout = w_hwio.shape
    return jnp.transpose(w_hwio, (0, 1, 3, 2)).reshape(kh * kw, cout, cin).astype(jnp.bfloat16)


def _pack_aux(bias, scale, shift):
    """(Cout,) x3 -> (Cout, 3) f32, columns = [bias, bn scale, bn shift]."""
    return jnp.stack([bias, scale, shift], axis=1).astype(jnp.float32)


def basic_encoder_pallas(image_nchw, data_nchw, packed):
    """Fused encoder. image: (N,3,H,W), data: (N,D,H,W) -> (N,3,H,W), all f32 NCHW."""
    N, _, H, W = image_nchw.shape
    HW = H * W
    TH = _pick_rows_per_chunk(H, W)
    L = _round_up(W + 1, 128)                    # leading halo, 128-lane aligned
    S = _round_up(L + (H + 1) * W + 1, 128)      # flat scratch length (incl. halos)

    (w1, a1), (w2, a2), (w3, a3), (w4, a4) = packed

    img_flat = image_nchw.reshape(N, 3, HW)      # free trailing-dim reshapes
    dat_flat = data_nchw.reshape(N, DATA_DEPTH, HW)

    def _const_spec(arr):
        nd = arr.ndim
        return pl.BlockSpec(arr.shape, lambda n, _nd=nd: (0,) * _nd)

    kernel = functools.partial(_fused_encoder_kernel, H=H, W=W, TH=TH, L=L, S=S)
    out_flat = pl.pallas_call(
        kernel,
        out_shape=jax.ShapeDtypeStruct((N, 3, HW), jnp.float32),
        grid=(N,),
        in_specs=[
            pl.BlockSpec((1, 3, HW), lambda n: (n, 0, 0)),
            pl.BlockSpec((1, DATA_DEPTH, HW), lambda n: (n, 0, 0)),
            _const_spec(w1), _const_spec(a1),
            _const_spec(w2), _const_spec(a2),
            _const_spec(w3), _const_spec(a3),
            _const_spec(w4), _const_spec(a4),
        ],
        out_specs=pl.BlockSpec((1, 3, HW), lambda n: (n, 0, 0)),
        scratch_shapes=[
            pltpu.VMEM((HIDDEN, S), jnp.bfloat16),                # buf_a
            pltpu.VMEM((HIDDEN + DATA_DEPTH, S), jnp.bfloat16),   # buf_b (x + data)
        ],
        compiler_params=pltpu.CompilerParams(
            dimension_semantics=("parallel",),
            # v7x-safe; everything this version keeps fully resident fits easily.
            vmem_limit_bytes=40 * 1024 * 1024,
        ),
    )(img_flat, dat_flat, w1, a1, w2, a2, w3, a3, w4, a4)
    return out_flat.reshape(N, 3, H, W)


def init_params(key, data_depth=DATA_DEPTH, hidden_size=HIDDEN):
    """Deterministic synthetic parameters matching the PyTorch module shapes (HWIO)."""
    def conv_params(k, cin, cout):
        kw, kb = jax.random.split(k)
        w = 0.1 * jax.random.normal(kw, (3, 3, cin, cout), jnp.float32)  # HWIO
        b = 0.1 * jax.random.normal(kb, (cout,), jnp.float32)
        return w, b

    def bn_params(k, c):
        kg, kb, km, kv = jax.random.split(k, 4)
        gamma = 1.0 + 0.1 * jax.random.normal(kg, (c,), jnp.float32)
        beta = 0.1 * jax.random.normal(kb, (c,), jnp.float32)
        rmean = 0.05 * jax.random.normal(km, (c,), jnp.float32)
        rvar = 1.0 + 0.1 * jax.random.uniform(kv, (c,), jnp.float32)
        scale = gamma / jnp.sqrt(rvar + BN_EPS)
        shift = beta - rmean * scale
        return scale, shift

    ks = jax.random.split(key, 7)
    return {
        "conv1": conv_params(ks[0], 3, hidden_size),
        "bn1": bn_params(ks[1], hidden_size),
        # conv2 input channel order is [x (hidden), data (data_depth)], matching
        # torch.cat([x, data], dim=1) in the reference module.
        "conv2": conv_params(ks[2], hidden_size + data_depth, hidden_size),
        "bn2": bn_params(ks[3], hidden_size),
        "conv3": conv_params(ks[4], hidden_size, hidden_size),
        "bn3": bn_params(ks[5], hidden_size),
        "conv4": conv_params(ks[6], hidden_size, 3),
    }


@jax.jit
def basic_encoder_forward(params, image_nchw, data_nchw):
    """BasicEncoder.forward. image: (N,3,H,W), data: (N,D,H,W) -> (N,3,H,W)."""
    w1, b1 = params["conv1"]; s1, h1 = params["bn1"]
    w2, b2 = params["conv2"]; s2, h2 = params["bn2"]
    w3, b3 = params["conv3"]; s3, h3 = params["bn3"]
    w4, b4 = params["conv4"]

    packed = (
        (_pack_weight(w1), _pack_aux(b1, s1, h1)),
        (_pack_weight(w2), _pack_aux(b2, s2, h2)),
        (_pack_weight(w3), _pack_aux(b3, s3, h3)),
        (_pack_weight(w4), _pack_aux(b4, jnp.ones_like(b4), jnp.zeros_like(b4))),
    )
    return basic_encoder_pallas(image_nchw, data_nchw, packed)


def _reference_forward(params, image, data):
    """Pure-JAX f32 reference of the PyTorch module (eval-mode BatchNorm)."""
    def conv(x, w, b):
        y = jax.lax.conv_general_dilated(
            x, w, window_strides=(1, 1), padding="SAME",
            dimension_numbers=("NCHW", "HWIO", "NCHW"))
        return y + b[None, :, None, None]

    def block(x, wb, bn):
        (w, b), (s, h) = wb, bn
        y = conv(x, w, b)
        y = jnp.where(y >= 0, y, NEG_SLOPE * y)
        return y * s[None, :, None, None] + h[None, :, None, None]

    x = block(image, params["conv1"], params["bn1"])
    x = block(jnp.concatenate([x, data], axis=1), params["conv2"], params["bn2"])
    x = block(x, params["conv3"], params["bn3"])
    w4, b4 = params["conv4"]
    return conv(x, w4, b4)


if __name__ == "__main__":
    N, H, W = 2, 16, 16
    key = jax.random.PRNGKey(0)
    k_img, k_dat, k_par = jax.random.split(key, 3)

    image = jax.random.normal(k_img, (N, 3, H, W), jnp.float32)
    data = (jax.random.uniform(k_dat, (N, DATA_DEPTH, H, W)) > 0.5).astype(jnp.float32)
    params = init_params(k_par)

    out = basic_encoder_forward(params, image, data)
    jax.block_until_ready(out)
    assert out.shape == (N, 3, H, W), out.shape
    assert bool(jnp.all(jnp.isfinite(out)))

    # Loose tolerance: the kernel stores weights / inter-layer activations in bf16
    # (f32 accumulation), so allow ~1e-1-level absolute deviation from the f32 ref.
    ref = _reference_forward(params, image, data)
    diff = jnp.abs(out - ref)
    assert float(jnp.max(diff)) < 0.5, float(jnp.max(diff))
    assert float(jnp.mean(diff)) < 0.08, float(jnp.mean(diff))

    print("KERNEL_OK")
</pallas_src>

<mosaic_0001>
module attributes {stable_mosaic.version = 11 : i64} {
  func.func @_fused_encoder_kernel(%arg0: i32, %arg1: memref<1x3x256xf32, #tpu.memory_space<vmem>>, %arg2: memref<1x4x256xf32, #tpu.memory_space<vmem>>, %arg3: memref<9x32x3xbf16, #tpu.memory_space<vmem>>, %arg4: memref<32x3xf32, #tpu.memory_space<vmem>>, %arg5: memref<9x32x36xbf16, #tpu.memory_space<vmem>>, %arg6: memref<32x3xf32, #tpu.memory_space<vmem>>, %arg7: memref<9x32x32xbf16, #tpu.memory_space<vmem>>, %arg8: memref<32x3xf32, #tpu.memory_space<vmem>>, %arg9: memref<9x3x32xbf16, #tpu.memory_space<vmem>>, %arg10: memref<3x3xf32, #tpu.memory_space<vmem>>, %arg11: memref<1x3x256xf32, #tpu.memory_space<vmem>>, %arg12: memref<32x512xbf16, #tpu.memory_space<vmem>>, %arg13: memref<36x512xbf16, #tpu.memory_space<vmem>>) attributes {dimension_semantics = [#tpu.dimension_semantics<parallel>], iteration_bounds = array<i64: 2>, scalar_prefetch = 0 : i64, scratch_operands = 2 : i64, tpu.core_type = #tpu.core_type<tc>, window_params = [{transform_indices = @transform_0, window_bounds = array<i64: 1, 3, 256>}, {transform_indices = @transform_1, window_bounds = array<i64: 1, 4, 256>}, {pipeline_mode = #tpu.pipeline_mode<synchronous>, transform_indices = @transform_2, window_bounds = array<i64: 9, 32, 3>}, {pipeline_mode = #tpu.pipeline_mode<synchronous>, transform_indices = @transform_3, window_bounds = array<i64: 32, 3>}, {pipeline_mode = #tpu.pipeline_mode<synchronous>, transform_indices = @transform_4, window_bounds = array<i64: 9, 32, 36>}, {pipeline_mode = #tpu.pipeline_mode<synchronous>, transform_indices = @transform_5, window_bounds = array<i64: 32, 3>}, {pipeline_mode = #tpu.pipeline_mode<synchronous>, transform_indices = @transform_6, window_bounds = array<i64: 9, 32, 32>}, {pipeline_mode = #tpu.pipeline_mode<synchronous>, transform_indices = @transform_7, window_bounds = array<i64: 32, 3>}, {pipeline_mode = #tpu.pipeline_mode<synchronous>, transform_indices = @transform_8, window_bounds = array<i64: 9, 3, 32>}, {pipeline_mode = #tpu.pipeline_mode<synchronous>, transform_indices = @transform_9, window_bounds = array<i64: 3, 3>}, {transform_indices = @transform_10, window_bounds = array<i64: 1, 3, 256>}]} {
    %cst = arith.constant 0.000000e+00 : bf16
    %0 = vector.broadcast %cst : bf16 to vector<32x128xbf16>
    %c0 = arith.constant 0 : index
    %c0_0 = arith.constant 0 : index
    %1 = vector.load %arg12[%c0, %c0_0] : memref<32x512xbf16, #tpu.memory_space<vmem>>, vector<32x128xbf16>
    tpu.vector_store %arg12[%c0, %c0_0], %0 {strides = array<i32>} : memref<32x512xbf16, #tpu.memory_space<vmem>>, vector<32x128xbf16>,
    %cst_1 = arith.constant 0.000000e+00 : bf16
    %2 = vector.broadcast %cst_1 : bf16 to vector<32x128xbf16>
    %c0_2 = arith.constant 0 : index
    %c384 = arith.constant 384 : index
    %3 = vector.load %arg12[%c0_2, %c384] : memref<32x512xbf16, #tpu.memory_space<vmem>>, vector<32x128xbf16>
    tpu.vector_store %arg12[%c0_2, %c384], %2 {strides = array<i32>} : memref<32x512xbf16, #tpu.memory_space<vmem>>, vector<32x128xbf16>,
    %cst_3 = arith.constant 0.000000e+00 : bf16
    %4 = vector.broadcast %cst_3 : bf16 to vector<36x128xbf16>
    %c0_4 = arith.constant 0 : index
    %c0_5 = arith.constant 0 : index
    %5 = vector.load %arg13[%c0_4, %c0_5] : memref<36x512xbf16, #tpu.memory_space<vmem>>, vector<36x128xbf16>
    tpu.vector_store %arg13[%c0_4, %c0_5], %4 {strides = array<i32>} : memref<36x512xbf16, #tpu.memory_space<vmem>>, vector<36x128xbf16>,
    %cst_6 = arith.constant 0.000000e+00 : bf16
    %6 = vector.broadcast %cst_6 : bf16 to vector<36x128xbf16>
    %c0_7 = arith.constant 0 : index
    %c384_8 = arith.constant 384 : index
    %7 = vector.load %arg13[%c0_7, %c384_8] : memref<36x512xbf16, #tpu.memory_space<vmem>>, vector<36x128xbf16>
    tpu.vector_store %arg13[%c0_7, %c384_8], %6 {strides = array<i32>} : memref<36x512xbf16, #tpu.memory_space<vmem>>, vector<36x128xbf16>,
    %c0_9 = arith.constant 0 : index
    %c0_10 = arith.constant 0 : index
    %c0_11 = arith.constant 0 : index
    %8 = vector.load %arg1[%c0_9, %c0_10, %c0_11] : memref<1x3x256xf32, #tpu.memory_space<vmem>>, vector<1x3x256xf32>
    %9 = vector.shape_cast %8 : vector<1x3x256xf32> to vector<3x256xf32>
    %10 = arith.truncf %9 : vector<3x256xf32> to vector<3x256xbf16>
    %c0_12 = arith.constant 0 : index
    %c128 = arith.constant 128 : index
    %11 = vector.load %arg12[%c0_12, %c128] : memref<32x512xbf16, #tpu.memory_space<vmem>>, vector<3x256xbf16>
    tpu.vector_store %arg12[%c0_12, %c128], %10 {strides = array<i32>} : memref<32x512xbf16, #tpu.memory_space<vmem>>, vector<3x256xbf16>,
    %c0_13 = arith.constant 0 : index
    %c0_14 = arith.constant 0 : index
    %c0_15 = arith.constant 0 : index
    %12 = vector.load %arg2[%c0_13, %c0_14, %c0_15] : memref<1x4x256xf32, #tpu.memory_space<vmem>>, vector<1x4x256xf32>
    %13 = vector.shape_cast %12 : vector<1x4x256xf32> to vector<4x256xf32>
    %14 = arith.truncf %13 : vector<4x256xf32> to vector<4x256xbf16>
    %c32 = arith.constant 32 : index
    %c128_16 = arith.constant 128 : index
    %15 = vector.load %arg13[%c32, %c128_16] : memref<36x512xbf16, #tpu.memory_space<vmem>>, vector<4x256xbf16>
    tpu.vector_store %arg13[%c32, %c128_16], %14 {strides = array<i32>} : memref<36x512xbf16, #tpu.memory_space<vmem>>, vector<4x256xbf16>,
    %16 = tpu.iota {dimensions = array<i32: 1>} : vector<1x256xi32>
    %c16_i32 = arith.constant 16 : i32
    %c0_i32 = arith.constant 0 : i32
    %17 = arith.cmpi eq, %c16_i32, %c0_i32 : i32
    %c1_i32 = arith.constant 1 : i32
    %18 = arith.select %17, %c1_i32, %c16_i32 : i32
    %19 = vector.broadcast %18 : i32 to vector<1x256xi32>
    %20 = arith.remsi %16, %19 : vector<1x256xi32>
    %c0_i32_17 = arith.constant 0 : i32
    %21 = vector.broadcast %c0_i32_17 : i32 to vector<1x256xi32>
    %22 = arith.cmpi ne, %20, %21 : vector<1x256xi32>
    %c0_i32_18 = arith.constant 0 : i32
    %23 = vector.broadcast %c0_i32_18 : i32 to vector<1x256xi32>
    %24 = arith.cmpi slt, %20, %23 : vector<1x256xi32>
    %c0_i32_19 = arith.constant 0 : i32
    %25 = arith.cmpi slt, %18, %c0_i32_19 : i32
    %26 = vector.broadcast %25 : i1 to vector<1x256xi1>
    %27 = vector.broadcast %26 : vector<1x256xi1> to vector<1x256xi1>
    %28 = arith.xori %24, %27 : vector<1x256xi1>
    %29 = arith.andi %28, %22 : vector<1x256xi1>
    %30 = vector.broadcast %18 : i32 to vector<1x256xi32>
    %31 = arith.addi %20, %30 : vector<1x256xi32>
    %32 = arith.select %29, %31, %20 : vector<1x256xi1>, vector<1x256xi32>
    %c0_i32_20 = arith.constant 0 : i32
    %33 = vector.broadcast %c0_i32_20 : i32 to vector<1x256xi32>
    %34 = arith.cmpi ne, %32, %33 : vector<1x256xi32>
    %35 = arith.extui %34 : vector<1x256xi1> to vector<1x256xi32>
    %36 = arith.sitofp %35 : vector<1x256xi32> to vector<1x256xf32>
    %37 = arith.truncf %36 : vector<1x256xf32> to vector<1x256xbf16>
    %c15_i32 = arith.constant 15 : i32
    %38 = vector.broadcast %c15_i32 : i32 to vector<1x256xi32>
    %39 = arith.cmpi ne, %32, %38 : vector<1x256xi32>
    %40 = arith.extui %39 : vector<1x256xi1> to vector<1x256xi32>
    %41 = arith.sitofp %40 : vector<1x256xi32> to vector<1x256xf32>
    %42 = arith.truncf %41 : vector<1x256xf32> to vector<1x256xbf16>
    %c0_21 = arith.constant 0 : index
    %c0_22 = arith.constant 0 : index
    %43 = vector.load %arg4[%c0_21, %c0_22] : memref<32x3xf32, #tpu.memory_space<vmem>>, vector<32x1xf32>
    %c0_23 = arith.constant 0 : index
    %c1 = arith.constant 1 : index
    %44 = vector.load %arg4[%c0_23, %c1] : memref<32x3xf32, #tpu.memory_space<vmem>>, vector<32x1xf32>
    %c0_24 = arith.constant 0 : index
    %c2 = arith.constant 2 : index
    %45 = vector.load %arg4[%c0_24, %c2] : memref<32x3xf32, #tpu.memory_space<vmem>>, vector<32x1xf32>
    %cst_25 = arith.constant 0.000000e+00 : f32
    %46 = vector.broadcast %cst_25 : f32 to vector<32x256xf32>
    %c0_26 = arith.constant 0 : index
    %c111 = arith.constant 111 : index
    %47 = vector.load %arg12[%c0_26, %c111] : memref<32x512xbf16, #tpu.memory_space<vmem>>, vector<3x256xbf16>
    %48 = vector.broadcast %37 : vector<1x256xbf16> to vector<3x256xbf16>
    %49 = arith.mulf %47, %48 : vector<3x256xbf16>
    %c0_27 = arith.constant 0 : index
    %c0_28 = arith.constant 0 : index
    %c0_29 = arith.constant 0 : index
    %50 = vector.load %arg3[%c0_27, %c0_28, %c0_29] : memref<9x32x3xbf16, #tpu.memory_space<vmem>>, vector<1x32x3xbf16>
    %51 = vector.shape_cast %50 : vector<1x32x3xbf16> to vector<32x3xbf16>
    %cst_30 = arith.constant dense<0.000000e+00> : vector<32x256xf32>
    %52 = tpu.matmul %51, %49, %cst_30 {dimension_numbers = #tpu.dot_dimension_numbers<[1], [0], [0], [1], [0, 0, 1, 1], [], []>} : vector<32x3xbf16>, vector<3x256xbf16>, vector<32x256xf32> -> vector<32x256xf32>
    %53 = arith.addf %46, %52 : vector<32x256xf32>
    %c0_31 = arith.constant 0 : index
    %c112 = arith.constant 112 : index
    %54 = vector.load %arg12[%c0_31, %c112] : memref<32x512xbf16, #tpu.memory_space<vmem>>, vector<3x256xbf16>
    %c1_32 = arith.constant 1 : index
    %c0_33 = arith.constant 0 : index
    %c0_34 = arith.constant 0 : index
    %55 = vector.load %arg3[%c1_32, %c0_33, %c0_34] : memref<9x32x3xbf16, #tpu.memory_space<vmem>>, vector<1x32x3xbf16>
    %56 = vector.shape_cast %55 : vector<1x32x3xbf16> to vector<32x3xbf16>
    %cst_35 = arith.constant dense<0.000000e+00> : vector<32x256xf32>
    %57 = tpu.matmul %56, %54, %cst_35 {dimension_numbers = #tpu.dot_dimension_numbers<[1], [0], [0], [1], [0, 0, 1, 1], [], []>} : vector<32x3xbf16>, vector<3x256xbf16>, vector<32x256xf32> -> vector<32x256xf32>
    %58 = arith.addf %53, %57 : vector<32x256xf32>
    %c0_36 = arith.constant 0 : index
    %c113 = arith.constant 113 : index
    %59 = vector.load %arg12[%c0_36, %c113] : memref<32x512xbf16, #tpu.memory_space<vmem>>, vector<3x256xbf16>
    %60 = vector.broadcast %42 : vector<1x256xbf16> to vector<3x256xbf16>
    %61 = arith.mulf %59, %60 : vector<3x256xbf16>
    %c2_37 = arith.constant 2 : index
    %c0_38 = arith.constant 0 : index
    %c0_39 = arith.constant 0 : index
    %62 = vector.load %arg3[%c2_37, %c0_38, %c0_39] : memref<9x32x3xbf16, #tpu.memory_space<vmem>>, vector<1x32x3xbf16>
    %63 = vector.shape_cast %62 : vector<1x32x3xbf16> to vector<32x3xbf16>
    %cst_40 = arith.constant dense<0.000000e+00> : vector<32x256xf32>
    %64 = tpu.matmul %63, %61, %cst_40 {dimension_numbers = #tpu.dot_dimension_numbers<[1], [0], [0], [1], [0, 0, 1, 1], [], []>} : vector<32x3xbf16>, vector<3x256xbf16>, vector<32x256xf32> -> vector<32x256xf32>
    %65 = arith.addf %58, %64 : vector<32x256xf32>
    %c0_41 = arith.constant 0 : index
    %c127 = arith.constant 127 : index
    %66 = vector.load %arg12[%c0_41, %c127] : memref<32x512xbf16, #tpu.memory_space<vmem>>, vector<3x256xbf16>
    %67 = vector.broadcast %37 : vector<1x256xbf16> to vector<3x256xbf16>
    %68 = arith.mulf %66, %67 : vector<3x256xbf16>
    %c3 = arith.constant 3 : index
    %c0_42 = arith.constant 0 : index
    %c0_43 = arith.constant 0 : index
    %69 = vector.load %arg3[%c3, %c0_42, %c0_43] : memref<9x32x3xbf16, #tpu.memory_space<vmem>>, vector<1x32x3xbf16>
    %70 = vector.shape_cast %69 : vector<1x32x3xbf16> to vector<32x3xbf16>
    %cst_44 = arith.constant dense<0.000000e+00> : vector<32x256xf32>
    %71 = tpu.matmul %70, %68, %cst_44 {dimension_numbers = #tpu.dot_dimension_numbers<[1], [0], [0], [1], [0, 0, 1, 1], [], []>} : vector<32x3xbf16>, vector<3x256xbf16>, vector<32x256xf32> -> vector<32x256xf32>
    %72 = arith.addf %65, %71 : vector<32x256xf32>
    %c0_45 = arith.constant 0 : index
    %c128_46 = arith.constant 128 : index
    %73 = vector.load %arg12[%c0_45, %c128_46] : memref<32x512xbf16, #tpu.memory_space<vmem>>, vector<3x256xbf16>
    %c4 = arith.constant 4 : index
    %c0_47 = arith.constant 0 : index
    %c0_48 = arith.constant 0 : index
    %74 = vector.load %arg3[%c4, %c0_47, %c0_48] : memref<9x32x3xbf16, #tpu.memory_space<vmem>>, vector<1x32x3xbf16>
    %75 = vector.shape_cast %74 : vector<1x32x3xbf16> to vector<32x3xbf16>
    %cst_49 = arith.constant dense<0.000000e+00> : vector<32x256xf32>
    %76 = tpu.matmul %75, %73, %cst_49 {dimension_numbers = #tpu.dot_dimension_numbers<[1], [0], [0], [1], [0, 0, 1, 1], [], []>} : vector<32x3xbf16>, vector<3x256xbf16>, vector<32x256xf32> -> vector<32x256xf32>
    %77 = arith.addf %72, %76 : vector<32x256xf32>
    %c0_50 = arith.constant 0 : index
    %c129 = arith.constant 129 : index
    %78 = vector.load %arg12[%c0_50, %c129] : memref<32x512xbf16, #tpu.memory_space<vmem>>, vector<3x256xbf16>
    %79 = vector.broadcast %42 : vector<1x256xbf16> to vector<3x256xbf16>
    %80 = arith.mulf %78, %79 : vector<3x256xbf16>
    %c5 = arith.constant 5 : index
    %c0_51 = arith.constant 0 : index
    %c0_52 = arith.constant 0 : index
    %81 = vector.load %arg3[%c5, %c0_51, %c0_52] : memref<9x32x3xbf16, #tpu.memory_space<vmem>>, vector<1x32x3xbf16>
    %82 = vector.shape_cast %81 : vector<1x32x3xbf16> to vector<32x3xbf16>
    %cst_53 = arith.constant dense<0.000000e+00> : vector<32x256xf32>
    %83 = tpu.matmul %82, %80, %cst_53 {dimension_numbers = #tpu.dot_dimension_numbers<[1], [0], [0], [1], [0, 0, 1, 1], [], []>} : vector<32x3xbf16>, vector<3x256xbf16>, vector<32x256xf32> -> vector<32x256xf32>
    %84 = arith.addf %77, %83 : vector<32x256xf32>
    %c0_54 = arith.constant 0 : index
    %c143 = arith.constant 143 : index
    %85 = vector.load %arg12[%c0_54, %c143] : memref<32x512xbf16, #tpu.memory_space<vmem>>, vector<3x256xbf16>
    %86 = vector.broadcast %37 : vector<1x256xbf16> to vector<3x256xbf16>
    %87 = arith.mulf %85, %86 : vector<3x256xbf16>
    %c6 = arith.constant 6 : index
    %c0_55 = arith.constant 0 : index
    %c0_56 = arith.constant 0 : index
    %88 = vector.load %arg3[%c6, %c0_55, %c0_56] : memref<9x32x3xbf16, #tpu.memory_space<vmem>>, vector<1x32x3xbf16>
    %89 = vector.shape_cast %88 : vector<1x32x3xbf16> to vector<32x3xbf16>
    %cst_57 = arith.constant dense<0.000000e+00> : vector<32x256xf32>
    %90 = tpu.matmul %89, %87, %cst_57 {dimension_numbers = #tpu.dot_dimension_numbers<[1], [0], [0], [1], [0, 0, 1, 1], [], []>} : vector<32x3xbf16>, vector<3x256xbf16>, vector<32x256xf32> -> vector<32x256xf32>
    %91 = arith.addf %84, %90 : vector<32x256xf32>
    %c0_58 = arith.constant 0 : index
    %c144 = arith.constant 144 : index
    %92 = vector.load %arg12[%c0_58, %c144] : memref<32x512xbf16, #tpu.memory_space<vmem>>, vector<3x256xbf16>
    %c7 = arith.constant 7 : index
    %c0_59 = arith.constant 0 : index
    %c0_60 = arith.constant 0 : index
    %93 = vector.load %arg3[%c7, %c0_59, %c0_60] : memref<9x32x3xbf16, #tpu.memory_space<vmem>>, vector<1x32x3xbf16>
    %94 = vector.shape_cast %93 : vector<1x32x3xbf16> to vector<32x3xbf16>
    %cst_61 = arith.constant dense<0.000000e+00> : vector<32x256xf32>
    %95 = tpu.matmul %94, %92, %cst_61 {dimension_numbers = #tpu.dot_dimension_numbers<[1], [0], [0], [1], [0, 0, 1, 1], [], []>} : vector<32x3xbf16>, vector<3x256xbf16>, vector<32x256xf32> -> vector<32x256xf32>
    %96 = arith.addf %91, %95 : vector<32x256xf32>
    %c0_62 = arith.constant 0 : index
    %c145 = arith.constant 145 : index
    %97 = vector.load %arg12[%c0_62, %c145] : memref<32x512xbf16, #tpu.memory_space<vmem>>, vector<3x256xbf16>
    %98 = vector.broadcast %42 : vector<1x256xbf16> to vector<3x256xbf16>
    %99 = arith.mulf %97, %98 : vector<3x256xbf16>
    %c8 = arith.constant 8 : index
    %c0_63 = arith.constant 0 : index
    %c0_64 = arith.constant 0 : index
    %100 = vector.load %arg3[%c8, %c0_63, %c0_64] : memref<9x32x3xbf16, #tpu.memory_space<vmem>>, vector<1x32x3xbf16>
    %101 = vector.shape_cast %100 : vector<1x32x3xbf16> to vector<32x3xbf16>
    %cst_65 = arith.constant dense<0.000000e+00> : vector<32x256xf32>
    %102 = tpu.matmul %101, %99, %cst_65 {dimension_numbers = #tpu.dot_dimension_numbers<[1], [0], [0], [1], [0, 0, 1, 1], [], []>} : vector<32x3xbf16>, vector<3x256xbf16>, vector<32x256xf32> -> vector<32x256xf32>
    %103 = arith.addf %96, %102 : vector<32x256xf32>
    %104 = vector.broadcast %43 : vector<32x1xf32> to vector<32x256xf32>
    %105 = arith.addf %103, %104 : vector<32x256xf32>
    %cst_66 = arith.constant 0.000000e+00 : f32
    %106 = vector.broadcast %cst_66 : f32 to vector<32x256xf32>
    %107 = arith.cmpf oge, %105, %106 : vector<32x256xf32>
    %cst_67 = arith.constant 0.00999999977 : f32
    %108 = vector.broadcast %cst_67 : f32 to vector<32x256xf32>
    %109 = arith.mulf %108, %105 : vector<32x256xf32>
    %110 = arith.select %107, %105, %109 : vector<32x256xi1>, vector<32x256xf32>
    %111 = vector.broadcast %44 : vector<32x1xf32> to vector<32x256xf32>
    %112 = arith.mulf %110, %111 : vector<32x256xf32>
    %113 = vector.broadcast %45 : vector<32x1xf32> to vector<32x256xf32>
    %114 = arith.addf %112, %113 : vector<32x256xf32>
    %115 = arith.truncf %114 : vector<32x256xf32> to vector<32x256xbf16>
    %c0_68 = arith.constant 0 : index
    %c128_69 = arith.constant 128 : index
    %116 = vector.load %arg13[%c0_68, %c128_69] : memref<36x512xbf16, #tpu.memory_space<vmem>>, vector<32x256xbf16>
    tpu.vector_store %arg13[%c0_68, %c128_69], %115 {strides = array<i32>} : memref<36x512xbf16, #tpu.memory_space<vmem>>, vector<32x256xbf16>,
    %c0_70 = arith.constant 0 : index
    %c0_71 = arith.constant 0 : index
    %117 = vector.load %arg6[%c0_70, %c0_71] : memref<32x3xf32, #tpu.memory_space<vmem>>, vector<32x1xf32>
    %c0_72 = arith.constant 0 : index
    %c1_73 = arith.constant 1 : index
    %118 = vector.load %arg6[%c0_72, %c1_73] : memref<32x3xf32, #tpu.memory_space<vmem>>, vector<32x1xf32>
    %c0_74 = arith.constant 0 : index
    %c2_75 = arith.constant 2 : index
    %119 = vector.load %arg6[%c0_74, %c2_75] : memref<32x3xf32, #tpu.memory_space<vmem>>, vector<32x1xf32>
    %cst_76 = arith.constant 0.000000e+00 : f32
    %120 = vector.broadcast %cst_76 : f32 to vector<32x256xf32>
    %c0_77 = arith.constant 0 : index
    %c111_78 = arith.constant 111 : index
    %121 = vector.load %arg13[%c0_77, %c111_78] : memref<36x512xbf16, #tpu.memory_space<vmem>>, vector<36x256xbf16>
    %122 = vector.broadcast %37 : vector<1x256xbf16> to vector<36x256xbf16>
    %123 = arith.mulf %121, %122 : vector<36x256xbf16>
    %c0_79 = arith.constant 0 : index
    %c0_80 = arith.constant 0 : index
    %c0_81 = arith.constant 0 : index
    %124 = vector.load %arg5[%c0_79, %c0_80, %c0_81] : memref<9x32x36xbf16, #tpu.memory_space<vmem>>, vector<1x32x36xbf16>
    %125 = vector.shape_cast %124 : vector<1x32x36xbf16> to vector<32x36xbf16>
    %cst_82 = arith.constant dense<0.000000e+00> : vector<32x256xf32>
    %126 = tpu.matmul %125, %123, %cst_82 {dimension_numbers = #tpu.dot_dimension_numbers<[1], [0], [0], [1], [0, 0, 1, 1], [], []>} : vector<32x36xbf16>, vector<36x256xbf16>, vector<32x256xf32> -> vector<32x256xf32>
    %127 = arith.addf %120, %126 : vector<32x256xf32>
    %c0_83 = arith.constant 0 : index
    %c112_84 = arith.constant 112 : index
    %128 = vector.load %arg13[%c0_83, %c112_84] : memref<36x512xbf16, #tpu.memory_space<vmem>>, vector<36x256xbf16>
    %c1_85 = arith.constant 1 : index
    %c0_86 = arith.constant 0 : index
    %c0_87 = arith.constant 0 : index
    %129 = vector.load %arg5[%c1_85, %c0_86, %c0_87] : memref<9x32x36xbf16, #tpu.memory_space<vmem>>, vector<1x32x36xbf16>
    %130 = vector.shape_cast %129 : vector<1x32x36xbf16> to vector<32x36xbf16>
    %cst_88 = arith.constant dense<0.000000e+00> : vector<32x256xf32>
    %131 = tpu.matmul %130, %128, %cst_88 {dimension_numbers = #tpu.dot_dimension_numbers<[1], [0], [0], [1], [0, 0, 1, 1], [], []>} : vector<32x36xbf16>, vector<36x256xbf16>, vector<32x256xf32> -> vector<32x256xf32>
    %132 = arith.addf %127, %131 : vector<32x256xf32>
    %c0_89 = arith.constant 0 : index
    %c113_90 = arith.constant 113 : index
    %133 = vector.load %arg13[%c0_89, %c113_90] : memref<36x512xbf16, #tpu.memory_space<vmem>>, vector<36x256xbf16>
    %134 = vector.broadcast %42 : vector<1x256xbf16> to vector<36x256xbf16>
    %135 = arith.mulf %133, %134 : vector<36x256xbf16>
    %c2_91 = arith.constant 2 : index
    %c0_92 = arith.constant 0 : index
    %c0_93 = arith.constant 0 : index
    %136 = vector.load %arg5[%c2_91, %c0_92, %c0_93] : memref<9x32x36xbf16, #tpu.memory_space<vmem>>, vector<1x32x36xbf16>
    %137 = vector.shape_cast %136 : vector<1x32x36xbf16> to vector<32x36xbf16>
    %cst_94 = arith.constant dense<0.000000e+00> : vector<32x256xf32>
    %138 = tpu.matmul %137, %135, %cst_94 {dimension_numbers = #tpu.dot_dimension_numbers<[1], [0], [0], [1], [0, 0, 1, 1], [], []>} : vector<32x36xbf16>, vector<36x256xbf16>, vector<32x256xf32> -> vector<32x256xf32>
    %139 = arith.addf %132, %138 : vector<32x256xf32>
    %c0_95 = arith.constant 0 : index
    %c127_96 = arith.constant 127 : index
    %140 = vector.load %arg13[%c0_95, %c127_96] : memref<36x512xbf16, #tpu.memory_space<vmem>>, vector<36x256xbf16>
    %141 = vector.broadcast %37 : vector<1x256xbf16> to vector<36x256xbf16>
    %142 = arith.mulf %140, %141 : vector<36x256xbf16>
    %c3_97 = arith.constant 3 : index
    %c0_98 = arith.constant 0 : index
    %c0_99 = arith.constant 0 : index
    %143 = vector.load %arg5[%c3_97, %c0_98, %c0_99] : memref<9x32x36xbf16, #tpu.memory_space<vmem>>, vector<1x32x36xbf16>
    %144 = vector.shape_cast %143 : vector<1x32x36xbf16> to vector<32x36xbf16>
    %cst_100 = arith.constant dense<0.000000e+00> : vector<32x256xf32>
    %145 = tpu.matmul %144, %142, %cst_100 {dimension_numbers = #tpu.dot_dimension_numbers<[1], [0], [0], [1], [0, 0, 1, 1], [], []>} : vector<32x36xbf16>, vector<36x256xbf16>, vector<32x256xf32> -> vector<32x256xf32>
    %146 = arith.addf %139, %145 : vector<32x256xf32>
    %c0_101 = arith.constant 0 : index
    %c128_102 = arith.constant 128 : index
    %147 = vector.load %arg13[%c0_101, %c128_102] : memref<36x512xbf16, #tpu.memory_space<vmem>>, vector<36x256xbf16>
    %c4_103 = arith.constant 4 : index
    %c0_104 = arith.constant 0 : index
    %c0_105 = arith.constant 0 : index
    %148 = vector.load %arg5[%c4_103, %c0_104, %c0_105] : memref<9x32x36xbf16, #tpu.memory_space<vmem>>, vector<1x32x36xbf16>
    %149 = vector.shape_cast %148 : vector<1x32x36xbf16> to vector<32x36xbf16>
    %cst_106 = arith.constant dense<0.000000e+00> : vector<32x256xf32>
    %150 = tpu.matmul %149, %147, %cst_106 {dimension_numbers = #tpu.dot_dimension_numbers<[1], [0], [0], [1], [0, 0, 1, 1], [], []>} : vector<32x36xbf16>, vector<36x256xbf16>, vector<32x256xf32> -> vector<32x256xf32>
    %151 = arith.addf %146, %150 : vector<32x256xf32>
    %c0_107 = arith.constant 0 : index
    %c129_108 = arith.constant 129 : index
    %152 = vector.load %arg13[%c0_107, %c129_108] : memref<36x512xbf16, #tpu.memory_space<vmem>>, vector<36x256xbf16>
    %153 = vector.broadcast %42 : vector<1x256xbf16> to vector<36x256xbf16>
    %154 = arith.mulf %152, %153 : vector<36x256xbf16>
    %c5_109 = arith.constant 5 : index
    %c0_110 = arith.constant 0 : index
    %c0_111 = arith.constant 0 : index
    %155 = vector.load %arg5[%c5_109, %c0_110, %c0_111] : memref<9x32x36xbf16, #tpu.memory_space<vmem>>, vector<1x32x36xbf16>
    %156 = vector.shape_cast %155 : vector<1x32x36xbf16> to vector<32x36xbf16>
    %cst_112 = arith.constant dense<0.000000e+00> : vector<32x256xf32>
    %157 = tpu.matmul %156, %154, %cst_112 {dimension_numbers = #tpu.dot_dimension_numbers<[1], [0], [0], [1], [0, 0, 1, 1], [], []>} : vector<32x36xbf16>, vector<36x256xbf16>, vector<32x256xf32> -> vector<32x256xf32>
    %158 = arith.addf %151, %157 : vector<32x256xf32>
    %c0_113 = arith.constant 0 : index
    %c143_114 = arith.constant 143 : index
    %159 = vector.load %arg13[%c0_113, %c143_114] : memref<36x512xbf16, #tpu.memory_space<vmem>>, vector<36x256xbf16>
    %160 = vector.broadcast %37 : vector<1x256xbf16> to vector<36x256xbf16>
    %161 = arith.mulf %159, %160 : vector<36x256xbf16>
    %c6_115 = arith.constant 6 : index
    %c0_116 = arith.constant 0 : index
    %c0_117 = arith.constant 0 : index
    %162 = vector.load %arg5[%c6_115, %c0_116, %c0_117] : memref<9x32x36xbf16, #tpu.memory_space<vmem>>, vector<1x32x36xbf16>
    %163 = vector.shape_cast %162 : vector<1x32x36xbf16> to vector<32x36xbf16>
    %cst_118 = arith.constant dense<0.000000e+00> : vector<32x256xf32>
    %164 = tpu.matmul %163, %161, %cst_118 {dimension_numbers = #tpu.dot_dimension_numbers<[1], [0], [0], [1], [0, 0, 1, 1], [], []>} : vector<32x36xbf16>, vector<36x256xbf16>, vector<32x256xf32> -> vector<32x256xf32>
    %165 = arith.addf %158, %164 : vector<32x256xf32>
    %c0_119 = arith.constant 0 : index
    %c144_120 = arith.constant 144 : index
    %166 = vector.load %arg13[%c0_119, %c144_120] : memref<36x512xbf16, #tpu.memory_space<vmem>>, vector<36x256xbf16>
    %c7_121 = arith.constant 7 : index
    %c0_122 = arith.constant 0 : index
    %c0_123 = arith.constant 0 : index
    %167 = vector.load %arg5[%c7_121, %c0_122, %c0_123] : memref<9x32x36xbf16, #tpu.memory_space<vmem>>, vector<1x32x36xbf16>
    %168 = vector.shape_cast %167 : vector<1x32x36xbf16> to vector<32x36xbf16>
    %cst_124 = arith.constant dense<0.000000e+00> : vector<32x256xf32>
    %169 = tpu.matmul %168, %166, %cst_124 {dimension_numbers = #tpu.dot_dimension_numbers<[1], [0], [0], [1], [0, 0, 1, 1], [], []>} : vector<32x36xbf16>, vector<36x256xbf16>, vector<32x256xf32> -> vector<32x256xf32>
    %170 = arith.addf %165, %169 : vector<32x256xf32>
    %c0_125 = arith.constant 0 : index
    %c145_126 = arith.constant 145 : index
    %171 = vector.load %arg13[%c0_125, %c145_126] : memref<36x512xbf16, #tpu.memory_space<vmem>>, vector<36x256xbf16>
    %172 = vector.broadcast %42 : vector<1x256xbf16> to vector<36x256xbf16>
    %173 = arith.mulf %171, %172 : vector<36x256xbf16>
    %c8_127 = arith.constant 8 : index
    %c0_128 = arith.constant 0 : index
    %c0_129 = arith.constant 0 : index
    %174 = vector.load %arg5[%c8_127, %c0_128, %c0_129] : memref<9x32x36xbf16, #tpu.memory_space<vmem>>, vector<1x32x36xbf16>
    %175 = vector.shape_cast %174 : vector<1x32x36xbf16> to vector<32x36xbf16>
    %cst_130 = arith.constant dense<0.000000e+00> : vector<32x256xf32>
    %176 = tpu.matmul %175, %173, %cst_130 {dimension_numbers = #tpu.dot_dimension_numbers<[1], [0], [0], [1], [0, 0, 1, 1], [], []>} : vector<32x36xbf16>, vector<36x256xbf16>, vector<32x256xf32> -> vector<32x256xf32>
    %177 = arith.addf %170, %176 : vector<32x256xf32>
    %178 = vector.broadcast %117 : vector<32x1xf32> to vector<32x256xf32>
    %179 = arith.addf %177, %178 : vector<32x256xf32>
    %cst_131 = arith.constant 0.000000e+00 : f32
    %180 = vector.broadcast %cst_131 : f32 to vector<32x256xf32>
    %181 = arith.cmpf oge, %179, %180 : vector<32x256xf32>
    %cst_132 = arith.constant 0.00999999977 : f32
    %182 = vector.broadcast %cst_132 : f32 to vector<32x256xf32>
    %183 = arith.mulf %182, %179 : vector<32x256xf32>
    %184 = arith.select %181, %179, %183 : vector<32x256xi1>, vector<32x256xf32>
    %185 = vector.broadcast %118 : vector<32x1xf32> to vector<32x256xf32>
    %186 = arith.mulf %184, %185 : vector<32x256xf32>
    %187 = vector.broadcast %119 : vector<32x1xf32> to vector<32x256xf32>
    %188 = arith.addf %186, %187 : vector<32x256xf32>
    %189 = arith.truncf %188 : vector<32x256xf32> to vector<32x256xbf16>
    %c0_133 = arith.constant 0 : index
    %c128_134 = arith.constant 128 : index
    %190 = vector.load %arg12[%c0_133, %c128_134] : memref<32x512xbf16, #tpu.memory_space<vmem>>, vector<32x256xbf16>
    tpu.vector_store %arg12[%c0_133, %c128_134], %189 {strides = array<i32>} : memref<32x512xbf16, #tpu.memory_space<vmem>>, vector<32x256xbf16>,
    %c0_135 = arith.constant 0 : index
    %c0_136 = arith.constant 0 : index
    %191 = vector.load %arg8[%c0_135, %c0_136] : memref<32x3xf32, #tpu.memory_space<vmem>>, vector<32x1xf32>
    %c0_137 = arith.constant 0 : index
    %c1_138 = arith.constant 1 : index
    %192 = vector.load %arg8[%c0_137, %c1_138] : memref<32x3xf32, #tpu.memory_space<vmem>>, vector<32x1xf32>
    %c0_139 = arith.constant 0 : index
    %c2_140 = arith.constant 2 : index
    %193 = vector.load %arg8[%c0_139, %c2_140] : memref<32x3xf32, #tpu.memory_space<vmem>>, vector<32x1xf32>
    %cst_141 = arith.constant 0.000000e+00 : f32
    %194 = vector.broadcast %cst_141 : f32 to vector<32x256xf32>
    %c0_142 = arith.constant 0 : index
    %c111_143 = arith.constant 111 : index
    %195 = vector.load %arg12[%c0_142, %c111_143] : memref<32x512xbf16, #tpu.memory_space<vmem>>, vector<32x256xbf16>
    %196 = vector.broadcast %37 : vector<1x256xbf16> to vector<32x256xbf16>
    %197 = arith.mulf %195, %196 : vector<32x256xbf16>
    %c0_144 = arith.constant 0 : index
    %c0_145 = arith.constant 0 : index
    %c0_146 = arith.constant 0 : index
    %198 = vector.load %arg7[%c0_144, %c0_145, %c0_146] : memref<9x32x32xbf16, #tpu.memory_space<vmem>>, vector<1x32x32xbf16>
    %199 = vector.shape_cast %198 : vector<1x32x32xbf16> to vector<32x32xbf16>
    %cst_147 = arith.constant dense<0.000000e+00> : vector<32x256xf32>
    %200 = tpu.matmul %199, %197, %cst_147 {dimension_numbers = #tpu.dot_dimension_numbers<[1], [0], [0], [1], [0, 0, 1, 1], [], []>} : vector<32x32xbf16>, vector<32x256xbf16>, vector<32x256xf32> -> vector<32x256xf32>
    %201 = arith.addf %194, %200 : vector<32x256xf32>
    %c0_148 = arith.constant 0 : index
    %c112_149 = arith.constant 112 : index
    %202 = vector.load %arg12[%c0_148, %c112_149] : memref<32x512xbf16, #tpu.memory_space<vmem>>, vector<32x256xbf16>
    %c1_150 = arith.constant 1 : index
    %c0_151 = arith.constant 0 : index
    %c0_152 = arith.constant 0 : index
    %203 = vector.load %arg7[%c1_150, %c0_151, %c0_152] : memref<9x32x32xbf16, #tpu.memory_space<vmem>>, vector<1x32x32xbf16>
    %204 = vector.shape_cast %203 : vector<1x32x32xbf16> to vector<32x32xbf16>
    %cst_153 = arith.constant dense<0.000000e+00> : vector<32x256xf32>
    %205 = tpu.matmul %204, %202, %cst_153 {dimension_numbers = #tpu.dot_dimension_numbers<[1], [0], [0], [1], [0, 0, 1, 1], [], []>} : vector<32x32xbf16>, vector<32x256xbf16>, vector<32x256xf32> -> vector<32x256xf32>
    %206 = arith.addf %201, %205 : vector<32x256xf32>
    %c0_154 = arith.constant 0 : index
    %c113_155 = arith.constant 113 : index
    %207 = vector.load %arg12[%c0_154, %c113_155] : memref<32x512xbf16, #tpu.memory_space<vmem>>, vector<32x256xbf16>
    %208 = vector.broadcast %42 : vector<1x256xbf16> to vector<32x256xbf16>
    %209 = arith.mulf %207, %208 : vector<32x256xbf16>
    %c2_156 = arith.constant 2 : index
    %c0_157 = arith.constant 0 : index
    %c0_158 = arith.constant 0 : index
    %210 = vector.load %arg7[%c2_156, %c0_157, %c0_158] : memref<9x32x32xbf16, #tpu.memory_space<vmem>>, vector<1x32x32xbf16>
    %211 = vector.shape_cast %210 : vector<1x32x32xbf16> to vector<32x32xbf16>
    %cst_159 = arith.constant dense<0.000000e+00> : vector<32x256xf32>
    %212 = tpu.matmul %211, %209, %cst_159 {dimension_numbers = #tpu.dot_dimension_numbers<[1], [0], [0], [1], [0, 0, 1, 1], [], []>} : vector<32x32xbf16>, vector<32x256xbf16>, vector<32x256xf32> -> vector<32x256xf32>
    %213 = arith.addf %206, %212 : vector<32x256xf32>
    %c0_160 = arith.constant 0 : index
    %c127_161 = arith.constant 127 : index
    %214 = vector.load %arg12[%c0_160, %c127_161] : memref<32x512xbf16, #tpu.memory_space<vmem>>, vector<32x256xbf16>
    %215 = vector.broadcast %37 : vector<1x256xbf16> to vector<32x256xbf16>
    %216 = arith.mulf %214, %215 : vector<32x256xbf16>
    %c3_162 = arith.constant 3 : index
    %c0_163 = arith.constant 0 : index
    %c0_164 = arith.constant 0 : index
    %217 = vector.load %arg7[%c3_162, %c0_163, %c0_164] : memref<9x32x32xbf16, #tpu.memory_space<vmem>>, vector<1x32x32xbf16>
    %218 = vector.shape_cast %217 : vector<1x32x32xbf16> to vector<32x32xbf16>
    %cst_165 = arith.constant dense<0.000000e+00> : vector<32x256xf32>
    %219 = tpu.matmul %218, %216, %cst_165 {dimension_numbers = #tpu.dot_dimension_numbers<[1], [0], [0], [1], [0, 0, 1, 1], [], []>} : vector<32x32xbf16>, vector<32x256xbf16>, vector<32x256xf32> -> vector<32x256xf32>
    %220 = arith.addf %213, %219 : vector<32x256xf32>
    %c0_166 = arith.constant 0 : index
    %c128_167 = arith.constant 128 : index
    %221 = vector.load %arg12[%c0_166, %c128_167] : memref<32x512xbf16, #tpu.memory_space<vmem>>, vector<32x256xbf16>
    %c4_168 = arith.constant 4 : index
    %c0_169 = arith.constant 0 : index
    %c0_170 = arith.constant 0 : index
    %222 = vector.load %arg7[%c4_168, %c0_169, %c0_170] : memref<9x32x32xbf16, #tpu.memory_space<vmem>>, vector<1x32x32xbf16>
    %223 = vector.shape_cast %222 : vector<1x32x32xbf16> to vector<32x32xbf16>
    %cst_171 = arith.constant dense<0.000000e+00> : vector<32x256xf32>
    %224 = tpu.matmul %223, %221, %cst_171 {dimension_numbers = #tpu.dot_dimension_numbers<[1], [0], [0], [1], [0, 0, 1, 1], [], []>} : vector<32x32xbf16>, vector<32x256xbf16>, vector<32x256xf32> -> vector<32x256xf32>
    %225 = arith.addf %220, %224 : vector<32x256xf32>
    %c0_172 = arith.constant 0 : index
    %c129_173 = arith.constant 129 : index
    %226 = vector.load %arg12[%c0_172, %c129_173] : memref<32x512xbf16, #tpu.memory_space<vmem>>, vector<32x256xbf16>
    %227 = vector.broadcast %42 : vector<1x256xbf16> to vector<32x256xbf16>
    %228 = arith.mulf %226, %227 : vector<32x256xbf16>
    %c5_174 = arith.constant 5 : index
    %c0_175 = arith.constant 0 : index
    %c0_176 = arith.constant 0 : index
    %229 = vector.load %arg7[%c5_174, %c0_175, %c0_176] : memref<9x32x32xbf16, #tpu.memory_space<vmem>>, vector<1x32x32xbf16>
    %230 = vector.shape_cast %229 : vector<1x32x32xbf16> to vector<32x32xbf16>
    %cst_177 = arith.constant dense<0.000000e+00> : vector<32x256xf32>
    %231 = tpu.matmul %230, %228, %cst_177 {dimension_numbers = #tpu.dot_dimension_numbers<[1], [0], [0], [1], [0, 0, 1, 1], [], []>} : vector<32x32xbf16>, vector<32x256xbf16>, vector<32x256xf32> -> vector<32x256xf32>
    %232 = arith.addf %225, %231 : vector<32x256xf32>
    %c0_178 = arith.constant 0 : index
    %c143_179 = arith.constant 143 : index
    %233 = vector.load %arg12[%c0_178, %c143_179] : memref<32x512xbf16, #tpu.memory_space<vmem>>, vector<32x256xbf16>
    %234 = vector.broadcast %37 : vector<1x256xbf16> to vector<32x256xbf16>
    %235 = arith.mulf %233, %234 : vector<32x256xbf16>
    %c6_180 = arith.constant 6 : index
    %c0_181 = arith.constant 0 : index
    %c0_182 = arith.constant 0 : index
    %236 = vector.load %arg7[%c6_180, %c0_181, %c0_182] : memref<9x32x32xbf16, #tpu.memory_space<vmem>>, vector<1x32x32xbf16>
    %237 = vector.shape_cast %236 : vector<1x32x32xbf16> to vector<32x32xbf16>
    %cst_183 = arith.constant dense<0.000000e+00> : vector<32x256xf32>
    %238 = tpu.matmul %237, %235, %cst_183 {dimension_numbers = #tpu.dot_dimension_numbers<[1], [0], [0], [1], [0, 0, 1, 1], [], []>} : vector<32x32xbf16>, vector<32x256xbf16>, vector<32x256xf32> -> vector<32x256xf32>
    %239 = arith.addf %232, %238 : vector<32x256xf32>
    %c0_184 = arith.constant 0 : index
    %c144_185 = arith.constant 144 : index
    %240 = vector.load %arg12[%c0_184, %c144_185] : memref<32x512xbf16, #tpu.memory_space<vmem>>, vector<32x256xbf16>
    %c7_186 = arith.constant 7 : index
    %c0_187 = arith.constant 0 : index
    %c0_188 = arith.constant 0 : index
    %241 = vector.load %arg7[%c7_186, %c0_187, %c0_188] : memref<9x32x32xbf16, #tpu.memory_space<vmem>>, vector<1x32x32xbf16>
    %242 = vector.shape_cast %241 : vector<1x32x32xbf16> to vector<32x32xbf16>
    %cst_189 = arith.constant dense<0.000000e+00> : vector<32x256xf32>
    %243 = tpu.matmul %242, %240, %cst_189 {dimension_numbers = #tpu.dot_dimension_numbers<[1], [0], [0], [1], [0, 0, 1, 1], [], []>} : vector<32x32xbf16>, vector<32x256xbf16>, vector<32x256xf32> -> vector<32x256xf32>
    %244 = arith.addf %239, %243 : vector<32x256xf32>
    %c0_190 = arith.constant 0 : index
    %c145_191 = arith.constant 145 : index
    %245 = vector.load %arg12[%c0_190, %c145_191] : memref<32x512xbf16, #tpu.memory_space<vmem>>, vector<32x256xbf16>
    %246 = vector.broadcast %42 : vector<1x256xbf16> to vector<32x256xbf16>
    %247 = arith.mulf %245, %246 : vector<32x256xbf16>
    %c8_192 = arith.constant 8 : index
    %c0_193 = arith.constant 0 : index
    %c0_194 = arith.constant 0 : index
    %248 = vector.load %arg7[%c8_192, %c0_193, %c0_194] : memref<9x32x32xbf16, #tpu.memory_space<vmem>>, vector<1x32x32xbf16>
    %249 = vector.shape_cast %248 : vector<1x32x32xbf16> to vector<32x32xbf16>
    %cst_195 = arith.constant dense<0.000000e+00> : vector<32x256xf32>
    %250 = tpu.matmul %249, %247, %cst_195 {dimension_numbers = #tpu.dot_dimension_numbers<[1], [0], [0], [1], [0, 0, 1, 1], [], []>} : vector<32x32xbf16>, vector<32x256xbf16>, vector<32x256xf32> -> vector<32x256xf32>
    %251 = arith.addf %244, %250 : vector<32x256xf32>
    %252 = vector.broadcast %191 : vector<32x1xf32> to vector<32x256xf32>
    %253 = arith.addf %251, %252 : vector<32x256xf32>
    %cst_196 = arith.constant 0.000000e+00 : f32
    %254 = vector.broadcast %cst_196 : f32 to vector<32x256xf32>
    %255 = arith.cmpf oge, %253, %254 : vector<32x256xf32>
    %cst_197 = arith.constant 0.00999999977 : f32
    %256 = vector.broadcast %cst_197 : f32 to vector<32x256xf32>
    %257 = arith.mulf %256, %253 : vector<32x256xf32>
    %258 = arith.select %255, %253, %257 : vector<32x256xi1>, vector<32x256xf32>
    %259 = vector.broadcast %192 : vector<32x1xf32> to vector<32x256xf32>
    %260 = arith.mulf %258, %259 : vector<32x256xf32>
    %261 = vector.broadcast %193 : vector<32x1xf32> to vector<32x256xf32>
    %262 = arith.addf %260, %261 : vector<32x256xf32>
    %263 = arith.truncf %262 : vector<32x256xf32> to vector<32x256xbf16>
    %c0_198 = arith.constant 0 : index
    %c128_199 = arith.constant 128 : index
    %264 = vector.load %arg13[%c0_198, %c128_199] : memref<36x512xbf16, #tpu.memory_space<vmem>>, vector<32x256xbf16>
    tpu.vector_store %arg13[%c0_198, %c128_199], %263 {strides = array<i32>} : memref<36x512xbf16, #tpu.memory_space<vmem>>, vector<32x256xbf16>,
    %c0_200 = arith.constant 0 : index
    %c0_201 = arith.constant 0 : index
    %265 = vector.load %arg10[%c0_200, %c0_201] : memref<3x3xf32, #tpu.memory_space<vmem>>, vector<3x1xf32>
    %cst_202 = arith.constant 0.000000e+00 : f32
    %266 = vector.broadcast %cst_202 : f32 to vector<3x256xf32>
    %c0_203 = arith.constant 0 : index
    %c111_204 = arith.constant 111 : index
    %267 = vector.load %arg13[%c0_203, %c111_204] : memref<36x512xbf16, #tpu.memory_space<vmem>>, vector<32x256xbf16>
    %268 = vector.broadcast %37 : vector<1x256xbf16> to vector<32x256xbf16>
    %269 = arith.mulf %267, %268 : vector<32x256xbf16>
    %c0_205 = arith.constant 0 : index
    %c0_206 = arith.constant 0 : index
    %c0_207 = arith.constant 0 : index
    %270 = vector.load %arg9[%c0_205, %c0_206, %c0_207] : memref<9x3x32xbf16, #tpu.memory_space<vmem>>, vector<1x3x32xbf16>
    %271 = vector.shape_cast %270 : vector<1x3x32xbf16> to vector<3x32xbf16>
    %cst_208 = arith.constant dense<0.000000e+00> : vector<3x256xf32>
    %272 = tpu.matmul %271, %269, %cst_208 {dimension_numbers = #tpu.dot_dimension_numbers<[1], [0], [0], [1], [0, 0, 1, 1], [], []>} : vector<3x32xbf16>, vector<32x256xbf16>, vector<3x256xf32> -> vector<3x256xf32>
    %273 = arith.addf %266, %272 : vector<3x256xf32>
    %c0_209 = arith.constant 0 : index
    %c112_210 = arith.constant 112 : index
    %274 = vector.load %arg13[%c0_209, %c112_210] : memref<36x512xbf16, #tpu.memory_space<vmem>>, vector<32x256xbf16>
    %c1_211 = arith.constant 1 : index
    %c0_212 = arith.constant 0 : index
    %c0_213 = arith.constant 0 : index
    %275 = vector.load %arg9[%c1_211, %c0_212, %c0_213] : memref<9x3x32xbf16, #tpu.memory_space<vmem>>, vector<1x3x32xbf16>
    %276 = vector.shape_cast %275 : vector<1x3x32xbf16> to vector<3x32xbf16>
    %cst_214 = arith.constant dense<0.000000e+00> : vector<3x256xf32>
    %277 = tpu.matmul %276, %274, %cst_214 {dimension_numbers = #tpu.dot_dimension_numbers<[1], [0], [0], [1], [0, 0, 1, 1], [], []>} : vector<3x32xbf16>, vector<32x256xbf16>, vector<3x256xf32> -> vector<3x256xf32>
    %278 = arith.addf %273, %277 : vector<3x256xf32>
    %c0_215 = arith.constant 0 : index
    %c113_216 = arith.constant 113 : index
    %279 = vector.load %arg13[%c0_215, %c113_216] : memref<36x512xbf16, #tpu.memory_space<vmem>>, vector<32x256xbf16>
    %280 = vector.broadcast %42 : vector<1x256xbf16> to vector<32x256xbf16>
    %281 = arith.mulf %279, %280 : vector<32x256xbf16>
    %c2_217 = arith.constant 2 : index
    %c0_218 = arith.constant 0 : index
    %c0_219 = arith.constant 0 : index
    %282 = vector.load %arg9[%c2_217, %c0_218, %c0_219] : memref<9x3x32xbf16, #tpu.memory_space<vmem>>, vector<1x3x32xbf16>
    %283 = vector.shape_cast %282 : vector<1x3x32xbf16> to vector<3x32xbf16>
    %cst_220 = arith.constant dense<0.000000e+00> : vector<3x256xf32>
    %284 = tpu.matmul %283, %281, %cst_220 {dimension_numbers = #tpu.dot_dimension_numbers<[1], [0], [0], [1], [0, 0, 1, 1], [], []>} : vector<3x32xbf16>, vector<32x256xbf16>, vector<3x256xf32> -> vector<3x256xf32>
    %285 = arith.addf %278, %284 : vector<3x256xf32>
    %c0_221 = arith.constant 0 : index
    %c127_222 = arith.constant 127 : index
    %286 = vector.load %arg13[%c0_221, %c127_222] : memref<36x512xbf16, #tpu.memory_space<vmem>>, vector<32x256xbf16>
    %287 = vector.broadcast %37 : vector<1x256xbf16> to vector<32x256xbf16>
    %288 = arith.mulf %286, %287 : vector<32x256xbf16>
    %c3_223 = arith.constant 3 : index
    %c0_224 = arith.constant 0 : index
    %c0_225 = arith.constant 0 : index
    %289 = vector.load %arg9[%c3_223, %c0_224, %c0_225] : memref<9x3x32xbf16, #tpu.memory_space<vmem>>, vector<1x3x32xbf16>
    %290 = vector.shape_cast %289 : vector<1x3x32xbf16> to vector<3x32xbf16>
    %cst_226 = arith.constant dense<0.000000e+00> : vector<3x256xf32>
    %291 = tpu.matmul %290, %288, %cst_226 {dimension_numbers = #tpu.dot_dimension_numbers<[1], [0], [0], [1], [0, 0, 1, 1], [], []>} : vector<3x32xbf16>, vector<32x256xbf16>, vector<3x256xf32> -> vector<3x256xf32>
    %292 = arith.addf %285, %291 : vector<3x256xf32>
    %c0_227 = arith.constant 0 : index
    %c128_228 = arith.constant 128 : index
    %293 = vector.load %arg13[%c0_227, %c128_228] : memref<36x512xbf16, #tpu.memory_space<vmem>>, vector<32x256xbf16>
    %c4_229 = arith.constant 4 : index
    %c0_230 = arith.constant 0 : index
    %c0_231 = arith.constant 0 : index
    %294 = vector.load %arg9[%c4_229, %c0_230, %c0_231] : memref<9x3x32xbf16, #tpu.memory_space<vmem>>, vector<1x3x32xbf16>
    %295 = vector.shape_cast %294 : vector<1x3x32xbf16> to vector<3x32xbf16>
    %cst_232 = arith.constant dense<0.000000e+00> : vector<3x256xf32>
    %296 = tpu.matmul %295, %293, %cst_232 {dimension_numbers = #tpu.dot_dimension_numbers<[1], [0], [0], [1], [0, 0, 1, 1], [], []>} : vector<3x32xbf16>, vector<32x256xbf16>, vector<3x256xf32> -> vector<3x256xf32>
    %297 = arith.addf %292, %296 : vector<3x256xf32>
    %c0_233 = arith.constant 0 : index
    %c129_234 = arith.constant 129 : index
    %298 = vector.load %arg13[%c0_233, %c129_234] : memref<36x512xbf16, #tpu.memory_space<vmem>>, vector<32x256xbf16>
    %299 = vector.broadcast %42 : vector<1x256xbf16> to vector<32x256xbf16>
    %300 = arith.mulf %298, %299 : vector<32x256xbf16>
    %c5_235 = arith.constant 5 : index
    %c0_236 = arith.constant 0 : index
    %c0_237 = arith.constant 0 : index
    %301 = vector.load %arg9[%c5_235, %c0_236, %c0_237] : memref<9x3x32xbf16, #tpu.memory_space<vmem>>, vector<1x3x32xbf16>
    %302 = vector.shape_cast %301 : vector<1x3x32xbf16> to vector<3x32xbf16>
    %cst_238 = arith.constant dense<0.000000e+00> : vector<3x256xf32>
    %303 = tpu.matmul %302, %300, %cst_238 {dimension_numbers = #tpu.dot_dimension_numbers<[1], [0], [0], [1], [0, 0, 1, 1], [], []>} : vector<3x32xbf16>, vector<32x256xbf16>, vector<3x256xf32> -> vector<3x256xf32>
    %304 = arith.addf %297, %303 : vector<3x256xf32>
    %c0_239 = arith.constant 0 : index
    %c143_240 = arith.constant 143 : index
    %305 = vector.load %arg13[%c0_239, %c143_240] : memref<36x512xbf16, #tpu.memory_space<vmem>>, vector<32x256xbf16>
    %306 = vector.broadcast %37 : vector<1x256xbf16> to vector<32x256xbf16>
    %307 = arith.mulf %305, %306 : vector<32x256xbf16>
    %c6_241 = arith.constant 6 : index
    %c0_242 = arith.constant 0 : index
    %c0_243 = arith.constant 0 : index
    %308 = vector.load %arg9[%c6_241, %c0_242, %c0_243] : memref<9x3x32xbf16, #tpu.memory_space<vmem>>, vector<1x3x32xbf16>
    %309 = vector.shape_cast %308 : vector<1x3x32xbf16> to vector<3x32xbf16>
    %cst_244 = arith.constant dense<0.000000e+00> : vector<3x256xf32>
    %310 = tpu.matmul %309, %307, %cst_244 {dimension_numbers = #tpu.dot_dimension_numbers<[1], [0], [0], [1], [0, 0, 1, 1], [], []>} : vector<3x32xbf16>, vector<32x256xbf16>, vector<3x256xf32> -> vector<3x256xf32>
    %311 = arith.addf %304, %310 : vector<3x256xf32>
    %c0_245 = arith.constant 0 : index
    %c144_246 = arith.constant 144 : index
    %312 = vector.load %arg13[%c0_245, %c144_246] : memref<36x512xbf16, #tpu.memory_space<vmem>>, vector<32x256xbf16>
    %c7_247 = arith.constant 7 : index
    %c0_248 = arith.constant 0 : index
    %c0_249 = arith.constant 0 : index
    %313 = vector.load %arg9[%c7_247, %c0_248, %c0_249] : memref<9x3x32xbf16, #tpu.memory_space<vmem>>, vector<1x3x32xbf16>
    %314 = vector.shape_cast %313 : vector<1x3x32xbf16> to vector<3x32xbf16>
    %cst_250 = arith.constant dense<0.000000e+00> : vector<3x256xf32>
    %315 = tpu.matmul %314, %312, %cst_250 {dimension_numbers = #tpu.dot_dimension_numbers<[1], [0], [0], [1], [0, 0, 1, 1], [], []>} : vector<3x32xbf16>, vector<32x256xbf16>, vector<3x256xf32> -> vector<3x256xf32>
    %316 = arith.addf %311, %315 : vector<3x256xf32>
    %c0_251 = arith.constant 0 : index
    %c145_252 = arith.constant 145 : index
    %317 = vector.load %arg13[%c0_251, %c145_252] : memref<36x512xbf16, #tpu.memory_space<vmem>>, vector<32x256xbf16>
    %318 = vector.broadcast %42 : vector<1x256xbf16> to vector<32x256xbf16>
    %319 = arith.mulf %317, %318 : vector<32x256xbf16>
    %c8_253 = arith.constant 8 : index
    %c0_254 = arith.constant 0 : index
    %c0_255 = arith.constant 0 : index
    %320 = vector.load %arg9[%c8_253, %c0_254, %c0_255] : memref<9x3x32xbf16, #tpu.memory_space<vmem>>, vector<1x3x32xbf16>
    %321 = vector.shape_cast %320 : vector<1x3x32xbf16> to vector<3x32xbf16>
    %cst_256 = arith.constant dense<0.000000e+00> : vector<3x256xf32>
    %322 = tpu.matmul %321, %319, %cst_256 {dimension_numbers = #tpu.dot_dimension_numbers<[1], [0], [0], [1], [0, 0, 1, 1], [], []>} : vector<3x32xbf16>, vector<32x256xbf16>, vector<3x256xf32> -> vector<3x256xf32>
    %323 = arith.addf %316, %322 : vector<3x256xf32>
    %324 = vector.broadcast %265 : vector<3x1xf32> to vector<3x256xf32>
    %325 = arith.addf %323, %324 : vector<3x256xf32>
    %c0_257 = arith.constant 0 : index
    %c0_258 = arith.constant 0 : index
    %c0_259 = arith.constant 0 : index
    %326 = vector.load %arg11[%c0_257, %c0_258, %c0_259] : memref<1x3x256xf32, #tpu.memory_space<vmem>>, vector<1x3x256xf32>
    %327 = vector.shape_cast %326 : vector<1x3x256xf32> to vector<3x256xf32>
    %328 = vector.shape_cast %325 : vector<3x256xf32> to vector<1x3x256xf32>
    tpu.vector_store %arg11[%c0_257, %c0_258, %c0_259], %328 {strides = array<i32>} : memref<1x3x256xf32, #tpu.memory_space<vmem>>, vector<1x3x256xf32>,
    return
  }
  func.func @transform_0(%arg0: i32) -> (i32, i32, i32) {
    %c0_i32 = arith.constant 0 : i32
    %c0_i32_0 = arith.constant 0 : i32
    %c0_i32_1 = arith.constant 0 : i32
    return %arg0, %c0_i32, %c0_i32_0 : i32, i32, i32
  }
  func.func @transform_1(%arg0: i32) -> (i32, i32, i32) {
    %c0_i32 = arith.constant 0 : i32
    %c0_i32_0 = arith.constant 0 : i32
    %c0_i32_1 = arith.constant 0 : i32
    return %arg0, %c0_i32, %c0_i32_0 : i32, i32, i32
  }
  func.func @transform_2(%arg0: i32) -> (i32, i32, i32) {
    %c0_i32 = arith.constant 0 : i32
    %c0_i32_0 = arith.constant 0 : i32
    %c0_i32_1 = arith.constant 0 : i32
    %c0_i32_2 = arith.constant 0 : i32
    return %c0_i32, %c0_i32_0, %c0_i32_1 : i32, i32, i32
  }
  func.func @transform_3(%arg0: i32) -> (i32, i32) {
    %c0_i32 = arith.constant 0 : i32
    %c0_i32_0 = arith.constant 0 : i32
    %c0_i32_1 = arith.constant 0 : i32
    return %c0_i32, %c0_i32_0 : i32, i32
  }
  func.func @transform_4(%arg0: i32) -> (i32, i32, i32) {
    %c0_i32 = arith.constant 0 : i32
    %c0_i32_0 = arith.constant 0 : i32
    %c0_i32_1 = arith.constant 0 : i32
    %c0_i32_2 = arith.constant 0 : i32
    return %c0_i32, %c0_i32_0, %c0_i32_1 : i32, i32, i32
  }
  func.func @transform_5(%arg0: i32) -> (i32, i32) {
    %c0_i32 = arith.constant 0 : i32
    %c0_i32_0 = arith.constant 0 : i32
    %c0_i32_1 = arith.constant 0 : i32
    return %c0_i32, %c0_i32_0 : i32, i32
  }
  func.func @transform_6(%arg0: i32) -> (i32, i32, i32) {
    %c0_i32 = arith.constant 0 : i32
    %c0_i32_0 = arith.constant 0 : i32
    %c0_i32_1 = arith.constant 0 : i32
    %c0_i32_2 = arith.constant 0 : i32
    return %c0_i32, %c0_i32_0, %c0_i32_1 : i32, i32, i32
  }
  func.func @transform_7(%arg0: i32) -> (i32, i32) {
    %c0_i32 = arith.constant 0 : i32
    %c0_i32_0 = arith.constant 0 : i32
    %c0_i32_1 = arith.constant 0 : i32
    return %c0_i32, %c0_i32_0 : i32, i32
  }
  func.func @transform_8(%arg0: i32) -> (i32, i32, i32) {
    %c0_i32 = arith.constant 0 : i32
    %c0_i32_0 = arith.constant 0 : i32
    %c0_i32_1 = arith.constant 0 : i32
    %c0_i32_2 = arith.constant 0 : i32
    return %c0_i32, %c0_i32_0, %c0_i32_1 : i32, i32, i32
  }
  func.func @transform_9(%arg0: i32) -> (i32, i32) {
    %c0_i32 = arith.constant 0 : i32
    %c0_i32_0 = arith.constant 0 : i32
    %c0_i32_1 = arith.constant 0 : i32
    return %c0_i32, %c0_i32_0 : i32, i32
  }
  func.func @transform_10(%arg0: i32) -> (i32, i32, i32) {
    %c0_i32 = arith.constant 0 : i32
    %c0_i32_0 = arith.constant 0 : i32
    %c0_i32_1 = arith.constant 0 : i32
    return %arg0, %c0_i32, %c0_i32_0 : i32, i32, i32
  }
}

</mosaic_0001>

<bundles_post_ra>
// kernel: basic_encoder_forward.1
= control target key start
LH: loop header
LB: loop body
LE: loop exit
PB: predicated region body
PF: predicated region fallthrough
CT: control target
= control target key end

     0   :  { %s5601_s13 = smov 0   ;;  %s7852_s0 = inlined_call_operand.vmem [shape: f32[2,3,256], index: 0, kind: input, shape index: {}]   ;;  %s7853_s1 = inlined_call_operand.vmem [shape: f32[2,4,256], index: 1, kind: input, shape index: {}]   ;;  %s7854_s2 = inlined_call_operand.vmem [shape: bf16[9,32,3], index: 2, kind: input, shape index: {}]   ;;  %s7855_s3 = inlined_call_operand.vmem [shape: f32[32,3], index: 3, kind: input, shape index: {}]   ;;  %s7856_s4 = inlined_call_operand.vmem [shape: bf16[9,32,36], index: 4, kind: input, shape index: {}]   ;;  %s7857_s5 = inlined_call_operand.vmem [shape: f32[32,3], index: 5, kind: input, shape index: {}]   ;;  %s7858_s6 = inlined_call_operand.vmem [shape: bf16[9,32,32], index: 6, kind: input, shape index: {}]   ;;  %s7859_s7 = inlined_call_operand.vmem [shape: f32[32,3], index: 7, kind: input, shape index: {}]   ;;  %s7860_s8 = inlined_call_operand.vmem [shape: bf16[9,3,32], index: 8, kind: input, shape index: {}]   ;;  %s7861_s9 = inlined_call_operand.vmem [shape: f32[3,3], index: 9, kind: input, shape index: {}]   ;;  %s7862_s10 = inlined_call_operand.vmem [shape: f32[2,3,256], index: 10, kind: output, shape index: {}]  }
   0x1 LB: > { %s4680_s14 = sadd.s32 4294967295, %s5531_s13   ;;  %p4684_p0 = scmp.ge.s32.totalorder %s5531_s13, 1  ;;  %s5531_s13 = sphi %s5601_s13, %s20_s13  }
   0x2   : > { %p322_p1 = scmp.lt.s32.totalorder %s5531_s13, 3 }
   0x4   : > { %p323_p2 = pnand %p4684_p0, %p322_p1 }
   0x6   : > { %326 = sbr.rel (%p323_p2) target bundleno = 1836 (0x72c), region = 60 }
   0xb   : > { %v426_v0 = vlaneseq  ;;  %p365_p3 = scmp.lt.s32.totalorder %s4680_s14, 1  ;;  %v7863_v1 = vmov 0   ;;  %v5534_v6 = vmov 0.0   ;;  %vm407_vm2 = vcmask 1041408   ;;  %s5535_s22 = smov 111   ;;  %v5340_v12 = vld [vmem:[%s7854_s2 + $0x10] sm:$0xff] }
   0xc   : > { %381 = vst [vmem:[#allocation2] sm:$0xf] %v7863_v1  ;;  %5493 = vset.pattern.permute.xlu2 %v7863_v1  ;;  %5491 = vset.pattern.permute.xlu0 %v7863_v1  ;;  %vm408_vm3 = vsmask.f32 1280  ;;  %vm410_vm4 = vcmask 1045508   ;;  %s5536_s23 = smov 113  }
   0xd   : > { %v427_v2 = vand.u32 127, %v426_v0  ;;  %5492 = vset.pattern.permute.xlu1 %v7863_v1  ;;  %s8104_s14 = smov (!%p365_p3, %s4680_s14), 1  ;;  %382 = vst [vmem:[#allocation2 + $0x10] sm:$0xf] %v7863_v1  ;;  %vm411_vm5 = vsmask.f32 5376  ;;  %vm5632_vm8 = vmand %vm407_vm2, %vm408_vm3 }
   0xe   : > { %383 = vst [vmem:[#allocation2 + $0x20] sm:$0xf] %v7863_v1  ;;  %s5615_s15 = sshll.u32 %s8104_s14, 3  ;;  %vm5639_vm9 = vmand %vm410_vm4, %vm411_vm5  ;;  %v414_v16 = vld [vmem:[#allocation2 + $0x4] sm:$0x33]  ;;  %s5537_s24 = smov 16  }
   0xf   : > { %v428_v3 = vadd.s32 128, %v427_v2  ;;  %v433_v4 = vand.u32 15, %v427_v2  ;;  %384 = vst [vmem:[#allocation2 + $0x30] sm:$0xf] %v7863_v1  ;;  %s369_s18 = scalar_lea.vmem %s7852_s0, %s5615_s15  ;;  %s374_s21 = scalar_lea.vmem %s7853_s1, %s5615_s15  ;;  %vm413_vm10 = vmor %vm5639_vm9, %vm5632_vm8  ;;  %vm484_vm11 = vcmask 908288   ;;  %vm666_vm12 = vcmask 924672  }
  0x10   : > { %385 = vst [vmem:[#allocation2 + $0xc] sm:$0xf] %v7863_v1  ;;  %v399_v8 = vld [vmem:[%s369_s18] sm:$0x77]  ;;  %s5538_s25 = smov 127   ;;  %s5539_s26 = smov 17  }
  0x11   : > { %v440_v5 = vand.u32 15, %v428_v3  ;;  %vm453_vm0 = vcmp.ne.s32.totalorder %v433_v4, 0  ;;  %401 = vst [vmem:[#allocation1] ss:$2 sm:$0xff] %v399_v8  ;;  %vm460_vm6 = vcmp.ne.s32.totalorder %v433_v4, 15  ;;  %v417_v15 = vld [vmem:[%s374_s21] sm:$0xff] }
  0x12   : > { %v4691_v7 = vsel %vm453_vm0, 1.0, %v5534_v6  ;;  %386 = vst [vmem:[#allocation2 + $0x1c] sm:$0xf] %v7863_v1  ;;  %v4693_v13 = vsel %vm460_vm6, 1.0, %v5534_v6  ;;  %s5540_s27 = smov 15   ;;  %vm766_vm13 = vcmask 1039360  }
  0x13   : > { %vm454_vm1 = vcmp.ne.s32.totalorder %v440_v5, 0  ;;  %vm461_vm7 = vcmp.ne.s32.totalorder %v440_v5, 15  ;;  %387 = vst [vmem:[#allocation2 + $0x2c] sm:$0xf] %v7863_v1  ;;  %vm538_vm14 = vcmask 1040384   ;;  %s5541_s28 = smov 1  }
  0x14   : > { %v4692_v9 = vsel %vm454_vm1, 1.0, %v5534_v6  ;;  %388 = vst [vmem:[#allocation2 + $0x3c] sm:$0xf] %v7863_v1  ;;  %v4694_v14 = vsel %vm461_vm7, 1.0, %v5534_v6  ;;  %v5542_v2 = vmov 65535   ;;  %vm528_vm15 = vcmask 130048  }
  0x15   : > { %v5624_v10 = vpack.i.bf16 %v4692_v9, %v4691_v7  ;;  %389 = vst [vmem:[#allocation3] sm:$0xf] %v7863_v1  ;;  %v5650_v19 = vpack.i.bf16 %v4694_v14, %v4693_v13  ;;  %v540_v3 = vsel %vm538_vm14, 4294967295, %v5542_v2  ;;  %vm531_vm0 = vcmask 23552   ;;  %v5341_v14 = vld [vmem:[%s7854_s2 + $0x18] sm:$0xff]  ;;  %s5543_s12 = smov 112  }
  0x16   : > { %390 = vst [vmem:[#allocation3 + $0x10] sm:$0xf] %v7863_v1  ;;  %v5714_v5 = vsel %vm407_vm2, %v540_v3, 0  ;;  %vm605_vm1 = vcmask 138240   ;;  %vm701_vm3 = vcmask 121856   ;;  %vm801_vm4 = vcmask 7168  }
  0x17   : > { %5462 = vrot.lane.b32.xlu0 %v5624_v10, %s5535_s22  ;;  %391 = vst [vmem:[#allocation3 + $0x20] sm:$0xf] %v7863_v1  ;;  %vm1175_vm5 = vcmask 916480  }
  0x18   : > { %v402_v17 = vld.sshfl [vmem:[#allocation1] sm:$0xff pattern:$0x75316420]  ;;  %v403_v18 = vld.sshfl [vmem:[#allocation1 + $0x8] sm:$0xff pattern:$0x75316420] }
  0x19   : > { %v406_v20 = vpack.c.bf16 %v403_v18, %v402_v17  ;;  %419 = vst [vmem:[#allocation1] ss:$2 sm:$0xff] %v417_v15 }
  0x1a   : > { %392 = vst [vmem:[#allocation3 + $0x30] sm:$0xf] %v7863_v1 }
  0x1b   : > { %v415_v21 = vsel %vm413_vm10, %v406_v20, %v414_v16  ;;  %393 = vst [vmem:[#allocation3 + $0x40] sm:$0x3] %v7863_v1 }
  0x1c   : > { %416 = vst [vmem:[#allocation2 + $0x4] sm:$0x33] %v415_v21 }
  0x1d   : > { %394 = vst [vmem:[#allocation3 + $0xc] sm:$0xf] %v7863_v1 }
  0x1e   : > { %395 = vst [vmem:[#allocation3 + $0x1c] sm:$0xf] %v7863_v1 }
  0x1f   : > { %5467 = vrot.lane.b32.xlu0 %v5650_v19, %s5536_s23  ;;  %396 = vst [vmem:[#allocation3 + $0x2c] sm:$0xf] %v7863_v1 }
  0x20   : > { %397 = vst [vmem:[#allocation3 + $0x3c] sm:$0xf] %v7863_v1  ;;  %v420_v30 = vld.sshfl [vmem:[#allocation1] sm:$0xff pattern:$0x75316420] }
  0x21   : > { %398 = vst [vmem:[#allocation3 + $0x4c] sm:$0x3] %v7863_v1  ;;  %v421_v31 = vld.sshfl [vmem:[#allocation1 + $0x8] sm:$0xff pattern:$0x75316420] }
  0x22   : > { %v424_v32 = vpack.c.bf16 %v421_v31, %v420_v30  ;;  %v5747_v30 = vld [vmem:[#allocation2 + $0xc] sm:$0x3] }
  0x23   : > { %v471_v22 = vld [vmem:[#allocation2] sm:$0x33]  ;;  %v472_v23 = vld [vmem:[#allocation2 + $0x8] sm:$0x3] }
  0x24   : > { %v516_v24 = vunpack.c.l.b16 %v471_v22  ;;  %v518_v25 = vunpack.c.l.b16 %v472_v23  ;;  %v517_v28 = vunpack.c.h.b16 %v471_v22  ;;  %425 = vst [vmem:[#allocation3 + $0x44] sm:$0x33] %v424_v32  ;;  %v475_v33 = vunpack.c.l.bf16 %v472_v23  ;;  %v5749_v31 = vld [vmem:[#allocation2 + $0x4] sm:$0x33]  ;;  %v5342_v32 = vld [vmem:[%s7854_s2 + $0x20] sm:$0xff] }
  0x25   : > { %v473_v34 = vunpack.c.l.bf16 %v471_v22  ;;  %v474_v36 = vunpack.c.h.bf16 %v471_v22  ;;  %v5338_v22 = vld [vmem:[%s7854_s2] sm:$0xff] }
  0x26   : > { %v519_v26 = vpack.c.b16 %v516_v24, %v516_v24  ;;  %v521_v27 = vpack.c.b16 %v518_v25, %v518_v25  ;;  %v520_v29 = vpack.c.b16 %v517_v28, %v517_v28 }
  0x28   : > { %522 = vrot.lane.b32.xlu1 %v519_v26, %s5537_s24  ;;  %526 = vrot.lane.b32.xlu2 %v521_v27, %s5537_s24 }
  0x30   : > { %524 = vrot.lane.b32.xlu1 %v520_v29, %s5537_s24  ;;  %5472 = vrot.lane.b32.xlu2 %v5624_v10, %s5538_s25 }
  0x82   : > { %v527_v37 = vpop.permute.xlu2 %526 }
  0x89   : > { %v5463_v35 = vpop.permute.xlu0 %5462 }
  0x8a   : > { %v5666_v38 = vunpack.i.h.bf16 %v5463_v35  ;;  %v5668_v39 = vunpack.i.l.bf16 %v5463_v35  ;;  %v5473_v50 = vpop.permute.xlu2 %5472 }
  0x8b   : > { %v5693_v57 = vunpack.i.l.bf16 %v5473_v50  ;;  %v5699_v60 = vunpack.i.h.bf16 %v5473_v50 }
  0x8c   : > { %7962 = vst [vmem:[#allocation4_spill] sm:$0xff] %v5666_v38  ;;  %v491_v40 = vmul.f32 %v5666_v38, %v475_v33  ;;  %v489_v41 = vmul.f32 %v5668_v39, %v473_v34  ;;  %v5675_v42 = vsel %vm484_vm11, %v5668_v39, %v5666_v38 }
  0x8d   : > { %7963 = vst [vmem:[#allocation5_spill] sm:$0xff] %v5668_v39  ;;  %v490_v43 = vmul.f32 %v5675_v42, %v474_v36  ;;  %v771_v59 = vmul.f32 %v5693_v57, %v473_v34  ;;  %v5704_v63 = vsel %vm766_vm13, %v5693_v57, %v5699_v60  ;;  %v773_v4 = vmul.f32 %v5699_v60, %v475_v33 }
  0x8e   : > { %7964 = vst [vmem:[#allocation6_spill] sm:$0xff] %v5675_v42  ;;  %v494_v44 = vpack.c.bf16 %v491_v40, %v491_v40  ;;  %v492_v45 = vpack.c.bf16 %v489_v41, %v489_v41  ;;  %v772_v0 = vmul.f32 %v5704_v63, %v474_v36  ;;  %v5761_v41 = vunpack.c.h.bf16 %v5749_v31 }
  0x8f   : > { %v493_v46 = vpack.c.bf16 %v490_v43, %v490_v43  ;;  %7968 = vst [vmem:[#allocation10_spill] sm:$0xff] %v5693_v57  ;;  %v774_v62 = vpack.c.bf16 %v771_v59, %v771_v59  ;;  %v776_v8 = vpack.c.bf16 %v773_v4, %v773_v4 }
  0x90   : > { %603 = vrot.lane.b32.xlu2 %v494_v44, %s5539_s26  ;;  %599 = vrot.lane.b32.xlu0 %v492_v45, %s5539_s26  ;;  %7969 = vst [vmem:[#allocation11_spill] sm:$0xff] %v5699_v60  ;;  %v775_v6 = vpack.c.bf16 %v772_v0, %v772_v0 }
  0x91   : > { %v5468_v47 = vpop.permute.xlu0 %5467  ;;  %601 = vrot.lane.b32.xlu1 %v493_v46, %s5539_s26  ;;  %7970 = vst [vmem:[#allocation12_spill] sm:$0xff] %v5704_v63 }
  0x92   : > { %v5681_v48 = vunpack.i.h.bf16 %v5468_v47  ;;  %v5683_v49 = vunpack.i.l.bf16 %v5468_v47 }
  0x94   : > { %7965 = vst [vmem:[#allocation7_spill] sm:$0xff] %v5681_v48  ;;  %v673_v51 = vmul.f32 %v5681_v48, %v475_v33  ;;  %v671_v52 = vmul.f32 %v5683_v49, %v473_v34  ;;  %v5690_v53 = vsel %vm666_vm12, %v5683_v49, %v5681_v48  ;;  %v862_v33 = vld [vmem:[#allocation2 + $0x4] sm:$0x33] }
  0x95   : > { %7966 = vst [vmem:[#allocation8_spill] sm:$0xff] %v5683_v49  ;;  %v672_v54 = vmul.f32 %v5690_v53, %v474_v36  ;;  %v879_v34 = vunpack.c.l.b16 %v862_v33  ;;  %v880_v35 = vunpack.c.h.b16 %v862_v33  ;;  %v5755_v36 = vunpack.c.l.bf16 %v5747_v30 }
  0x96   : > { %7967 = vst [vmem:[#allocation9_spill] sm:$0xff] %v5690_v53  ;;  %v676_v55 = vpack.c.bf16 %v673_v51, %v673_v51  ;;  %v674_v56 = vpack.c.bf16 %v671_v52, %v671_v52 }
  0x97   : > { %v675_v58 = vpack.c.bf16 %v672_v54, %v672_v54  ;;  %v881_v43 = vpack.c.b16 %v879_v34, %v879_v34  ;;  %v882_v44 = vpack.c.b16 %v880_v35, %v880_v35  ;;  %v5344_v34 = vld [vmem:[%s7854_s2 + $0x30] sm:$0xff] }
  0x98   : > { %699 = vrot.lane.b32.xlu2 %v676_v55, %s5540_s27  ;;  %695 = vrot.lane.b32.xlu0 %v674_v56, %s5540_s27 }
  0x99   : > { %697 = vrot.lane.b32.xlu1 %v675_v58, %s5540_s27  ;;  %v890_v52 = vand.u32 %v881_v43, %v5714_v5  ;;  %v893_v54 = vand.u32 %v882_v44, %v5714_v5 }
  0x9a   : > { %v523_v61 = vpop.permute.xlu1 %522 }
  0xa0   : > { %5477 = vrot.lane.b32.xlu0 %v5650_v19, %s5541_s28  ;;  %795 = vrot.lane.b32.xlu2 %v774_v62, %s5541_s28  ;;  %v5339_v62 = vld [vmem:[%s7854_s2 + $0x8] sm:$0xff] }
  0xa1   : > { %5482 = vrot.lane.b32.xlu1 %v5624_v10, %s5540_s27 }
  0xa2   : > { %v525_v7 = vpop.permute.xlu1 %524 }
  0xa3   : > { %v530_v9 = vsel %vm528_vm15, %v525_v7, %v527_v37  ;;  %v529_v10 = vsel %vm528_vm15, %v523_v61, %v525_v7  ;;  %v5758_v37 = vunpack.c.l.bf16 %v5749_v31 }
  0xa4   : > { %v546_v11 = vand.u32 %v5714_v5, %v530_v9  ;;  %v543_v13 = vand.u32 %v5714_v5, %v529_v10 }
  0xa6   : > { %574 = vmatpush.bf16.msra.mxu1 %v546_v11  ;;  %555 = vmatpush.bf16.msra.mxu0 %v543_v13 }
  0xa8   : > { %797 = vrot.lane.b32.xlu0 %v775_v6, %s5541_s28  ;;  %5487 = vrot.lane.b32.xlu2 %v5650_v19, %s5539_s26 }
  0xa9   : > { %799 = vrot.lane.b32.xlu1 %v776_v8, %s5541_s28  ;;  %4709 = vmatmul.msk.bf16.vlgmr.msra.gmra.mxu1 %vm531_vm0, %v5340_v12 }
  0xaa   : > { %4707 = vmatmul.msk.bf16.vlgmr.msra.gmra.mxu0 %vm531_vm0, %v5340_v12 }
  0xb9   : > { %4710 = vmatmul.msk.bf16.gmra.mxu1 %vm531_vm0, %v5341_v14 }
  0xba   : > { %4708 = vmatmul.msk.bf16.gmra.mxu0 %vm531_vm0, %v5341_v14 }
  0xea   : > { %v604_v15 = vpop.permute.xlu2 %603 }
  0xf2   : > { %v700_v24 = vpop.permute.xlu2 %699 }
  0xfa   : > { %v796_v61 = vpop.permute.xlu2 %795 }
 0x102   : > { %v600_v16 = vpop.permute.xlu0 %599 }
 0x103   : > { %v602_v17 = vpop.permute.xlu1 %601 }
 0x104   : > { %v606_v18 = vsel %vm605_vm1, %v600_v16, %v602_v17  ;;  %v607_v19 = vsel %vm605_vm1, %v602_v17, %v604_v15 }
 0x105   : > { %v615_v20 = vand.u32 %v606_v18, %v5714_v5  ;;  %v618_v21 = vand.u32 %v607_v19, %v5714_v5  ;;  %v5343_v18 = vld [vmem:[%s7854_s2 + $0x28] sm:$0xff]  ;;  %v4274_v19 = vld [vmem:[#allocation3 + $0x2c] sm:$0xf] }
 0x107   : > { %627 = vmatpush.bf16.msra.mxu2 %v615_v20  ;;  %646 = vmatpush.bf16.msra.mxu3 %v618_v21  ;;  %v4276_v20 = vld [vmem:[#allocation3 + $0x3c] sm:$0xf]  ;;  %v5488_v21 = vpop.permute.xlu2 %5487 }
 0x10a   : > { %v696_v23 = vpop.permute.xlu0 %695  ;;  %4719 = vmatmul.msk.bf16.vlgmr.msra.gmra.mxu2 %vm531_vm0, %v5338_v22  ;;  %4721 = vmatmul.msk.bf16.vlgmr.msra.gmra.mxu3 %vm531_vm0, %v5338_v22  ;;  %v1165_v22 = vunpack.c.l.b16 %v5747_v30 }
 0x10b   : > { %v698_v25 = vpop.permute.xlu1 %697 }
 0x10c   : > { %v702_v26 = vsel %vm701_vm3, %v696_v23, %v698_v25  ;;  %v703_v27 = vsel %vm701_vm3, %v698_v25, %v700_v24  ;;  %v1163_v23 = vunpack.c.l.b16 %v5749_v31  ;;  %v1164_v24 = vunpack.c.h.b16 %v5749_v31 }
 0x10d   : > { %v711_v28 = vand.u32 %v702_v26, %v5714_v5  ;;  %v714_v29 = vand.u32 %v703_v27, %v5714_v5  ;;  %v5819_v25 = vunpack.c.l.bf16 %v4274_v19  ;;  %v5821_v26 = vunpack.c.l.bf16 %v4276_v20 }
 0x10e   : > { %v5823_v27 = vunpack.i.h.bf16 %v5488_v21  ;;  %v1168_v31 = vpack.c.b16 %v1165_v22, %v1165_v22  ;;  %v1167_v33 = vpack.c.b16 %v1164_v24, %v1164_v24 }
 0x10f   : > { %723 = vmatpush.bf16.msrb.mxu0 %v711_v28  ;;  %742 = vmatpush.bf16.msrb.mxu1 %v714_v29  ;;  %7977 = vst [vmem:[#allocation19_spill] sm:$0xff] %v5819_v25  ;;  %v5825_v28 = vunpack.i.l.bf16 %v5488_v21 }
 0x110   : > { %7978 = vst [vmem:[#allocation20_spill] sm:$0xff] %v5821_v26  ;;  %v1247_v43 = vmul.f32 %v5823_v27, %v5755_v36 }
 0x111   : > { %7979 = vst [vmem:[#allocation21_spill] sm:$0xff] %v5823_v27  ;;  %v1245_v44 = vmul.f32 %v5825_v28, %v5758_v37 }
 0x112   : > { %v5478_v40 = vpop.permute.xlu0 %5477  ;;  %4735 = vmatmul.msk.bf16.vlgmr.msrb.gmra.mxu0 %vm531_vm0, %v5342_v32  ;;  %4737 = vmatmul.msk.bf16.vlgmr.msrb.gmra.mxu1 %vm531_vm0, %v5342_v32  ;;  %7980 = vst [vmem:[#allocation22_spill] sm:$0xff] %v5825_v28  ;;  %v1166_v32 = vpack.c.b16 %v1163_v23, %v1163_v23 }
 0x113   : > { %v5765_v45 = vunpack.i.h.bf16 %v5478_v40  ;;  %v5767_v46 = vunpack.i.l.bf16 %v5478_v40  ;;  %v5483_v47 = vpop.permute.xlu1 %5482  ;;  %902 = vmatpush.bf16.msra.mxu0 %v890_v52  ;;  %921 = vmatpush.bf16.msra.mxu1 %v893_v54  ;;  %v5844_v40 = vsel %vm605_vm1, %v5825_v28, %v5823_v27  ;;  %v1250_v52 = vpack.c.bf16 %v1247_v43, %v1247_v43 }
 0x114   : > { %v5769_v50 = vunpack.i.h.bf16 %v5483_v47  ;;  %v5771_v51 = vunpack.i.l.bf16 %v5483_v47  ;;  %7983 = vst [vmem:[#allocation25_spill] sm:$0xff] %v5844_v40  ;;  %v1246_v47 = vmul.f32 %v5844_v40, %v5761_v41  ;;  %v1248_v54 = vpack.c.bf16 %v1245_v44, %v1245_v44 }
 0x115   : > { %7971 = vst [vmem:[#allocation13_spill] sm:$0xff] %v5765_v45  ;;  %v957_v55 = vmul.f32 %v5765_v45, %v5755_v36  ;;  %v955_v56 = vmul.f32 %v5767_v46, %v5758_v37  ;;  %v5782_v58 = vsel %vm801_vm4, %v5767_v46, %v5765_v45 }
 0x116   : > { %7972 = vst [vmem:[#allocation14_spill] sm:$0xff] %v5767_v46  ;;  %v956_v59 = vmul.f32 %v5782_v58, %v5761_v41  ;;  %v5792_v3 = vsel %vm701_vm3, %v5771_v51, %v5769_v50  ;;  %v1057_v6 = vmul.f32 %v5769_v50, %v5755_v36  ;;  %v1055_v7 = vmul.f32 %v5771_v51, %v5758_v37  ;;  %v467_v36 = vld [vmem:[%s7855_s3] sm:$0xff]  ;;  %v469_v37 = vld [vmem:[%s7855_s3 + $0x10] sm:$0xff] }
 0x117   : > { %7973 = vst [vmem:[#allocation15_spill] sm:$0xff] %v5769_v50  ;;  %v960_v0 = vpack.c.bf16 %v957_v55, %v957_v55  ;;  %v958_v2 = vpack.c.bf16 %v955_v56, %v955_v56  ;;  %v1056_v8 = vmul.f32 %v5792_v3, %v5761_v41  ;;  %v5830_v29 = vmul.f32 %v5769_v50, %v5819_v25  ;;  %v5346_v56 = vld [vmem:[%s7854_s2 + $0x40] sm:$0xff]  ;;  %v5345_v41 = vld [vmem:[%s7854_s2 + $0x38] sm:$0xff] }
 0x118   : > { %7974 = vst [vmem:[#allocation16_spill] sm:$0xff] %v5771_v51  ;;  %v959_v4 = vpack.c.bf16 %v956_v59, %v956_v59  ;;  %v1060_v14 = vpack.c.bf16 %v1057_v6, %v1057_v6  ;;  %v1058_v15 = vpack.c.bf16 %v1055_v7, %v1055_v7  ;;  %v5834_v30 = vmul.f32 %v5769_v50, %v5821_v26  ;;  %v470_v59 = vld [vmem:[%s7855_s3 + $0x18] sm:$0xff] }
 0x119   : > { %7975 = vst [vmem:[#allocation17_spill] sm:$0xff] %v5782_v58  ;;  %983 = vrot.lane.b32.xlu2 %v960_v0, %s5538_s25  ;;  %979 = vrot.lane.b32.xlu0 %v958_v2, %s5538_s25  ;;  %v1059_v17 = vpack.c.bf16 %v1056_v8, %v1056_v8  ;;  %v1249_v55 = vpack.c.bf16 %v1246_v47, %v1246_v47  ;;  %v7865_v0 = vmov 1   ;;  %v7867_v7 = vmov 2   ;;  %v4861_v8 = vld [vmem:[#allocation3 + $0x20] sm:$0xf] }
 0x11a   : > { %7976 = vst [vmem:[#allocation18_spill] sm:$0xff] %v5792_v3  ;;  %981 = vrot.lane.b32.xlu1 %v959_v4, %s5538_s25  ;;  %4720 = vmatmul.msk.bf16.gmra.mxu2 %vm531_vm0, %v5339_v62  ;;  %v798_v9 = vpop.permute.xlu0 %797  ;;  %v5891_v2 = vmul.f32 %v5823_v27, %v5819_v25  ;;  %v5895_v4 = vmul.f32 %v5823_v27, %v5821_v26 }
 0x11b   : > { %4722 = vmatmul.msk.bf16.gmra.mxu3 %vm531_vm0, %v5339_v62  ;;  %v800_v11 = vpop.permute.xlu1 %799  ;;  %v802_v10 = vsel %vm801_vm4, %v796_v61, %v798_v9  ;;  %7981 = vst [vmem:[#allocation23_spill] sm:$0xff] %v5830_v29  ;;  %v5347_v61 = vld [vmem:[%s7854_s2 + $0x48] sm:$0xff] }
 0x11c   : > { %v811_v12 = vand.u32 %v802_v10, %v5714_v5  ;;  %v803_v13 = vsel %vm801_vm4, %v798_v9, %v800_v11  ;;  %7982 = vst [vmem:[#allocation24_spill] sm:$0xff] %v5834_v30  ;;  %v468_v62 = vld [vmem:[%s7855_s3 + $0x8] sm:$0xff]  ;;  %v5360_v9 = vld [vmem:[#allocation3 + $0x2c] sm:$0xf0] }
 0x11d   : > { %v814_v16 = vand.u32 %v803_v13, %v5714_v5  ;;  %7984 = vst [vmem:[#allocation26_spill] sm:$0xff] %v5891_v2  ;;  %v4862_v11 = vor.u32 %v5360_v9, %v4861_v8  ;;  %v1456_v10 = vld [vmem:[#allocation3 + $0x40] sm:$0x33]  ;;  %v5357_v13 = vld [vmem:[#allocation3 + $0xc] sm:$0xf0] }
 0x11e   : > { %823 = vmatpush.bf16.msrb.mxu2 %v811_v12  ;;  %7985 = vst [vmem:[#allocation27_spill] sm:$0xff] %v5895_v4  ;;  %v4849_v12 = vld [vmem:[#allocation3] sm:$0xf]  ;;  %v1539_v21 = vunpack.c.h.b16 %v1456_v10 }
 0x11f   : > { %842 = vmatpush.bf16.msrb.mxu3 %v814_v16 }
 0x120   : > { %v1548_v24 = vpack.c.b16 %v1539_v21, %v1539_v21 }
 0x121   : > { %1083 = vrot.lane.b32.xlu2 %v1060_v14, %s5536_s23  ;;  %1079 = vrot.lane.b32.xlu0 %v1058_v15, %s5536_s23  ;;  %v1538_v14 = vunpack.c.l.b16 %v1456_v10  ;;  %v4850_v15 = vor.u32 %v5357_v13, %v4849_v12 }
 0x122   : > { %1081 = vrot.lane.b32.xlu1 %v1059_v17, %s5536_s23  ;;  %4736 = vmatmul.msk.bf16.gmra.mxu0 %vm531_vm0, %v5343_v18  ;;  %v1470_v17 = vunpack.c.l.bf16 %v1456_v10 }
 0x123   : > { %4738 = vmatmul.msk.bf16.gmra.mxu1 %vm531_vm0, %v5343_v18  ;;  %v1547_v16 = vpack.c.b16 %v1538_v14, %v1538_v14  ;;  %v1457_v18 = vld [vmem:[#allocation3 + $0x48] sm:$0x3] }
 0x124   : > { %v1540_v19 = vunpack.c.l.b16 %v1457_v18  ;;  %v1738_v20 = vmul.f32 %v5683_v49, %v1470_v17 }
 0x126   : > { %v1549_v22 = vpack.c.b16 %v1540_v19, %v1540_v19  ;;  %v1747_v23 = vpack.c.bf16 %v1738_v20, %v1738_v20  ;;  %v576_v44 = vpop.f32.mrf.mxu1 }
 0x127   : > { %v557_v43 = vpop.f32.mrf.mxu0 }
 0x129   : > { %1173 = vrot.lane.b32.xlu2 %v1168_v31, %s5543_s12  ;;  %1169 = vrot.lane.b32.xlu0 %v1166_v32, %s5543_s12  ;;  %v5912_v31 = vunpack.c.l.bf16 %v1457_v18  ;;  %v1485_v32 = vmul.f32 %v5668_v39, %v1470_v17 }
 0x12a   : > { %1171 = vrot.lane.b32.xlu1 %v1167_v33, %s5543_s12  ;;  %4751 = vmatmul.msk.bf16.vlgmr.msrb.gmra.mxu2 %vm531_vm0, %v5344_v34  ;;  %v5917_v33 = vunpack.c.h.bf16 %v1456_v10 }
 0x12b   : > { %4753 = vmatmul.msk.bf16.vlgmr.msrb.gmra.mxu3 %vm531_vm0, %v5344_v34  ;;  %7986 = vst [vmem:[#allocation28_spill] sm:$0xff] %v5912_v31  ;;  %v1740_v34 = vmul.f32 %v5681_v48, %v5912_v31 }
 0x12c   : > { %7987 = vst [vmem:[#allocation29_spill] sm:$0xff] %v5917_v33  ;;  %v1739_v47 = vmul.f32 %v5917_v33, %v5690_v53 }
 0x131   : > { %1273 = vrot.lane.b32.xlu2 %v1250_v52, %s5535_s22  ;;  %1269 = vrot.lane.b32.xlu0 %v1248_v54, %s5535_s22  ;;  %v1494_v52 = vpack.c.bf16 %v1485_v32, %v1485_v32  ;;  %v1749_v54 = vpack.c.bf16 %v1740_v34, %v1740_v34  ;;  %v5348_v34 = vld [vmem:[%s7854_s2 + $0x50] sm:$0xff] }
 0x132   : > { %1271 = vrot.lane.b32.xlu1 %v1249_v55, %s5535_s22  ;;  %4767 = vmatmul.msk.bf16.vlgmr.msra.gmra.mxu0 %vm531_vm0, %v5346_v56  ;;  %v1748_v55 = vpack.c.bf16 %v1739_v47, %v1739_v47 }
 0x133   : > { %4769 = vmatmul.msk.bf16.vlgmr.msra.gmra.mxu1 %vm531_vm0, %v5346_v56  ;;  %v1872_v56 = vmul.f32 %v5693_v57, %v1470_v17 }
 0x139   : > { %1338 = vperm.xlu2 %5493, %v467_v36   ;;  %1348 = vperm.xlu0 %5491, %v469_v37  }
 0x13a   : > { %1353 = vperm.xlu1 %5492, %v470_v59   ;;  %4752 = vmatmul.msk.bf16.gmra.mxu2 %vm531_vm0, %v5345_v41 }
 0x13b   : > { %4754 = vmatmul.msk.bf16.gmra.mxu3 %vm531_vm0, %v5345_v41  ;;  %v5932_v41 = vpop.f32.mrf.mxu0 }
 0x141   : > { %5494 = vset.pattern.permute.xlu2 %v7865_v0  ;;  %5495 = vset.pattern.permute.xlu0 %v7865_v0 }
 0x142   : > { %1397 = vperm.xlu2 %5494, %v469_v37   ;;  %1401 = vperm.xlu0 %5495, %v470_v59  }
 0x143   : > { %1343 = vperm.xlu1 %5492, %v468_v62   ;;  %4768 = vmatmul.msk.bf16.gmra.mxu0 %vm531_vm0, %v5347_v61 }
 0x144   : > { %4770 = vmatmul.msk.bf16.gmra.mxu1 %vm531_vm0, %v5347_v61  ;;  %v1881_v61 = vpack.c.bf16 %v1872_v56, %v1872_v56 }
 0x14a   : > { %5497 = vset.pattern.permute.xlu2 %v7867_v7  ;;  %5500 = vset.pattern.permute.xlu0 %v7867_v7 }
 0x14b   : > { %5496 = vset.pattern.permute.xlu1 %v7867_v7  ;;  %1425 = vperm.xlu2 %5497, %v470_v59   ;;  %v5934_v59 = vpop.f32.mrf.mxu1 }
 0x14c   : > { %1413 = vperm.xlu0 %5500, %v467_v36   ;;  %1421 = vperm.xlu1 %5496, %v469_v37   ;;  %v1486_v37 = vmul.f32 %v5917_v33, %v5675_v42 }
 0x14e   : > { %v1495_v8 = vpack.c.bf16 %v1486_v37, %v1486_v37 }
 0x153   : > { %5499 = vset.pattern.permute.xlu2 %v7865_v0  ;;  %v581_v10 = vpop.f32.mrf.mxu1 }
 0x154   : > { %1556 = vrot.lane.b32.xlu0 %v4862_v11, %s5537_s24  ;;  %5498 = vset.pattern.permute.xlu1 %v7865_v0  ;;  %v562_v11 = vpop.f32.mrf.mxu0 }
 0x155   : > { %1393 = vperm.xlu2 %5499, %v468_v62   ;;  %1389 = vperm.xlu1 %5498, %v467_v36   ;;  %v1487_v36 = vmul.f32 %v5666_v38, %v5912_v31 }
 0x156   : > { %5502 = vset.pattern.permute.xlu0 %v7863_v1 }
 0x15b   : > { %v5941_v14 = vpop.f32.mrf.mxu1 }
 0x15c   : > { %1550 = vrot.lane.b32.xlu0 %v4850_v15, %s5537_s24  ;;  %v5939_v13 = vpop.f32.mrf.mxu0 }
 0x15d   : > { %1562 = vrot.lane.b32.xlu2 %v1547_v16, %s5537_s24  ;;  %5501 = vset.pattern.permute.xlu1 %v7867_v7 }
 0x15e   : > { %1417 = vperm.xlu1 %5501, %v468_v62   ;;  %5504 = vset.pattern.permute.xlu2 %v7863_v1  ;;  %v1496_v62 = vpack.c.bf16 %v1487_v36, %v1487_v36 }
 0x164   : > { %1786 = vrot.lane.b32.xlu0 %v1747_v23, %s5540_s27 }
 0x165   : > { %1566 = vrot.lane.b32.xlu2 %v1549_v22, %s5537_s24 }
 0x166   : > { %1564 = vrot.lane.b32.xlu1 %v1548_v24, %s5537_s24 }
 0x167   : > { %5503 = vset.pattern.permute.xlu1 %v7863_v1 }
 0x16c   : > { %1660 = vrot.lane.b32.xlu0 %v1494_v52, %s5539_s26 }
 0x16d   : > { %1790 = vrot.lane.b32.xlu2 %v1749_v54, %s5540_s27 }
 0x16e   : > { %1788 = vrot.lane.b32.xlu1 %v1748_v55, %s5540_s27 }
 0x173   : > { %v984_v9 = vpop.permute.xlu2 %983 }
 0x174   : > { %1920 = vrot.lane.b32.xlu0 %v1881_v61, %s5541_s28 }
 0x175   : > { %1664 = vrot.lane.b32.xlu2 %v1496_v62, %s5539_s26 }
 0x176   : > { %1662 = vrot.lane.b32.xlu1 %v1495_v8, %s5539_s26 }
 0x17b   : > { %v1084_v12 = vpop.permute.xlu2 %1083 }
 0x183   : > { %v1174_v16 = vpop.permute.xlu2 %1173 }
 0x18b   : > { %v980_v15 = vpop.permute.xlu0 %979  ;;  %v1274_v62 = vpop.permute.xlu2 %1273 }
 0x18c   : > { %v982_v17 = vpop.permute.xlu1 %981 }
 0x18d   : > { %v986_v18 = vsel %vm766_vm13, %v980_v15, %v982_v17  ;;  %v987_v19 = vsel %vm766_vm13, %v982_v17, %v984_v9  ;;  %v629_v20 = vpop.f32.mrf.mxu2  ;;  %v648_v21 = vpop.f32.mrf.mxu3  ;;  %v5350_v15 = vld [vmem:[%s7854_s2 + $0x60] sm:$0xff] }
 0x18e   : > { %v995_v22 = vand.u32 %v986_v18, %v5714_v5  ;;  %v998_v23 = vand.u32 %v987_v19, %v5714_v5  ;;  %v630_v24 = vadd.f32 %v629_v20, %v557_v43  ;;  %v649_v32 = vadd.f32 %v648_v21, %v576_v44 }
 0x18f   : > { %v725_v47 = vpop.f32.mrf.mxu0  ;;  %v744_v52 = vpop.f32.mrf.mxu1 }
 0x190   : > { %1007 = vmatpush.bf16.msra.mxu2 %v995_v22  ;;  %1026 = vmatpush.bf16.msra.mxu3 %v998_v23  ;;  %v5950_v54 = vadd.f32 %v725_v47, %v630_v24  ;;  %v5952_v55 = vadd.f32 %v744_v52, %v649_v32  ;;  %v5349_v47 = vld [vmem:[%s7854_s2 + $0x58] sm:$0xff] }
 0x193   : > { %v1080_v56 = vpop.permute.xlu0 %1079  ;;  %4783 = vmatmul.msk.bf16.vlgmr.msra.gmra.mxu2 %vm531_vm0, %v5348_v34  ;;  %4785 = vmatmul.msk.bf16.vlgmr.msra.gmra.mxu3 %vm531_vm0, %v5348_v34 }
 0x194   : > { %v1082_v36 = vpop.permute.xlu1 %1081 }
 0x195   : > { %v1086_v43 = vsel %vm666_vm12, %v1080_v56, %v1082_v36  ;;  %v1087_v44 = vsel %vm666_vm12, %v1082_v36, %v1084_v12  ;;  %v5958_v37 = vpop.f32.mrf.mxu2  ;;  %v5960_v61 = vpop.f32.mrf.mxu3 }
 0x196   : > { %v1095_v8 = vand.u32 %v1086_v43, %v5714_v5  ;;  %v1098_v9 = vand.u32 %v1087_v44, %v5714_v5  ;;  %v632_v38 = vadd.f32 %v5958_v37, %v5932_v41  ;;  %v651_v39 = vadd.f32 %v5960_v61, %v5934_v59 }
 0x197   : > { %v5967_v17 = vpop.f32.mrf.mxu0  ;;  %v5969_v18 = vpop.f32.mrf.mxu1 }
 0x198   : > { %1107 = vmatpush.bf16.msrb.mxu0 %v1095_v8  ;;  %1126 = vmatpush.bf16.msrb.mxu1 %v1098_v9  ;;  %v756_v48 = vadd.f32 %v5967_v17, %v632_v38  ;;  %v757_v49 = vadd.f32 %v5969_v18, %v651_v39 }
 0x19b   : > { %4799 = vmatmul.msk.bf16.vlgmr.msrb.gmra.mxu0 %vm531_vm0, %v5350_v15  ;;  %4801 = vmatmul.msk.bf16.vlgmr.msrb.gmra.mxu1 %vm531_vm0, %v5350_v15  ;;  %v1170_v12 = vpop.permute.xlu0 %1169 }
 0x19c   : > { %v1172_v19 = vpop.permute.xlu1 %1171 }
 0x19d   : > { %v1177_v20 = vsel %vm1175_vm5, %v1172_v19, %v1174_v16  ;;  %v1176_v21 = vsel %vm1175_vm5, %v1170_v12, %v1172_v19  ;;  %v634_v22 = vpop.f32.mrf.mxu2  ;;  %v5982_v16 = vpop.permute.xlu2 %1338  ;;  %v5351_v19 = vld [vmem:[%s7854_s2 + $0x68] sm:$0xff] }
 0x19e   : > { %v1188_v23 = vand.u32 %v1177_v20, %v5714_v5  ;;  %v1185_v24 = vand.u32 %v1176_v21, %v5714_v5  ;;  %v635_v32 = vadd.f32 %v634_v22, %v562_v11  ;;  %v653_v34 = vpop.f32.mrf.mxu3 }
 0x19f   : > { %v654_v52 = vadd.f32 %v653_v34, %v581_v10  ;;  %v730_v56 = vpop.f32.mrf.mxu0 }
 0x1a0   : > { %v5980_v36 = vadd.f32 %v730_v56, %v635_v32  ;;  %v749_v43 = vpop.f32.mrf.mxu1  ;;  %1197 = vmatpush.bf16.msrb.mxu2 %v1185_v24  ;;  %1216 = vmatpush.bf16.msrb.mxu3 %v1188_v23  ;;  %v5354_v32 = vld [vmem:[%s7854_s2 + $0x80] sm:$0xff] }
 0x1a1   : > { %v5984_v44 = vadd.f32 %v749_v43, %v654_v52  ;;  %v5353_v52 = vld [vmem:[%s7854_s2 + $0x78] sm:$0xff] }
 0x1a3   : > { %4784 = vmatmul.msk.bf16.gmra.mxu2 %vm531_vm0, %v5349_v47  ;;  %4786 = vmatmul.msk.bf16.gmra.mxu3 %vm531_vm0, %v5349_v47  ;;  %v1270_v11 = vpop.permute.xlu0 %1269 }
 0x1a4   : > { %v1272_v8 = vpop.permute.xlu1 %1271 }
 0x1a5   : > { %v1277_v9 = vsel %vm484_vm11, %v1272_v8, %v1274_v62  ;;  %v1276_v10 = vsel %vm484_vm11, %v1270_v11, %v1272_v8  ;;  %v5995_v20 = vpop.permute.xlu2 %1397  ;;  %v5355_v11 = vld [vmem:[%s7854_s2 + $0x88] sm:$0xff]  ;;  %v6055_v6 = vpop.f32.mrf.mxu2 }
 0x1a6   : > { %v1288_v15 = vand.u32 %v1277_v9, %v5714_v5  ;;  %v1285_v12 = vand.u32 %v1276_v10, %v5714_v5  ;;  %7988 = vst [vmem:[#allocation30_spill] sm:$0xff] %v5995_v20  ;;  %v5352_v5 = vld [vmem:[%s7854_s2 + $0x70] sm:$0xff]  ;;  %v6057_v35 = vpop.f32.mrf.mxu3 }
 0x1a7   : > { %v6059_v1 = vpop.f32.mrf.mxu0 }
 0x1a8   : > { %1316 = vmatpush.bf16.msra.mxu1 %v1288_v15  ;;  %1297 = vmatpush.bf16.msra.mxu0 %v1285_v12 }
 0x1ab   : > { %4800 = vmatmul.msk.bf16.gmra.mxu0 %vm531_vm0, %v5351_v19  ;;  %4802 = vmatmul.msk.bf16.gmra.mxu1 %vm531_vm0, %v5351_v19  ;;  %v5999_v21 = vpop.permute.xlu0 %1348 }
 0x1ac   : > { %7989 = vst [vmem:[#allocation31_spill] sm:$0xff] %v5999_v21  ;;  %v6001_v62 = vpop.permute.xlu1 %1353 }
 0x1ad   : > { %7990 = vst [vmem:[#allocation32_spill] sm:$0xff] %v6001_v62  ;;  %v6008_v22 = vpop.permute.xlu2 %1425  ;;  %v825_v25 = vpop.f32.mrf.mxu2 }
 0x1ae   : > { %7991 = vst [vmem:[#allocation33_spill] sm:$0xff] %v6008_v22  ;;  %v854_v3 = vadd.f32 %v825_v25, %v5950_v54 }
 0x1b3   : > { %4815 = vmatmul.msk.bf16.vlgmr.msrb.gmra.mxu2 %vm531_vm0, %v5352_v5  ;;  %4817 = vmatmul.msk.bf16.vlgmr.msrb.gmra.mxu3 %vm531_vm0, %v5352_v5 }
 0x1b4   : > { %v6012_v24 = vpop.permute.xlu0 %1401 }
 0x1b5   : > { %v6010_v23 = vpop.permute.xlu1 %1343  ;;  %7992 = vst [vmem:[#allocation34_spill] sm:$0xff] %v6012_v24  ;;  %v6021_v47 = vpop.permute.xlu2 %1393 }
 0x1bb   : > { %4831 = vmatmul.msk.bf16.vlgmr.msra.gmra.mxu0 %vm531_vm0, %v5354_v32  ;;  %4833 = vmatmul.msk.bf16.vlgmr.msra.gmra.mxu1 %vm531_vm0, %v5354_v32 }
 0x1bd   : > { %v6035_v8 = vpop.permute.xlu2 %1562 }
 0x1be   : > { %v6019_v34 = vpop.permute.xlu1 %1421  ;;  %v6026_v56 = vpop.permute.xlu0 %1413  ;;  %7994 = vst [vmem:[#allocation36_spill] sm:$0xff] %v6035_v8 }
 0x1bf   : > { %7993 = vst [vmem:[#allocation35_spill] sm:$0xff] %v6019_v34 }
 0x1c3   : > { %4816 = vmatmul.msk.bf16.gmra.mxu2 %vm531_vm0, %v5353_v52  ;;  %4818 = vmatmul.msk.bf16.gmra.mxu3 %vm531_vm0, %v5353_v52 }
 0x1c5   : > { %v6043_v15 = vpop.permute.xlu2 %1566 }
 0x1c6   : > { %v6037_v9 = vpop.permute.xlu0 %1556  ;;  %7996 = vst [vmem:[#allocation38_spill] sm:$0xff] %v6043_v15 }
 0x1c7   : > { %v6030_v43 = vpop.permute.xlu1 %1389  ;;  %7995 = vst [vmem:[#allocation37_spill] sm:$0xff] %v6037_v9 }
 0x1cb   : > { %4832 = vmatmul.msk.bf16.gmra.mxu0 %vm531_vm0, %v5355_v11  ;;  %4834 = vmatmul.msk.bf16.gmra.mxu1 %vm531_vm0, %v5355_v11  ;;  %v6061_v11 = vpop.f32.mrf.mxu1 }
 0x1cd   : > { %v6049_v5 = vpop.permute.xlu2 %1790 }
 0x1ce   : > { %v6045_v12 = vpop.permute.xlu0 %1550  ;;  %7999 = vst [vmem:[#allocation41_spill] sm:$0xff] %v6049_v5  ;;  %v904_v5 = vpop.f32.mrf.mxu0 }
 0x1cf   : > { %7997 = vst [vmem:[#allocation39_spill] sm:$0xff] %v6045_v12  ;;  %v844_v12 = vpop.f32.mrf.mxu3  ;;  %v933_v46 = vadd.f32 %v904_v5, %v854_v3 }
 0x1d0   : > { %v6041_v10 = vpop.permute.xlu1 %1417  ;;  %v855_v53 = vadd.f32 %v844_v12, %v5952_v55 }
 0x1d5   : > { %v1665_v0 = vpop.permute.xlu2 %1664 }
 0x1d6   : > { %v6051_v32 = vpop.permute.xlu0 %1786  ;;  %v906_v27 = vpop.f32.mrf.mxu0 }
 0x1d7   : > { %8000 = vst [vmem:[#allocation42_spill] sm:$0xff] %v6051_v32  ;;  %v923_v32 = vpop.f32.mrf.mxu1  ;;  %v846_v9 = vpop.f32.mrf.mxu3 }
 0x1d8   : > { %v6047_v19 = vpop.permute.xlu1 %1564  ;;  %v934_v62 = vadd.f32 %v923_v32, %v855_v53  ;;  %v857_v25 = vadd.f32 %v846_v9, %v757_v49 }
 0x1d9   : > { %7998 = vst [vmem:[#allocation40_spill] sm:$0xff] %v6047_v19 }
 0x1de   : > { %v1661_v7 = vpop.permute.xlu0 %1660  ;;  %v909_v8 = vpop.f32.mrf.mxu0 }
 0x1df   : > { %v925_v45 = vpop.f32.mrf.mxu1  ;;  %v849_v50 = vpop.f32.mrf.mxu3 }
 0x1e0   : > { %v6053_v52 = vpop.permute.xlu1 %1788  ;;  %v936_v38 = vadd.f32 %v925_v45, %v857_v25  ;;  %v859_v45 = vadd.f32 %v849_v50, %v5984_v44 }
 0x1e1   : > { %8001 = vst [vmem:[#allocation43_spill] sm:$0xff] %v6053_v52  ;;  %v827_v52 = vpop.f32.mrf.mxu2 }
 0x1e2   : > { %v856_v61 = vadd.f32 %v827_v52, %v756_v48  ;;  %v656_v48 = vadd.f32 %v6057_v35, %v5941_v14 }
 0x1e4   : > { %v935_v12 = vadd.f32 %v906_v27, %v856_v61 }
 0x1e8   : > { %v1663_v2 = vpop.permute.xlu1 %1662 }
 0x1e9   : > { %v1670_v4 = vsel %vm605_vm1, %v1661_v7, %v1663_v2  ;;  %v1671_v29 = vsel %vm605_vm1, %v1663_v2, %v1665_v0  ;;  %v830_v15 = vpop.f32.mrf.mxu2  ;;  %v928_v7 = vpop.f32.mrf.mxu1 }
 0x1ea   : > { %v1683_v30 = vsel %vm407_vm2, %v1670_v4, 0  ;;  %v1686_v26 = vsel %vm407_vm2, %v1671_v29, 0  ;;  %v6069_v0 = vpop.f32.mrf.mxu3  ;;  %v6071_v2 = vpop.f32.mrf.mxu0  ;;  %v858_v49 = vadd.f32 %v830_v15, %v5980_v36  ;;  %v938_v35 = vadd.f32 %v928_v7, %v859_v45 }
 0x1eb   : > { %1693 = vmatpush.bf16.msrb.mxu0 %v1683_v30  ;;  %1712 = vmatpush.bf16.msrb.mxu1 %v1686_v26 }
 0x1f1   : > { %v6067_v19 = vpop.f32.mrf.mxu2  ;;  %v6073_v29 = vpop.f32.mrf.mxu1 }
 0x216   : > { %v1009_v26 = vpop.f32.mrf.mxu2  ;;  %v1028_v30 = vpop.f32.mrf.mxu3 }
 0x217   : > { %v1038_v37 = vadd.f32 %v1009_v26, %v933_v46  ;;  %v1039_v59 = vadd.f32 %v1028_v30, %v934_v62  ;;  %v637_v46 = vadd.f32 %v6055_v6, %v5939_v13  ;;  %v761_v6 = vadd.f32 %v6061_v11, %v656_v48 }
 0x218   : > { %v1109_v4 = vpop.f32.mrf.mxu0  ;;  %v1128_v40 = vpop.f32.mrf.mxu1  ;;  %v937_v13 = vadd.f32 %v909_v8, %v858_v49 }
 0x219   : > { %v1138_v54 = vadd.f32 %v1109_v4, %v1038_v37  ;;  %v1139_v55 = vadd.f32 %v1128_v40, %v1039_v59  ;;  %v760_v9 = vadd.f32 %v6059_v1, %v637_v46  ;;  %v861_v8 = vadd.f32 %v6069_v0, %v761_v6 }
 0x21b   : > { %v860_v11 = vadd.f32 %v6067_v19, %v760_v9  ;;  %v940_v0 = vadd.f32 %v6073_v29, %v861_v8  ;;  %v8003_v9 = vld [vmem:[#allocation30_spill] sm:$0xff] }
 0x21d   : > { %v939_v19 = vadd.f32 %v6071_v2, %v860_v11 }
 0x21e   : > { %v1011_v33 = vpop.f32.mrf.mxu2  ;;  %v1030_v63 = vpop.f32.mrf.mxu3 }
 0x21f   : > { %v1040_v20 = vadd.f32 %v1011_v33, %v935_v12  ;;  %v1041_v21 = vadd.f32 %v1030_v63, %v936_v38 }
 0x220   : > { %v1111_v60 = vpop.f32.mrf.mxu0  ;;  %v1130_v31 = vpop.f32.mrf.mxu1 }
 0x221   : > { %v1140_v33 = vadd.f32 %v1111_v60, %v1040_v20  ;;  %v1141_v63 = vadd.f32 %v1130_v31, %v1041_v21 }
 0x226   : > { %v1014_v28 = vpop.f32.mrf.mxu2  ;;  %v1033_v57 = vpop.f32.mrf.mxu3 }
 0x227   : > { %v1042_v26 = vadd.f32 %v1014_v28, %v937_v13 }
 0x228   : > { %v6075_v58 = vpop.f32.mrf.mxu0  ;;  %v6077_v42 = vpop.f32.mrf.mxu1 }
 0x229   : > { %v1142_v28 = vadd.f32 %v6075_v58, %v1042_v26 }
 0x22e   : > { %v6087_v22 = vpop.f32.mrf.mxu2  ;;  %v6089_v24 = vpop.f32.mrf.mxu3 }
 0x22f   : > { %v1044_v58 = vadd.f32 %v6087_v22, %v939_v19 }
 0x230   : > { %v6091_v51 = vpop.f32.mrf.mxu0  ;;  %v6093_v41 = vpop.f32.mrf.mxu1 }
 0x231   : > { %v1144_v22 = vadd.f32 %v6091_v51, %v1044_v58  ;;  %v8008_v58 = vld [vmem:[#allocation34_spill] sm:$0xff] }
 0x236   : > { %v1199_v17 = vpop.f32.mrf.mxu2  ;;  %v1218_v39 = vpop.f32.mrf.mxu3 }
 0x237   : > { %v1228_v18 = vadd.f32 %v1199_v17, %v1138_v54  ;;  %v1229_v34 = vadd.f32 %v1218_v39, %v1139_v55 }
 0x238   : > { %v1299_v3 = vpop.f32.mrf.mxu0  ;;  %v1318_v53 = vpop.f32.mrf.mxu1 }
 0x239   : > { %v1328_v5 = vadd.f32 %v1299_v3, %v1228_v18  ;;  %v1329_v32 = vadd.f32 %v1318_v53, %v1229_v34 }
 0x23b   : > { %v1356_v27 = vadd.f32 %v5982_v16, %v1328_v5  ;;  %v1357_v40 = vadd.f32 %v5982_v16, %v1329_v32  ;;  %v1043_v16 = vadd.f32 %v1033_v57, %v938_v35  ;;  %v8002_v32 = vld [vmem:[#allocation31_spill] sm:$0xff] }
 0x23d   : > { %vm1364_vm6 = vcmp.ge.f32.partialorder %v1356_v27, 0.0  ;;  %v1372_v62 = vmul.f32 0.01, %v1356_v27  ;;  %vm1365_vm7 = vcmp.ge.f32.partialorder %v1357_v40, 0.0  ;;  %v1373_v34 = vmul.f32 0.01, %v1357_v40 }
 0x23e   : > { %v1201_v14 = vpop.f32.mrf.mxu2  ;;  %v1220_v36 = vpop.f32.mrf.mxu3 }
 0x23f   : > { %v1380_v15 = vsel %vm1364_vm6, %v1356_v27, %v1372_v62  ;;  %v1381_v50 = vsel %vm1365_vm7, %v1357_v40, %v1373_v34  ;;  %v1230_v44 = vadd.f32 %v1201_v14, %v1140_v33  ;;  %v1231_v52 = vadd.f32 %v1220_v36, %v1141_v63 }
 0x240   : > { %v1404_v60 = vmul.f32 %v6030_v43, %v1380_v15  ;;  %v1405_v31 = vmul.f32 %v6030_v43, %v1381_v50  ;;  %v1301_v20 = vpop.f32.mrf.mxu0  ;;  %v1320_v21 = vpop.f32.mrf.mxu1  ;;  %v1143_v43 = vadd.f32 %v6077_v42, %v1043_v16  ;;  %v1045_v42 = vadd.f32 %v6089_v24, %v940_v0  ;;  %v8004_v15 = vld [vmem:[#allocation35_spill] sm:$0xff]  ;;  %v8006_v16 = vld [vmem:[#allocation32_spill] sm:$0xff] }
 0x241   : > { %v1330_v30 = vadd.f32 %v1301_v20, %v1230_v44  ;;  %v1331_v1 = vadd.f32 %v1320_v21, %v1231_v52  ;;  %v8005_v52 = vld [vmem:[#allocation16_spill] sm:$0xff]  ;;  %vm1578_vm7 = vcmask 293888  }
 0x242   : > { %v1428_v7 = vadd.f32 %v6026_v56, %v1404_v60  ;;  %v1429_v4 = vadd.f32 %v6026_v56, %v1405_v31  ;;  %v1145_v24 = vadd.f32 %v6093_v41, %v1045_v42  ;;  %v8026_v0 = vld [vmem:[#allocation36_spill] sm:$0xff] }
 0x243   : > { %v1358_v37 = vadd.f32 %v6010_v23, %v1330_v30  ;;  %v1359_v57 = vadd.f32 %v6010_v23, %v1331_v1 }
 0x244   : > { %v1436_v59 = vpack.c.bf16 %v1429_v4, %v1428_v7  ;;  %v8007_v7 = vld [vmem:[#allocation14_spill] sm:$0xff] }
 0x245   : > { %vm1366_vm8 = vcmp.ge.f32.partialorder %v1358_v37, 0.0  ;;  %v1374_v61 = vmul.f32 0.01, %v1358_v37  ;;  %vm1367_vm9 = vcmp.ge.f32.partialorder %v1359_v57, 0.0  ;;  %v1375_v25 = vmul.f32 0.01, %v1359_v57 }
 0x246   : > { %1440 = vst [vmem:[#allocation3 + $0x4] sm:$0xff] %v1436_v59  ;;  %v1204_v54 = vpop.f32.mrf.mxu2  ;;  %v1223_v56 = vpop.f32.mrf.mxu3  ;;  %v6131_v35 = vunpack.c.l.bf16 %v1436_v59 }
 0x247   : > { %v1382_v55 = vsel %vm1366_vm8, %v1358_v37, %v1374_v61  ;;  %v1383_v12 = vsel %vm1367_vm9, %v1359_v57, %v1375_v25  ;;  %v1232_v38 = vadd.f32 %v1204_v54, %v1142_v28  ;;  %v1233_v23 = vadd.f32 %v1223_v56, %v1143_v43 }
 0x248   : > { %v1406_v17 = vmul.f32 %v6021_v47, %v1382_v55  ;;  %v1407_v39 = vmul.f32 %v6021_v47, %v1383_v12  ;;  %v1304_v18 = vpop.f32.mrf.mxu0  ;;  %v1323_v3 = vpop.f32.mrf.mxu1  ;;  %v6147_v8 = vmul.f32 %v8005_v52, %v6131_v35  ;;  %v6151_v4 = vmul.f32 %v8007_v7, %v6131_v35 }
 0x249   : > { %v1332_v2 = vadd.f32 %v1304_v18, %v1232_v38  ;;  %v1333_v53 = vadd.f32 %v1323_v3, %v1233_v23  ;;  %v6153_v37 = vunpack.c.h.bf16 %v1436_v59 }
 0x24a   : > { %v1430_v29 = vadd.f32 %v6041_v10, %v1406_v17  ;;  %v1431_v5 = vadd.f32 %v6041_v10, %v1407_v39 }
 0x24b   : > { %v1360_v46 = vadd.f32 %v8002_v32, %v1332_v2  ;;  %v1361_v48 = vadd.f32 %v8002_v32, %v1333_v53 }
 0x24c   : > { %v1437_v49 = vpack.c.bf16 %v1431_v5, %v1430_v29  ;;  %v8009_v5 = vld [vmem:[#allocation33_spill] sm:$0xff] }
 0x24d   : > { %vm1368_vm10 = vcmp.ge.f32.partialorder %v1360_v46, 0.0  ;;  %v1376_v45 = vmul.f32 0.01, %v1360_v46  ;;  %vm1369_vm14 = vcmp.ge.f32.partialorder %v1361_v48, 0.0  ;;  %v1377_v47 = vmul.f32 0.01, %v1361_v48 }
 0x24e   : > { %1441 = vst [vmem:[#allocation3 + $0x14] sm:$0xff] %v1437_v49  ;;  %v1206_v27 = vpop.f32.mrf.mxu2  ;;  %v1225_v40 = vpop.f32.mrf.mxu3  ;;  %v6127_v33 = vunpack.c.l.bf16 %v1437_v49  ;;  %v1448_v20 = vld [vmem:[#allocation3] sm:$0xff]  ;;  %v4857_v30 = vld [vmem:[#allocation3 + $0x8] sm:$0xf]  ;;  %v6164_v59 = vunpack.c.h.bf16 %v1437_v49 }
 0x24f   : > { %v1384_v63 = vsel %vm1368_vm10, %v1360_v46, %v1376_v45  ;;  %v1385_v10 = vsel %vm1369_vm14, %v1361_v48, %v1377_v47  ;;  %v1234_v62 = vadd.f32 %v1206_v27, %v1144_v22  ;;  %v1235_v34 = vadd.f32 %v1225_v40, %v1145_v24  ;;  %v5356_v1 = vld [vmem:[#allocation3 + $0x4] sm:$0xf]  ;;  %v6143_v11 = vld [vmem:[#allocation3 + $0x8] sm:$0xff]   ;;  %v8010_v48 = vld [vmem:[#allocation8_spill] sm:$0xff] }
 0x250   : > { %v1408_v6 = vmul.f32 %v8003_v9, %v1384_v63  ;;  %v1409_v51 = vmul.f32 %v8003_v9, %v1385_v10  ;;  %v1306_v13 = vpop.f32.mrf.mxu0  ;;  %v1325_v41 = vpop.f32.mrf.mxu1  ;;  %v6137_v26 = vmul.f32 %v8005_v52, %v6127_v33  ;;  %v6156_v19 = vunpack.c.l.bf16 %v1448_v20  ;;  %v8011_v49 = vld [vmem:[#allocation7_spill] sm:$0xff]  ;;  %v8012_v47 = vld [vmem:[#allocation9_spill] sm:$0xff]  ;;  %v8013_v40 = vld [vmem:[#allocation18_spill] sm:$0xff] }
 0x251   : > { %v1334_v14 = vadd.f32 %v1306_v13, %v1234_v62  ;;  %v1335_v36 = vadd.f32 %v1325_v41, %v1235_v34  ;;  %v6162_v54 = vmul.f32 %v8007_v7, %v6127_v33  ;;  %v6176_v3 = vunpack.c.l.bf16 %v6143_v11 }
 0x252   : > { %v1432_v50 = vadd.f32 %v8004_v15, %v1408_v6  ;;  %v1433_v44 = vadd.f32 %v8004_v15, %v1409_v51  ;;  %v6178_v2 = vunpack.c.h.bf16 %v1448_v20  ;;  %v1726_v22 = vmul.f32 %v8010_v48, %v6156_v19 }
 0x253   : > { %v1362_v60 = vadd.f32 %v8006_v16, %v1334_v14  ;;  %v1363_v31 = vadd.f32 %v8006_v16, %v1335_v36  ;;  %v6195_v63 = vmul.f32 %v6164_v59, %v8013_v40  ;;  %v1728_v34 = vmul.f32 %v8011_v49, %v6176_v3  ;;  %v8014_v36 = vld [vmem:[#allocation5_spill] sm:$0xff]  ;;  %v8015_v16 = vld [vmem:[#allocation4_spill] sm:$0xff] }
 0x254   : > { %v6141_v21 = vpack.c.bf16 %v1433_v44, %v1432_v50  ;;  %v1727_v9 = vmul.f32 %v6178_v2, %v8012_v47  ;;  %v6203_v6 = vmul.f32 %v6153_v37, %v8013_v40  ;;  %v1473_v44 = vmul.f32 %v8014_v36, %v6156_v19 }
 0x255   : > { %vm1370_vm0 = vcmp.ge.f32.partialorder %v1362_v60, 0.0  ;;  %v1378_v57 = vmul.f32 0.01, %v1362_v60  ;;  %vm1371_vm6 = vcmp.ge.f32.partialorder %v1363_v31, 0.0  ;;  %v1379_v28 = vmul.f32 0.01, %v1363_v31 }
 0x256   : > { %1442 = vst [vmem:[#allocation3 + $0x24] sm:$0xff] %v6141_v21  ;;  %v5358_v43 = vld [vmem:[#allocation3 + $0x14] sm:$0xf0]  ;;  %v4851_v61 = vld [vmem:[#allocation3 + $0x10] sm:$0xf0]  ;;  %v2113_v14 = vunpack.c.l.bf16 %v6141_v21 }
 0x257   : > { %v1450_v25 = vld [vmem:[#allocation3 + $0x10] sm:$0xff]  ;;  %v1386_v56 = vsel %vm1370_vm0, %v1362_v60, %v1378_v57  ;;  %v1387_v55 = vsel %vm1371_vm6, %v1363_v31, %v1379_v28  ;;  %v4858_v12 = vor.u32 %v5358_v43, %v4857_v30  ;;  %v4854_v38 = vor.u32 %v5356_v1, %v4851_v61  ;;  %v6166_v23 = vld [vmem:[#allocation3 + $0x18] sm:$0xff]   ;;  %v8016_v31 = vld [vmem:[#allocation6_spill] sm:$0xff] }
 0x258   : > { %v1410_v42 = vmul.f32 %v8008_v58, %v1386_v56  ;;  %v1411_v17 = vmul.f32 %v8008_v58, %v1387_v55  ;;  %v1461_v39 = vunpack.c.l.bf16 %v1450_v25  ;;  %v6171_v18 = vunpack.c.l.bf16 %v6166_v23  ;;  %v8017_v28 = vld [vmem:[#allocation17_spill] sm:$0xff] }
 0x259   : > { %1554 = vrot.lane.b32.xlu2 %v4858_v12, %s5537_s24  ;;  %1552 = vrot.lane.b32.xlu1 %v4854_v38, %s5537_s24  ;;  %v6180_v53 = vunpack.c.h.bf16 %v1450_v25  ;;  %v6219_v30 = vmul.f32 %v8005_v52, %v2113_v14  ;;  %v6226_v43 = vmul.f32 %v6153_v37, %v8017_v28  ;;  %v6230_v61 = vmul.f32 %v6164_v59, %v8017_v28 }
 0x25a   : > { %v1434_v32 = vadd.f32 %v8009_v5, %v1410_v42  ;;  %v1435_v46 = vadd.f32 %v8009_v5, %v1411_v17  ;;  %v1729_v24 = vmul.f32 %v8010_v48, %v1461_v39  ;;  %v1731_v45 = vmul.f32 %v8011_v49, %v6171_v18 }
 0x25b   : > { %v1730_v27 = vmul.f32 %v6180_v53, %v8012_v47  ;;  %v1476_v15 = vmul.f32 %v8014_v36, %v1461_v39  ;;  %v1478_v60 = vmul.f32 %v8015_v16, %v6171_v18  ;;  %v1477_v20 = vmul.f32 %v6180_v53, %v8016_v31 }
 0x25c   : > { %v1439_v10 = vpack.c.bf16 %v1435_v46, %v1434_v32  ;;  %v1741_v62 = vpack.c.bf16 %v1729_v24, %v1726_v22  ;;  %v1743_v51 = vpack.c.bf16 %v1731_v45, %v1728_v34  ;;  %v1475_v56 = vmul.f32 %v8015_v16, %v6176_v3  ;;  %v8018_v32 = vld [vmem:[#allocation10_spill] sm:$0xff] }
 0x25d   : > { %v1742_v13 = vpack.c.bf16 %v1730_v27, %v1727_v9  ;;  %v1488_v57 = vpack.c.bf16 %v1476_v15, %v1473_v44  ;;  %v1474_v55 = vmul.f32 %v6178_v2, %v8016_v31  ;;  %v6242_v38 = vmul.f32 %v8007_v7, %v2113_v14  ;;  %v1452_v45 = vld [vmem:[#allocation3 + $0x20] sm:$0xff] }
 0x25e   : > { %1443 = vst [vmem:[#allocation3 + $0x34] sm:$0xff] %v1439_v10  ;;  %1774 = vrot.lane.b32.xlu0 %v1741_v62, %s5540_s27  ;;  %v2116_v50 = vunpack.c.l.bf16 %v1439_v10  ;;  %v1490_v58 = vpack.c.bf16 %v1478_v60, %v1475_v56  ;;  %v1863_v46 = vmul.f32 %v8018_v32, %v1461_v39  ;;  %v1860_v24 = vmul.f32 %v8018_v32, %v6156_v19  ;;  %v4869_v39 = vld [vmem:[#allocation3 + $0x28] sm:$0xf]  ;;  %v5359_v15 = vld [vmem:[#allocation3 + $0x24] sm:$0xf] }
 0x25f   : > { %v1489_v42 = vpack.c.bf16 %v1477_v20, %v1474_v55  ;;  %v2114_v27 = vunpack.c.h.bf16 %v6141_v21  ;;  %v2117_v62 = vunpack.c.h.bf16 %v1439_v10  ;;  %v6258_v44 = vunpack.c.l.bf16 %v1452_v45  ;;  %v8019_v60 = vld [vmem:[#allocation22_spill] sm:$0xff] }
 0x260   : > { %v6222_v1 = vmul.f32 %v8005_v52, %v2116_v50  ;;  %v6233_v25 = vmul.f32 %v8007_v7, %v2116_v50  ;;  %v1875_v34 = vpack.c.bf16 %v1863_v46, %v1860_v24  ;;  %v6262_v20 = vmul.f32 %v8019_v60, %v6131_v35 }
 0x261   : > { %1778 = vrot.lane.b32.xlu2 %v1743_v51, %s5540_s27  ;;  %1776 = vrot.lane.b32.xlu1 %v1742_v13, %s5540_s27  ;;  %v6265_v21 = vmul.f32 %v2114_v27, %v8013_v40  ;;  %v6268_v10 = vmul.f32 %v2117_v62, %v8013_v40  ;;  %v6273_v55 = vmul.f32 %v2114_v27, %v8017_v28 }
 0x262   : > { %v6280_v35 = vmul.f32 %v8019_v60, %v6127_v33  ;;  %v6287_v46 = vmul.f32 %v8019_v60, %v2113_v14  ;;  %v6290_v24 = vmul.f32 %v8019_v60, %v2116_v50  ;;  %v8024_v50 = vld [vmem:[#allocation25_spill] sm:$0xff] }
 0x263   : > { %v6306_v5 = vmul.f32 %v6153_v37, %v8024_v50  ;;  %v6310_v17 = vmul.f32 %v6164_v59, %v8024_v50  ;;  %v1453_v37 = vld [vmem:[#allocation3 + $0x28] sm:$0xff]  }
 0x265   : > { %v1454_v22 = vld [vmem:[#allocation3 + $0x30] sm:$0xff]  ;;  %v5361_v9 = vld [vmem:[#allocation3 + $0x34] sm:$0xf0] }
 0x266   : > { %1648 = vrot.lane.b32.xlu0 %v1488_v57, %s5539_s26  ;;  %v4863_v51 = vld [vmem:[#allocation3 + $0x30] sm:$0xf0]  ;;  %v6255_v13 = vunpack.c.l.bf16 %v1454_v22  ;;  %v4870_v19 = vor.u32 %v5361_v9, %v4869_v39  ;;  %v6313_v39 = vmul.f32 %v2114_v27, %v8024_v50  ;;  %v1479_v27 = vmul.f32 %v8014_v36, %v6258_v44 }
 0x267   : > { %v4866_v57 = vor.u32 %v5359_v15, %v4863_v51  ;;  %v8020_v9 = vld [vmem:[#allocation28_spill] sm:$0xff]  ;;  %v8021_v51 = vld [vmem:[#allocation11_spill] sm:$0xff]  ;;  %v6316_v15 = vmul.f32 %v2117_v62, %v8024_v50 }
 0x268   : > { %v1735_v56 = vmul.f32 %v8010_v48, %v6255_v13  ;;  %v1874_v33 = vmul.f32 %v8021_v51, %v8020_v9  ;;  %v1482_v59 = vmul.f32 %v8014_v36, %v6255_v13 }
 0x269   : > { %1652 = vrot.lane.b32.xlu2 %v1490_v58, %s5539_s26  ;;  %1650 = vrot.lane.b32.xlu1 %v1489_v42, %s5539_s26  ;;  %v6276_v58 = vmul.f32 %v2117_v62, %v8017_v28  ;;  %v1865_v62 = vmul.f32 %v8021_v51, %v6171_v18 }
 0x26a   : > { %v1883_v14 = vpack.c.bf16 %v1874_v33, %v1874_v33  ;;  %v1491_v33 = vpack.c.bf16 %v1482_v59, %v1479_v27 }
 0x26e   : > { %1908 = vrot.lane.b32.xlu0 %v1875_v34, %s5541_s28  ;;  %v1732_v34 = vmul.f32 %v8010_v48, %v6258_v44 }
 0x270   : > { %v1744_v9 = vpack.c.bf16 %v1735_v56, %v1732_v34  ;;  %v6333_v34 = vld [vmem:[#allocation3 + $0x44] sm:$0x33] }
 0x271   : > { %1560 = vrot.lane.b32.xlu2 %v4870_v19, %s5537_s24  ;;  %1558 = vrot.lane.b32.xlu1 %v4866_v57, %s5537_s24  ;;  %v8022_v19 = vld [vmem:[#allocation12_spill] sm:$0xff]  ;;  %v8023_v57 = vld [vmem:[#allocation29_spill] sm:$0xff] }
 0x272   : > { %v1873_v42 = vmul.f32 %v8023_v57, %v8022_v19  ;;  %v1864_v56 = vmul.f32 %v6180_v53, %v8022_v19  ;;  %v1468_v53 = vunpack.c.h.bf16 %v1454_v22 }
 0x274   : > { %v1882_v12 = vpack.c.bf16 %v1873_v42, %v1873_v42  ;;  %v1455_v42 = vld [vmem:[#allocation3 + $0x38] sm:$0xff]  }
 0x275   : > { %v6343_v41 = vunpack.c.l.bf16 %v1455_v42 }
 0x276   : > { %1780 = vrot.lane.b32.xlu0 %v1744_v9, %s5540_s27  ;;  %v1862_v9 = vmul.f32 %v8021_v51, %v6176_v3  ;;  %v6349_v3 = vunpack.c.l.bf16 %v1453_v37 }
 0x277   : > { %v1737_v27 = vmul.f32 %v8011_v49, %v6343_v41 }
 0x278   : > { %v1877_v18 = vpack.c.bf16 %v1865_v62, %v1862_v9  ;;  %v1481_v29 = vmul.f32 %v8015_v16, %v6349_v3 }
 0x279   : > { %1924 = vrot.lane.b32.xlu2 %v1883_v14, %s5541_s28  ;;  %1922 = vrot.lane.b32.xlu1 %v1882_v12, %s5541_s28  ;;  %v1861_v14 = vmul.f32 %v6178_v2, %v8022_v19  ;;  %v6341_v12 = vunpack.c.l.bf16 %v6333_v34  ;;  %v1465_v2 = vunpack.c.h.bf16 %v1452_v45  ;;  %v1484_v45 = vmul.f32 %v8015_v16, %v6343_v41 }
 0x27b   : > { %v1876_v57 = vpack.c.bf16 %v1864_v56, %v1861_v14  ;;  %v2268_v59 = vmul.f32 %v8005_v52, %v6341_v12  ;;  %v1734_v56 = vmul.f32 %v8011_v49, %v6349_v3  ;;  %v1733_v22 = vmul.f32 %v1465_v2, %v8012_v47  ;;  %v8029_v49 = vld [vmem:[#allocation13_spill] sm:$0xff] }
 0x27d   : > { %v2277_v62 = vpack.c.bf16 %v2268_v59, %v2268_v59  ;;  %v1746_v9 = vpack.c.bf16 %v1737_v27, %v1734_v56  ;;  %v6369_v27 = vld [vmem:[#allocation3 + $0x4c] sm:$0x3] }
 0x27e   : > { %1654 = vrot.lane.b32.xlu0 %v1491_v33, %s5539_s26  ;;  %v1736_v33 = vmul.f32 %v1468_v53, %v8012_v47 }
 0x280   : > { %v1745_v14 = vpack.c.bf16 %v1736_v33, %v1733_v22  ;;  %v1493_v33 = vpack.c.bf16 %v1484_v45, %v1481_v29  ;;  %v1869_v22 = vmul.f32 %v8018_v32, %v6255_v13  ;;  %v8027_v45 = vld [vmem:[#allocation15_spill] sm:$0xff] }
 0x281   : > { %1912 = vrot.lane.b32.xlu2 %v1877_v18, %s5541_s28  ;;  %1910 = vrot.lane.b32.xlu1 %v1876_v57, %s5541_s28  ;;  %v2134_v57 = vmul.f32 %v8007_v7, %v6341_v12  ;;  %v1483_v18 = vmul.f32 %v1468_v53, %v8016_v31 }
 0x283   : > { %v2143_v59 = vpack.c.bf16 %v2134_v57, %v2134_v57  ;;  %v1866_v57 = vmul.f32 %v8018_v32, %v6258_v44  ;;  %v8028_v44 = vld [vmem:[#allocation38_spill] sm:$0xff] }
 0x286   : > { %2316 = vrot.lane.b32.xlu0 %v2277_v62, %s5536_s23  ;;  %v1480_v62 = vmul.f32 %v1465_v2, %v8016_v31 }
 0x288   : > { %v1492_v56 = vpack.c.bf16 %v1483_v18, %v1480_v62  ;;  %v1878_v62 = vpack.c.bf16 %v1869_v22, %v1866_v57  ;;  %v8030_v57 = vpack.c.bf16 %v6137_v26, %v6147_v8  ;;  %v1867_v8 = vmul.f32 %v1465_v2, %v8022_v19 }
 0x289   : > { %1784 = vrot.lane.b32.xlu2 %v1746_v9, %s5540_s27  ;;  %1782 = vrot.lane.b32.xlu1 %v1745_v14, %s5540_s27  ;;  %v6376_v9 = vunpack.c.l.bf16 %v6369_v27  ;;  %v2120_v14 = vunpack.c.h.bf16 %v6333_v34  ;;  %v1868_v2 = vmul.f32 %v8021_v51, %v6349_v3  ;;  %v8033_v3 = vpack.c.bf16 %v6222_v1, %v6219_v30 }
 0x28b   : > { %v2270_v18 = vmul.f32 %v8027_v45, %v6376_v9  ;;  %v2269_v13 = vmul.f32 %v2120_v14, %v8013_v40  ;;  %v2136_v32 = vmul.f32 %v8029_v49, %v6376_v9  ;;  %v2135_v22 = vmul.f32 %v2120_v14, %v8017_v28 }
 0x28c   : > { %v2538_v1 = vmul.f32 %v2120_v14, %v8024_v50 }
 0x28d   : > { %v2278_v47 = vpack.c.bf16 %v2269_v13, %v2269_v13  ;;  %v2144_v13 = vpack.c.bf16 %v2135_v22, %v2135_v22 }
 0x28e   : > { %2182 = vrot.lane.b32.xlu0 %v2143_v59, %s5538_s25  ;;  %v8025_v59 = vld [vmem:[#allocation40_spill] sm:$0xff] }
 0x28f   : > { %v1572_v29 = vsel %vm528_vm15, %v8026_v0, %v8025_v59  ;;  %v1573_v0 = vsel %vm528_vm15, %v8025_v59, %v8028_v44 }
 0x291   : > { %1658 = vrot.lane.b32.xlu2 %v1493_v33, %s5539_s26  ;;  %1656 = vrot.lane.b32.xlu1 %v1492_v56, %s5539_s26  ;;  %v1586_v33 = vsel %vm407_vm2, %v1572_v29, 0  ;;  %v2279_v56 = vpack.c.bf16 %v2270_v18, %v2270_v18  ;;  %v1589_v29 = vsel %vm407_vm2, %v1573_v0, 0  ;;  %v2145_v18 = vpack.c.bf16 %v2136_v32, %v2136_v32 }
 0x292   : > { %1596 = vmatpush.bf16.msra.mxu2 %v1586_v33  ;;  %1615 = vmatpush.bf16.msra.mxu3 %v1589_v29  ;;  %v1870_v33 = vmul.f32 %v1468_v53, %v8022_v19  ;;  %v8031_v32 = vpack.c.bf16 %v6162_v54, %v6151_v4  ;;  %v1871_v53 = vmul.f32 %v8021_v51, %v6343_v41 }
 0x293   : > { %v8032_v54 = vpack.c.bf16 %v6195_v63, %v6203_v6  ;;  %v8034_v63 = vpack.c.bf16 %v6230_v61, %v6226_v43  ;;  %v6451_v6 = vunpack.c.h.bf16 %v6143_v11  ;;  %v2427_v43 = vunpack.c.l.b16 %v6333_v34 }
 0x294   : > { %v1880_v4 = vpack.c.bf16 %v1871_v53, %v1868_v2  ;;  %v2547_v11 = vpack.c.bf16 %v2538_v1, %v2538_v1 }
 0x296   : > { %1914 = vrot.lane.b32.xlu0 %v1878_v62, %s5541_s28  ;;  %v6402_v62 = vunpack.c.h.bf16 %v1455_v42 }
 0x298   : > { %v2267_v59 = vmul.f32 %v8027_v45, %v6402_v62  ;;  %v2133_v0 = vmul.f32 %v8029_v49, %v6402_v62 }
 0x299   : > { %2320 = vrot.lane.b32.xlu2 %v2279_v56, %s5536_s23  ;;  %2318 = vrot.lane.b32.xlu1 %v2278_v47, %s5536_s23  ;;  %v6406_v47 = vunpack.c.h.bf16 %v1453_v37  ;;  %v1879_v56 = vpack.c.bf16 %v1870_v33, %v1867_v8  ;;  %v2537_v37 = vmul.f32 %v8019_v60, %v6341_v12  ;;  %v2124_v33 = vmul.f32 %v8029_v49, %v6451_v6  ;;  %v5380_v8 = vld [vmem:[#allocation3 + $0x30] sm:$0xf0] }
 0x29b   : > { %v2264_v26 = vmul.f32 %v8027_v45, %v6406_v47  ;;  %v2546_v44 = vpack.c.bf16 %v2537_v37, %v2537_v37  ;;  %v2130_v41 = vmul.f32 %v8029_v49, %v6406_v47  ;;  %v8037_v37 = vld [vmem:[#allocation21_spill] sm:$0xff] }
 0x29c   : > { %v2539_v53 = vmul.f32 %v8037_v37, %v6376_v9 }
 0x29d   : > { %v2276_v42 = vpack.c.bf16 %v2267_v59, %v2264_v26  ;;  %v2142_v22 = vpack.c.bf16 %v2133_v0, %v2130_v41  ;;  %v8036_v26 = vpack.c.bf16 %v6268_v10, %v6265_v21  ;;  %v8038_v21 = vpack.c.bf16 %v6276_v58, %v6273_v55 }
 0x29e   : > { %2304 = vrot.lane.b32.xlu0 %v8030_v57, %s5536_s23  ;;  %v6443_v57 = vunpack.c.h.bf16 %v6166_v23  ;;  %v2258_v23 = vmul.f32 %v8027_v45, %v6451_v6  ;;  %v2548_v2 = vpack.c.bf16 %v2539_v53, %v2539_v53  ;;  %v2429_v10 = vunpack.c.l.b16 %v6369_v27  ;;  %v5011_v27 = vld [vmem:[#allocation3 + $0x34] sm:$0xf0] }
 0x29f   : > { %v8044_v53 = vld [vmem:[#allocation41_spill] sm:$0xff] }
 0x2a0   : > { %v2261_v30 = vmul.f32 %v8027_v45, %v6443_v57  ;;  %v2127_v14 = vmul.f32 %v8029_v49, %v6443_v57  ;;  %v2438_v41 = vpack.c.b16 %v2429_v10, %v2429_v10 }
 0x2a1   : > { %2186 = vrot.lane.b32.xlu2 %v2145_v18, %s5538_s25  ;;  %2184 = vrot.lane.b32.xlu1 %v2144_v13, %s5538_s25  ;;  %v8035_v18 = vpack.c.bf16 %v6233_v25, %v6242_v38  ;;  %v2436_v13 = vpack.c.b16 %v2427_v43, %v2427_v43  ;;  %v6474_v38 = vpop.permute.xlu0 %1920  ;;  %v5377_v43 = vld [vmem:[#allocation3 + $0x10] sm:$0xf0] }
 0x2a2   : > { %v2273_v61 = vpack.c.bf16 %v2261_v30, %v2258_v23  ;;  %v2139_v25 = vpack.c.bf16 %v2127_v14, %v2124_v33  ;;  %v2533_v30 = vmul.f32 %v8037_v37, %v6406_v47  ;;  %v4997_v47 = vld [vmem:[#allocation3 + $0x4] sm:$0xf]  ;;  %v8041_v33 = vld [vmem:[#allocation37_spill] sm:$0xff] }
 0x2a3   : > { %v4998_v14 = vor.u32 %v5377_v43, %v4997_v47  ;;  %v1998_v43 = vld [vmem:[#allocation3 + $0x44] sm:$0x33] }
 0x2a4   : > { %v2027_v47 = vunpack.c.l.b16 %v1998_v43 }
 0x2a6   : > { %2170 = vrot.lane.b32.xlu0 %v8031_v32, %s5538_s25 }
 0x2a9   : > { %2314 = vrot.lane.b32.xlu2 %v2276_v42, %s5536_s23  ;;  %1916 = vrot.lane.b32.xlu1 %v1879_v56, %s5541_s28  ;;  %v5009_v56 = vld [vmem:[#allocation3 + $0x24] sm:$0xf] }
 0x2ae   : > { %2585 = vrot.lane.b32.xlu0 %v2546_v44, %s5535_s22  ;;  %v5010_v44 = vor.u32 %v5380_v8, %v5009_v56  ;;  %v8043_v8 = vld [vmem:[#allocation42_spill] sm:$0xff] }
 0x2b1   : > { %1918 = vrot.lane.b32.xlu2 %v1880_v4, %s5541_s28  ;;  %2306 = vrot.lane.b32.xlu1 %v8032_v54, %s5536_s23  ;;  %v2428_v54 = vunpack.c.h.b16 %v6333_v34  ;;  %v2536_v34 = vmul.f32 %v8037_v37, %v6402_v62  ;;  %v5017_v62 = vld [vmem:[#allocation3 + $0x2c] sm:$0xf] }
 0x2b3   : > { %v6432_v12 = vpop.permute.xlu2 %1554  ;;  %v2545_v1 = vpack.c.bf16 %v2536_v34, %v2533_v30  ;;  %v2530_v34 = vmul.f32 %v8037_v37, %v6443_v57  ;;  %v8047_v30 = vpack.c.bf16 %v6316_v15, %v6313_v39  ;;  %v5365_v39 = vld [vmem:[%s7856_s4 + $0x18] sm:$0xff] }
 0x2b6   : > { %2310 = vrot.lane.b32.xlu0 %v8033_v3, %s5536_s23  ;;  %v2437_v3 = vpack.c.b16 %v2428_v54, %v2428_v54 }
 0x2b9   : > { %2180 = vrot.lane.b32.xlu2 %v2142_v22, %s5538_s25  ;;  %2172 = vrot.lane.b32.xlu1 %v8034_v63, %s5538_s25  ;;  %v8039_v22 = vpack.c.bf16 %v6280_v35, %v6262_v20  ;;  %v8040_v20 = vpack.c.bf16 %v6290_v24, %v6287_v46  ;;  %v5379_v35 = vld [vmem:[#allocation3 + $0x28] sm:$0xf] }
 0x2ba   : > { %v5014_v23 = vor.u32 %v5379_v35, %v5011_v27  ;;  %v5378_v35 = vld [vmem:[#allocation3 + $0x18] sm:$0xf0] }
 0x2bb   : > { %v6453_v29 = vpop.permute.xlu2 %1778 }
 0x2be   : > { %2176 = vrot.lane.b32.xlu0 %v8035_v18, %s5538_s25 }
 0x2c1   : > { %2308 = vrot.lane.b32.xlu2 %v2273_v61, %s5536_s23  ;;  %2587 = vrot.lane.b32.xlu1 %v2547_v11, %s5535_s22  ;;  %v5381_v61 = vld [vmem:[#allocation3 + $0x38] sm:$0xf0] }
 0x2c3   : > { %v6467_v59 = vpop.permute.xlu2 %1652 }
 0x2c6   : > { %2451 = vrot.lane.b32.xlu0 %v2436_v13, %s5543_s12 }
 0x2c9   : > { %2174 = vrot.lane.b32.xlu2 %v2139_v25, %s5538_s25  ;;  %2312 = vrot.lane.b32.xlu1 %v8036_v26, %s5536_s23  ;;  %v5018_v25 = vor.u32 %v5381_v61, %v5017_v62  ;;  %v8042_v26 = vld [vmem:[#allocation43_spill] sm:$0xff] }
 0x2ca   : > { %v1796_v56 = vsel %vm701_vm3, %v8043_v8, %v8042_v26  ;;  %v5376_v61 = vld [vmem:[#allocation3 + $0x8] sm:$0xf] }
 0x2cb   : > { %v1561_v32 = vpop.permute.xlu2 %1560  ;;  %v1553_v42 = vpop.permute.xlu1 %1552 }
 0x2cc   : > { %v1569_v54 = vsel %vm528_vm15, %v1553_v42, %v6432_v12  ;;  %v2527_v12 = vmul.f32 %v8037_v37, %v6451_v6 }
 0x2ce   : > { %2445 = vrot.lane.b32.xlu0 %v5010_v44, %s5543_s12  ;;  %v1797_v44 = vsel %vm701_vm3, %v8042_v26, %v8044_v53 }
 0x2d0   : > { %v6484_v4 = vpop.permute.xlu0 %1774 }
 0x2d1   : > { %2589 = vrot.lane.b32.xlu2 %v2548_v2, %s5535_s22  ;;  %2178 = vrot.lane.b32.xlu1 %v8038_v21, %s5538_s25  ;;  %v8046_v21 = vld [vmem:[#allocation39_spill] sm:$0xff] }
 0x2d2   : > { %v1568_v10 = vsel %vm528_vm15, %v8046_v21, %v1553_v42  ;;  %v2542_v42 = vpack.c.bf16 %v2530_v34, %v2527_v12  ;;  %v5371_v12 = vld [vmem:[#allocation3 + $0x10] sm:$0xf0] }
 0x2d3   : > { %v6493_v0 = vpop.permute.xlu2 %1924  ;;  %v6495_v9 = vpop.permute.xlu1 %1776 }
 0x2d6   : > { %2573 = vrot.lane.b32.xlu0 %v8039_v22, %s5535_s22  ;;  %v1812_v22 = vsel %vm407_vm2, %v1797_v44, 0  ;;  %v1792_v44 = vsel %vm701_vm3, %v6484_v4, %v6495_v9 }
 0x2d8   : > { %v6501_v63 = vpop.permute.xlu0 %1648 }
 0x2d9   : > { %2455 = vrot.lane.b32.xlu2 %v2438_v41, %s5543_s12  ;;  %2453 = vrot.lane.b32.xlu1 %v2437_v3, %s5543_s12  ;;  %v5364_v41 = vld [vmem:[%s7856_s4 + $0x10] sm:$0xff]  ;;  %v1809_v3 = vsel %vm407_vm2, %v1796_v56, 0 }
 0x2db   : > { %v6505_v55 = vpop.permute.xlu2 %1912  ;;  %v6507_v58 = vpop.permute.xlu1 %1650 }
 0x2de   : > { %2579 = vrot.lane.b32.xlu0 %v8040_v20, %s5535_s22  ;;  %v5005_v20 = vld [vmem:[#allocation3 + $0xc] sm:$0xf] }
 0x2df   : > { %v5006_v62 = vor.u32 %v5378_v35, %v5005_v20  ;;  %v4933_v20 = vld [vmem:[#allocation3 + $0x4] sm:$0xf]  ;;  %v5370_v35 = vld [vmem:[#allocation3 + $0x8] sm:$0xf] }
 0x2e0   : > { %v6517_v18 = vpop.permute.xlu0 %1908 }
 0x2e1   : > { %2583 = vrot.lane.b32.xlu2 %v2545_v1, %s5535_s22  ;;  %2447 = vrot.lane.b32.xlu1 %v5014_v23, %s5543_s12  ;;  %v4999_v23 = vld [vmem:[#allocation3 + $0x14] sm:$0xf0] }
 0x2e2   : > { %v5002_v6 = vor.u32 %v5376_v61, %v4999_v23  ;;  %v4934_v23 = vor.u32 %v5371_v12, %v4933_v20 }
 0x2e3   : > { %v1785_v11 = vpop.permute.xlu2 %1784  ;;  %v1559_v13 = vpop.permute.xlu1 %1558 }
 0x2e4   : > { %v1570_v46 = vsel %vm528_vm15, %v8041_v33, %v1559_v13  ;;  %v1571_v24 = vsel %vm528_vm15, %v1559_v13, %v1561_v32  ;;  %v8045_v32 = vpack.c.bf16 %v6310_v17, %v6306_v5 }
 0x2e5   : > { %1597 = vmatpush.bf16.msra.mxu2 %v1570_v46  ;;  %1616 = vmatpush.bf16.msra.mxu3 %v1571_v24 }
 0x2e6   : > { %2439 = vrot.lane.b32.xlu0 %v4998_v14, %s5543_s12  ;;  %v2028_v14 = vunpack.c.h.b16 %v1998_v43 }
 0x2e8   : > { %v1781_v2 = vpop.permute.xlu0 %1780  ;;  %v2034_v26 = vpack.c.b16 %v2028_v14, %v2028_v14 }
 0x2e9   : > { %2449 = vrot.lane.b32.xlu2 %v5018_v25, %s5543_s12  ;;  %2575 = vrot.lane.b32.xlu1 %v8045_v32, %s5535_s22  ;;  %v2033_v25 = vpack.c.b16 %v2027_v47, %v2027_v47  ;;  %v4943_v32 = vld [vmem:[#allocation3 + $0x34] sm:$0xf0] }
 0x2ea   : > { %1598 = vmatpush.bf16.msra.mxu2 %v1568_v10  ;;  %1617 = vmatpush.bf16.msra.mxu3 %v1569_v54  ;;  %v2049_v53 = vsel %vm407_vm2, %v2034_v26, 0 }
 0x2eb   : > { %v1659_v17 = vpop.permute.xlu2 %1658  ;;  %v1923_v5 = vpop.permute.xlu1 %1922  ;;  %v2046_v56 = vsel %vm407_vm2, %v2033_v25, 0 }
 0x2ed   : > { %4871 = vmatmul.msk.bf16.vlgmr.msra.gmra.mxu2 %vm1578_vm7, %v5364_v41  ;;  %4873 = vmatmul.msk.bf16.vlgmr.msra.gmra.mxu3 %vm1578_vm7, %v5364_v41 }
 0x2ee   : > { %1819 = vmatpush.bf16.msrb.mxu2 %v1809_v3  ;;  %1838 = vmatpush.bf16.msrb.mxu3 %v1812_v22  ;;  %v4941_v3 = vld [vmem:[#allocation3 + $0x24] sm:$0xf]  ;;  %v5372_v22 = vld [vmem:[#allocation3 + $0x28] sm:$0xf] }
 0x2ef   : > { %v4946_v34 = vor.u32 %v5372_v22, %v4943_v32 }
 0x2f0   : > { %v1655_v27 = vpop.permute.xlu0 %1654 }
 0x2f1   : > { %2577 = vrot.lane.b32.xlu2 %v2542_v42, %s5535_s22  ;;  %2581 = vrot.lane.b32.xlu1 %v8047_v30, %s5535_s22  ;;  %v4935_v42 = vld [vmem:[#allocation3 + $0x14] sm:$0xf0] }
 0x2f2   : > { %v4938_v43 = vor.u32 %v5370_v35, %v4935_v42 }
 0x2f3   : > { %v6556_v1 = vpop.permute.xlu2 %2320  ;;  %v6558_v57 = vpop.permute.xlu1 %1910 }
 0x2f8   : > { %v2317_v13 = vpop.permute.xlu0 %2316 }
 0x2f9   : > { %2441 = vrot.lane.b32.xlu1 %v5002_v6, %s5543_s12  ;;  %2443 = vrot.lane.b32.xlu2 %v5006_v62, %s5543_s12 }
 0x2fb   : > { %v6565_v15 = vpop.permute.xlu2 %2186  ;;  %v1783_v33 = vpop.permute.xlu1 %1782 }
 0x2fc   : > { %v1794_v46 = vsel %vm701_vm3, %v1781_v2, %v1783_v33  ;;  %v1795_v24 = vsel %vm701_vm3, %v1783_v33, %v1785_v11  ;;  %v1793_v11 = vsel %vm701_vm3, %v6495_v9, %v6453_v29  ;;  %v5373_v2 = vld [vmem:[#allocation3 + $0x30] sm:$0xf0]  ;;  %v1930_v29 = vsel %vm801_vm4, %v6474_v38, %v1923_v5  ;;  %v5362_v38 = vld [vmem:[%s7856_s4] sm:$0xff]  ;;  %v5367_v33 = vld [vmem:[%s7856_s4 + $0x28] sm:$0xff] }
 0x2fd   : > { %4872 = vmatmul.msk.bf16.gmra.mxu2 %vm1578_vm7, %v5365_v39  ;;  %4874 = vmatmul.msk.bf16.gmra.mxu3 %vm1578_vm7, %v5365_v39  ;;  %v4942_v4 = vor.u32 %v5373_v2, %v4941_v3  ;;  %v1931_v9 = vsel %vm801_vm4, %v1923_v5, %v6493_v0  ;;  %v1943_v0 = vsel %vm407_vm2, %v1930_v29, 0  ;;  %v1927_v2 = vsel %vm801_vm4, %v6558_v57, %v6505_v55  ;;  %v5375_v29 = vld [vmem:[%s7856_s4 + $0x48] sm:$0xff] }
 0x2fe   : > { %1820 = vmatpush.bf16.msrb.mxu2 %v1794_v46  ;;  %1839 = vmatpush.bf16.msrb.mxu3 %v1795_v24  ;;  %v1946_v5 = vsel %vm407_vm2, %v1931_v9, 0 }
 0x300   : > { %v6571_v8 = vpop.permute.xlu0 %2182 }
 0x302   : > { %1821 = vmatpush.bf16.msrb.mxu2 %v1792_v44  ;;  %1840 = vmatpush.bf16.msrb.mxu3 %v1793_v11  ;;  %v1926_v11 = vsel %vm801_vm4, %v6517_v18, %v6558_v57  ;;  %v5374_v18 = vld [vmem:[%s7856_s4 + $0x40] sm:$0xff] }
 0x303   : > { %v6581_v21 = vpop.permute.xlu2 %2314  ;;  %v1657_v10 = vpop.permute.xlu1 %1656 }
 0x304   : > { %v1668_v54 = vsel %vm605_vm1, %v1655_v27, %v1657_v10  ;;  %v1669_v41 = vsel %vm605_vm1, %v1657_v10, %v1659_v17  ;;  %v1666_v17 = vsel %vm605_vm1, %v6501_v63, %v6507_v58  ;;  %v1667_v27 = vsel %vm605_vm1, %v6507_v58, %v6467_v59  ;;  %v5366_v63 = vld [vmem:[%s7856_s4 + $0x20] sm:$0xff] }
 0x305   : > { %1694 = vmatpush.bf16.msrb.mxu0 %v1668_v54  ;;  %1713 = vmatpush.bf16.msrb.mxu1 %v1669_v41 }
 0x306   : > { %2056 = vmatpush.bf16.msra.mxu2 %v2046_v56  ;;  %2075 = vmatpush.bf16.msra.mxu3 %v2049_v53 }
 0x308   : > { %v1915_v30 = vpop.permute.xlu0 %1914 }
 0x309   : > { %1695 = vmatpush.bf16.msrb.mxu0 %v1666_v17  ;;  %1714 = vmatpush.bf16.msrb.mxu1 %v1667_v27 }
 0x30a   : > { %2057 = vmatpush.bf16.msra.mxu2 %v4942_v4  ;;  %2076 = vmatpush.bf16.msra.mxu3 %v4946_v34  ;;  %v5369_v4 = vld [vmem:[%s7856_s4 + $0x38] sm:$0xff] }
 0x30b   : > { %v2319_v59 = vpop.permute.xlu1 %2318  ;;  %v1919_v61 = vpop.permute.xlu2 %1918 }
 0x30c   : > { %v2326_v58 = vsel %vm666_vm12, %v2317_v13, %v2319_v59  ;;  %v2327_v62 = vsel %vm666_vm12, %v2319_v59, %v6556_v1  ;;  %4883 = vmatmul.msk.bf16.vlgmr.msrb.gmra.mxu0 %vm1578_vm7, %v5362_v38  ;;  %4885 = vmatmul.msk.bf16.vlgmr.msrb.gmra.mxu1 %vm1578_vm7, %v5362_v38  ;;  %v5363_v1 = vld [vmem:[%s7856_s4 + $0x8] sm:$0xff] }
 0x30d   : > { %1953 = vmatpush.bf16.msra.mxu0 %v1943_v0  ;;  %1972 = vmatpush.bf16.msra.mxu1 %v1946_v5  ;;  %v2339_v6 = vsel %vm407_vm2, %v2326_v58, 0  ;;  %v2342_v47 = vsel %vm407_vm2, %v2327_v62, 0  ;;  %v5382_v58 = vld [vmem:[%s7856_s4 + $0x50] sm:$0xff] }
 0x30e   : > { %2058 = vmatpush.bf16.msra.mxu2 %v4934_v23  ;;  %2077 = vmatpush.bf16.msra.mxu3 %v4938_v43 }
 0x30f   : > { %4899 = vmatmul.msk.bf16.vlgmr.msrb.gmra.mxu2 %vm1578_vm7, %v5366_v63  ;;  %4901 = vmatmul.msk.bf16.vlgmr.msrb.gmra.mxu3 %vm1578_vm7, %v5366_v63 }
 0x310   : > { %v2305_v14 = vpop.permute.xlu0 %2304 }
 0x312   : > { %2349 = vmatpush.bf16.msrb.mxu2 %v2339_v6  ;;  %2368 = vmatpush.bf16.msrb.mxu3 %v2342_v47  ;;  %v6684_v6 = vld [vmem:[%s7857_s5 + $0x18] sm:$0xff] }
 0x313   : > { %v2185_v13 = vpop.permute.xlu1 %2184  ;;  %v6612_v39 = vpop.permute.xlu2 %2180  ;;  %2676 = vperm.xlu1 %5503, %v6684_v6  }
 0x314   : > { %v2192_v56 = vsel %vm766_vm13, %v6571_v8, %v2185_v13  ;;  %v2193_v53 = vsel %vm766_vm13, %v2185_v13, %v6565_v15  ;;  %v5368_v15 = vld [vmem:[%s7856_s4 + $0x30] sm:$0xff] }
 0x315   : > { %v2205_v32 = vsel %vm407_vm2, %v2192_v56, 0  ;;  %v2208_v10 = vsel %vm407_vm2, %v2193_v53, 0 }
 0x318   : > { %v6620_v46 = vpop.permute.xlu0 %2170 }
 0x31b   : > { %v1917_v24 = vpop.permute.xlu1 %1916  ;;  %v2309_v44 = vpop.permute.xlu2 %2308 }
 0x31c   : > { %4884 = vmatmul.msk.bf16.gmra.mxu0 %vm1578_vm7, %v5363_v1  ;;  %4886 = vmatmul.msk.bf16.gmra.mxu1 %vm1578_vm7, %v5363_v1  ;;  %v1928_v25 = vsel %vm801_vm4, %v1915_v30, %v1917_v24  ;;  %v1929_v26 = vsel %vm801_vm4, %v1917_v24, %v1919_v61  ;;  %v5384_v61 = vld [vmem:[%s7856_s4 + $0x60] sm:$0xff]  ;;  %v1446_v24 = vld [vmem:[%s7857_s5 + $0x10] sm:$0xff] }
 0x31d   : > { %1954 = vmatpush.bf16.msra.mxu0 %v1928_v25  ;;  %1973 = vmatpush.bf16.msra.mxu1 %v1929_v26 }
 0x31e   : > { %2671 = vperm.xlu0 %5502, %v1446_v24  }
 0x31f   : > { %4900 = vmatmul.msk.bf16.gmra.mxu2 %vm1578_vm7, %v5367_v33  ;;  %4902 = vmatmul.msk.bf16.gmra.mxu3 %vm1578_vm7, %v5367_v33 }
 0x320   : > { %v2586_v54 = vpop.permute.xlu0 %2585 }
 0x321   : > { %1955 = vmatpush.bf16.msra.mxu0 %v1926_v11  ;;  %1974 = vmatpush.bf16.msra.mxu1 %v1927_v2  ;;  %v5383_v11 = vld [vmem:[%s7856_s4 + $0x58] sm:$0xff]  ;;  %v5385_v2 = vld [vmem:[%s7856_s4 + $0x68] sm:$0xff] }
 0x323   : > { %v2307_v8 = vpop.permute.xlu1 %2306  ;;  %v2175_v41 = vpop.permute.xlu2 %2174 }
 0x324   : > { %v2322_v20 = vsel %vm666_vm12, %v2305_v14, %v2307_v8  ;;  %v2323_v35 = vsel %vm666_vm12, %v2307_v8, %v2309_v44 }
 0x325   : > { %2215 = vmatpush.bf16.msrb.mxu0 %v2205_v32  ;;  %2234 = vmatpush.bf16.msrb.mxu1 %v2208_v10  ;;  %v8048_v32 = vmov 2   ;;  %v8049_v10 = vmov 1  }
 0x326   : > { %5506 = vset.pattern.permute.xlu0 %v8049_v10 }
 0x327   : > { %2724 = vperm.xlu0 %5506, %v6684_v6  }
 0x328   : > { %v2311_v57 = vpop.permute.xlu0 %2310 }
 0x32b   : > { %v2173_v55 = vpop.permute.xlu1 %2172  ;;  %v2590_v22 = vpop.permute.xlu2 %2589 }
 0x32c   : > { %4915 = vmatmul.msk.bf16.vlgmr.msra.gmra.mxu0 %vm1578_vm7, %v5368_v15  ;;  %4917 = vmatmul.msk.bf16.vlgmr.msra.gmra.mxu1 %vm1578_vm7, %v5368_v15  ;;  %v2188_v63 = vsel %vm766_vm13, %v6620_v46, %v2173_v55  ;;  %v2189_v59 = vsel %vm766_vm13, %v2173_v55, %v2175_v41  ;;  %v6698_v46 = vld [vmem:[%s7857_s5 + $0x8] sm:$0xff] }
 0x32d   : > { %2666 = vperm.xlu1 %5503, %v6698_v46  }
 0x32f   : > { %4947 = vmatmul.msk.bf16.vlgmr.msra.gmra.mxu2 %vm1578_vm7, %v5374_v18  ;;  %4949 = vmatmul.msk.bf16.vlgmr.msra.gmra.mxu3 %vm1578_vm7, %v5374_v18  ;;  %v1444_v18 = vld [vmem:[%s7857_s5] sm:$0xff] }
 0x330   : > { %v2177_v34 = vpop.permute.xlu0 %2176  ;;  %2661 = vperm.xlu2 %5504, %v1444_v18   ;;  %5511 = vset.pattern.permute.xlu0 %v8048_v32 }
 0x331   : > { %2736 = vperm.xlu0 %5511, %v1444_v18  }
 0x333   : > { %v2588_v3 = vpop.permute.xlu1 %2587  ;;  %v2456_v30 = vpop.permute.xlu2 %2455 }
 0x334   : > { %v2595_v17 = vsel %vm484_vm11, %v2586_v54, %v2588_v3  ;;  %v2596_v27 = vsel %vm484_vm11, %v2588_v3, %v2590_v22 }
 0x335   : > { %v2608_v38 = vsel %vm407_vm2, %v2595_v17, 0  ;;  %5507 = vset.pattern.permute.xlu1 %v8048_v32  ;;  %v5386_v17 = vld [vmem:[%s7856_s4 + $0x70] sm:$0xff] }
 0x336   : > { %2744 = vperm.xlu1 %5507, %v1446_v24  }
 0x338   : > { %v2452_v0 = vpop.permute.xlu0 %2451  ;;  %5505 = vset.pattern.permute.xlu2 %v8049_v10 }
 0x339   : > { %2720 = vperm.xlu2 %5505, %v1446_v24  }
 0x33b   : > { %v2313_v9 = vpop.permute.xlu1 %2312  ;;  %v2584_v62 = vpop.permute.xlu2 %2583 }
 0x33c   : > { %4916 = vmatmul.msk.bf16.gmra.mxu0 %vm1578_vm7, %v5369_v4  ;;  %4918 = vmatmul.msk.bf16.gmra.mxu1 %vm1578_vm7, %v5369_v4  ;;  %v2324_v12 = vsel %vm666_vm12, %v2311_v57, %v2313_v9  ;;  %v2325_v42 = vsel %vm666_vm12, %v2313_v9, %v6581_v21  ;;  %v2611_v21 = vsel %vm407_vm2, %v2596_v27, 0 }
 0x33d   : > { %2350 = vmatpush.bf16.msrb.mxu2 %v2324_v12  ;;  %2369 = vmatpush.bf16.msrb.mxu3 %v2325_v42 }
 0x33e   : > { %5509 = vset.pattern.permute.xlu1 %v8049_v10 }
 0x33f   : > { %4948 = vmatmul.msk.bf16.gmra.mxu2 %vm1578_vm7, %v5375_v29  ;;  %4950 = vmatmul.msk.bf16.gmra.mxu3 %vm1578_vm7, %v5375_v29 }
 0x340   : > { %2712 = vperm.xlu1 %5509, %v1444_v18  }
 0x341   : > { %2351 = vmatpush.bf16.msrb.mxu2 %v2322_v20  ;;  %2370 = vmatpush.bf16.msrb.mxu3 %v2323_v35 }
 0x342   : > { %5508 = vset.pattern.permute.xlu2 %v8048_v32 }
 0x343   : > { %v2179_v5 = vpop.permute.xlu1 %2178  ;;  %v2450_v25 = vpop.permute.xlu2 %2449  ;;  %2748 = vperm.xlu2 %5508, %v6684_v6  }
 0x344   : > { %v2190_v23 = vsel %vm766_vm13, %v2177_v34, %v2179_v5  ;;  %v2191_v43 = vsel %vm766_vm13, %v2179_v5, %v6612_v39  ;;  %v2446_v39 = vpop.permute.xlu0 %2445  ;;  %v5388_v34 = vld [vmem:[%s7856_s4 + $0x80] sm:$0xff] }
 0x345   : > { %2618 = vmatpush.bf16.msra.mxu2 %v2608_v38  ;;  %2637 = vmatpush.bf16.msra.mxu3 %v2611_v21  ;;  %v5389_v21 = vld [vmem:[%s7856_s4 + $0x88] sm:$0xff] }
 0x346   : > { %2216 = vmatpush.bf16.msrb.mxu0 %v2190_v23  ;;  %2235 = vmatpush.bf16.msrb.mxu1 %v2191_v43 }
 0x348   : > { %5512 = vset.pattern.permute.xlu1 %v8048_v32 }
 0x349   : > { %2740 = vperm.xlu1 %5512, %v6698_v46  }
 0x34a   : > { %2217 = vmatpush.bf16.msrb.mxu0 %v2188_v63  ;;  %2236 = vmatpush.bf16.msrb.mxu1 %v2189_v59 }
 0x34b   : > { %v2454_v47 = vpop.permute.xlu1 %2453  ;;  %v2578_v54 = vpop.permute.xlu2 %2577  ;;  %5510 = vset.pattern.permute.xlu2 %v8049_v10 }
 0x34c   : > { %v2461_v14 = vsel %vm1175_vm5, %v2452_v0, %v2454_v47  ;;  %v2462_v13 = vsel %vm1175_vm5, %v2454_v47, %v2456_v30  ;;  %v2574_v44 = vpop.permute.xlu0 %2573  ;;  %v8050_v30 = vmov 0   ;;  %v5387_v0 = vld [vmem:[%s7856_s4 + $0x78] sm:$0xff]  ;;  %2716 = vperm.xlu2 %5510, %v6698_v46  }
 0x34d   : > { %4963 = vmatmul.msk.bf16.vlgmr.msrb.gmra.mxu0 %vm1578_vm7, %v5382_v58  ;;  %4965 = vmatmul.msk.bf16.vlgmr.msrb.gmra.mxu1 %vm1578_vm7, %v5382_v58  ;;  %v2474_v1 = vsel %vm407_vm2, %v2461_v14, 0  ;;  %v2477_v33 = vsel %vm407_vm2, %v2462_v13, 0 }
 0x34e   : > { %2484 = vmatpush.bf16.msra.mxu0 %v2474_v1  ;;  %2503 = vmatpush.bf16.msra.mxu1 %v2477_v33 }
 0x34f   : > { %4979 = vmatmul.msk.bf16.vlgmr.msrb.gmra.mxu2 %vm1578_vm7, %v5384_v61  ;;  %4981 = vmatmul.msk.bf16.vlgmr.msrb.gmra.mxu3 %vm1578_vm7, %v5384_v61 }
 0x350   : > { %5513 = vset.pattern.permute.xlu0 %v8050_v30 }
 0x351   : > { %5514 = vset.pattern.permute.xlu1 %v8050_v30 }
 0x353   : > { %v2448_v26 = vpop.permute.xlu1 %2447  ;;  %v2444_v4 = vpop.permute.xlu2 %2443 }
 0x354   : > { %v2459_v56 = vsel %vm1175_vm5, %v2446_v39, %v2448_v26  ;;  %v2460_v53 = vsel %vm1175_vm5, %v2448_v26, %v2450_v25  ;;  %v2580_v15 = vpop.permute.xlu0 %2579  ;;  %5515 = vset.pattern.permute.xlu2 %v8050_v30 }
 0x355   : > { %2485 = vmatpush.bf16.msra.mxu0 %v2459_v56  ;;  %2504 = vmatpush.bf16.msra.mxu1 %v2460_v53 }
 0x35b   : > { %v2576_v8 = vpop.permute.xlu1 %2575 }
 0x35c   : > { %v2591_v3 = vsel %vm484_vm11, %v2574_v44, %v2576_v8  ;;  %v2592_v22 = vsel %vm484_vm11, %v2576_v8, %v2578_v54  ;;  %v2440_v29 = vpop.permute.xlu0 %2439 }
 0x35d   : > { %4964 = vmatmul.msk.bf16.gmra.mxu0 %vm1578_vm7, %v5383_v11  ;;  %4966 = vmatmul.msk.bf16.gmra.mxu1 %vm1578_vm7, %v5383_v11 }
 0x35f   : > { %4980 = vmatmul.msk.bf16.gmra.mxu2 %vm1578_vm7, %v5385_v2  ;;  %4982 = vmatmul.msk.bf16.gmra.mxu3 %vm1578_vm7, %v5385_v2 }
 0x363   : > { %v2582_v41 = vpop.permute.xlu1 %2581 }
 0x364   : > { %v2593_v55 = vsel %vm484_vm11, %v2580_v15, %v2582_v41  ;;  %v2594_v57 = vsel %vm484_vm11, %v2582_v41, %v2584_v62 }
 0x365   : > { %2619 = vmatpush.bf16.msra.mxu2 %v2593_v55  ;;  %2638 = vmatpush.bf16.msra.mxu3 %v2594_v57 }
 0x369   : > { %2620 = vmatpush.bf16.msra.mxu2 %v2591_v3  ;;  %2639 = vmatpush.bf16.msra.mxu3 %v2592_v22 }
 0x36b   : > { %v2442_v9 = vpop.permute.xlu1 %2441 }
 0x36c   : > { %v2457_v12 = vsel %vm1175_vm5, %v2440_v29, %v2442_v9  ;;  %v2458_v42 = vsel %vm1175_vm5, %v2442_v9, %v2444_v4 }
 0x36d   : > { %2486 = vmatpush.bf16.msra.mxu0 %v2457_v12  ;;  %2505 = vmatpush.bf16.msra.mxu1 %v2458_v42 }
 0x36f   : > { %5035 = vmatmul.msk.bf16.vlgmr.msra.gmra.mxu2 %vm1578_vm7, %v5388_v34  ;;  %5037 = vmatmul.msk.bf16.vlgmr.msra.gmra.mxu3 %vm1578_vm7, %v5388_v34 }
 0x370   : > { %v1600_v27 = vpop.f32.mrf.mxu2  ;;  %v1619_v20 = vpop.f32.mrf.mxu3  ;;  %5019 = vmatmul.msk.bf16.vlgmr.msra.gmra.mxu0 %vm1578_vm7, %v5386_v17  ;;  %5021 = vmatmul.msk.bf16.vlgmr.msra.gmra.mxu1 %vm1578_vm7, %v5386_v17 }
 0x378   : > { %v6747_v35 = vpop.f32.mrf.mxu2  ;;  %v6749_v38 = vpop.f32.mrf.mxu3 }
 0x37f   : > { %5036 = vmatmul.msk.bf16.gmra.mxu2 %vm1578_vm7, %v5389_v21  ;;  %5038 = vmatmul.msk.bf16.gmra.mxu3 %vm1578_vm7, %v5389_v21 }
 0x380   : > { %v1605_v5 = vpop.f32.mrf.mxu2  ;;  %v1624_v23 = vpop.f32.mrf.mxu3  ;;  %5020 = vmatmul.msk.bf16.gmra.mxu0 %vm1578_vm7, %v5387_v0  ;;  %5022 = vmatmul.msk.bf16.gmra.mxu1 %vm1578_vm7, %v5387_v0 }
 0x388   : > { %v6764_v43 = vpop.f32.mrf.mxu2  ;;  %v6766_v63 = vpop.f32.mrf.mxu3 }
 0x389   : > { %v1697_v59 = vpop.f32.mrf.mxu0  ;;  %v1716_v58 = vpop.f32.mrf.mxu1 }
 0x38a   : > { %v1698_v62 = vadd.f32 %v1697_v59, %v1600_v27  ;;  %v1717_v61 = vadd.f32 %v1716_v58, %v1619_v20 }
 0x390   : > { %v6804_v32 = vpop.permute.xlu0 %2671 }
 0x391   : > { %v1699_v39 = vpop.f32.mrf.mxu0  ;;  %v1718_v1 = vpop.f32.mrf.mxu1 }
 0x392   : > { %v1823_v6 = vpop.f32.mrf.mxu2  ;;  %v1842_v47 = vpop.f32.mrf.mxu3  ;;  %v1700_v16 = vadd.f32 %v1699_v39, %v6747_v35  ;;  %v1719_v40 = vadd.f32 %v1718_v1, %v6749_v38 }
 0x393   : > { %v1852_v14 = vadd.f32 %v1823_v6, %v1698_v62  ;;  %v1853_v13 = vadd.f32 %v1842_v47, %v1717_v61  ;;  %v6792_v6 = vpop.permute.xlu1 %2676 }
 0x394   : > { %8051 = vst [vmem:[#allocation31_spill] sm:$0xff] %v6792_v6 }
 0x399   : > { %v1702_v24 = vpop.f32.mrf.mxu0  ;;  %v1721_v25 = vpop.f32.mrf.mxu1 }
 0x39a   : > { %v1825_v33 = vpop.f32.mrf.mxu2  ;;  %v1844_v46 = vpop.f32.mrf.mxu3  ;;  %v1703_v26 = vadd.f32 %v1702_v24, %v1605_v5  ;;  %v1722_v56 = vadd.f32 %v1721_v25, %v1624_v23 }
 0x39b   : > { %v1854_v7 = vadd.f32 %v1825_v33, %v1700_v16  ;;  %v1855_v36 = vadd.f32 %v1844_v46, %v1719_v40 }
 0x39f   : > { %v6802_v30 = vpop.permute.xlu1 %2666 }
 0x3a1   : > { %v6772_v8 = vpop.f32.mrf.mxu0  ;;  %v6774_v54 = vpop.f32.mrf.mxu1 }
 0x3a2   : > { %v1828_v53 = vpop.f32.mrf.mxu2  ;;  %v1847_v44 = vpop.f32.mrf.mxu3 }
 0x3a3   : > { %v6768_v11 = vadd.f32 %v1828_v53, %v1703_v26  ;;  %v6770_v2 = vadd.f32 %v1847_v44, %v1722_v56  ;;  %v2662_v56 = vpop.permute.xlu2 %2661 }
 0x3a8   : > { %v6818_v28 = vpop.permute.xlu1 %2744 }
 0x3a9   : > { %v1957_v41 = vpop.f32.mrf.mxu0  ;;  %v1976_v55 = vpop.f32.mrf.mxu1 }
 0x3aa   : > { %v6776_v15 = vpop.f32.mrf.mxu2  ;;  %v6778_v18 = vpop.f32.mrf.mxu3  ;;  %v1986_v45 = vadd.f32 %v1957_v41, %v1852_v14  ;;  %v1987_v49 = vadd.f32 %v1976_v55, %v1853_v13 }
 0x3ab   : > { %v6814_v31 = vpop.permute.xlu2 %2720  ;;  %v6820_v41 = vpop.permute.xlu0 %2724 }
 0x3ac   : > { %8052 = vst [vmem:[#allocation30_spill] sm:$0xff] %v6814_v31 }
 0x3b1   : > { %v1959_v22 = vpop.f32.mrf.mxu0  ;;  %v1978_v4 = vpop.f32.mrf.mxu1 }
 0x3b2   : > { %v2060_v57 = vpop.f32.mrf.mxu2  ;;  %v2079_v3 = vpop.f32.mrf.mxu3  ;;  %v1988_v55 = vadd.f32 %v1959_v22, %v1854_v7  ;;  %v1989_v6 = vadd.f32 %v1978_v4, %v1855_v36 }
 0x3b3   : > { %v2089_v50 = vadd.f32 %v2060_v57, %v1986_v45  ;;  %v2090_v60 = vadd.f32 %v2079_v3, %v1987_v49  ;;  %v2713_v4 = vpop.permute.xlu1 %2712 }
 0x3b9   : > { %v1962_v9 = vpop.f32.mrf.mxu0  ;;  %v1981_v12 = vpop.f32.mrf.mxu1 }
 0x3ba   : > { %v2062_v34 = vpop.f32.mrf.mxu2  ;;  %v2081_v29 = vpop.f32.mrf.mxu3  ;;  %v1991_v7 = vadd.f32 %v1981_v12, %v6770_v2 }
 0x3bb   : > { %v2091_v31 = vadd.f32 %v2062_v34, %v1988_v55  ;;  %v2092_v35 = vadd.f32 %v2081_v29, %v1989_v6  ;;  %v1705_v34 = vadd.f32 %v6772_v8, %v6764_v43  ;;  %v2737_v6 = vpop.permute.xlu0 %2736 }
 0x3c1   : > { %v6784_v27 = vpop.f32.mrf.mxu0  ;;  %v6786_v20 = vpop.f32.mrf.mxu1 }
 0x3c2   : > { %v6780_v42 = vpop.f32.mrf.mxu2  ;;  %v6782_v17 = vpop.f32.mrf.mxu3 }
 0x3c3   : > { %v2094_v29 = vadd.f32 %v6782_v17, %v1991_v7 }
 0x3ca   : > { %v6788_v21 = vpop.f32.mrf.mxu2  ;;  %v6790_v0 = vpop.f32.mrf.mxu3 }
 0x3cb   : > { %v2219_v5 = vpop.f32.mrf.mxu0  ;;  %v2238_v23 = vpop.f32.mrf.mxu1 }
 0x3cc   : > { %v2248_v48 = vadd.f32 %v2219_v5, %v2089_v50  ;;  %v2249_v52 = vadd.f32 %v2238_v23, %v2090_v60 }
 0x3d2   : > { %v2353_v59 = vpop.f32.mrf.mxu2  ;;  %v2372_v58 = vpop.f32.mrf.mxu3 }
 0x3d3   : > { %v2221_v62 = vpop.f32.mrf.mxu0  ;;  %v2240_v61 = vpop.f32.mrf.mxu1  ;;  %v2382_v14 = vadd.f32 %v2353_v59, %v2248_v48  ;;  %v2383_v13 = vadd.f32 %v2372_v58, %v2249_v52  ;;  %v1990_v52 = vadd.f32 %v1962_v9, %v6768_v11  ;;  %v5053_v58 = vld [vmem:[#allocation2] sm:$0xf]  ;;  %v5391_v11 = vld [vmem:[#allocation2 + $0xc] sm:$0xf0] }
 0x3d4   : > { %v2250_v1 = vadd.f32 %v2221_v62, %v2091_v31  ;;  %v2251_v5 = vadd.f32 %v2240_v61, %v2092_v35  ;;  %v6822_v48 = vpop.permute.xlu2 %2748  ;;  %v5065_v9 = vld [vmem:[#allocation2 + $0x20] sm:$0xf]  ;;  %v5054_v43 = vor.u32 %v5391_v11, %v5053_v58  ;;  %v1858_v35 = vadd.f32 %v6776_v15, %v1705_v34 }
 0x3d5   : > { %v2093_v31 = vadd.f32 %v6780_v42, %v1990_v52  ;;  %v1724_v42 = vadd.f32 %v6774_v54, %v6766_v63 }
 0x3d6   : > { %2854 = vrot.lane.b32.xlu0 %v5054_v43, %s5537_s24 }
 0x3d7   : > { %v1859_v63 = vadd.f32 %v6778_v18, %v1724_v42  ;;  %v8054_v42 = vld [vmem:[#allocation31_spill] sm:$0xff] }
 0x3d9   : > { %v1993_v15 = vadd.f32 %v6786_v20, %v1859_v63 }
 0x3da   : > { %v2355_v47 = vpop.f32.mrf.mxu2  ;;  %v2374_v24 = vpop.f32.mrf.mxu3 }
 0x3db   : > { %v6794_v25 = vpop.f32.mrf.mxu0  ;;  %v6796_v26 = vpop.f32.mrf.mxu1  ;;  %v2384_v36 = vadd.f32 %v2355_v47, %v2250_v1  ;;  %v2385_v33 = vadd.f32 %v2374_v24, %v2251_v5  ;;  %v5394_v47 = vld [vmem:[#allocation2 + $0x2c] sm:$0xf0]  ;;  %v1992_v5 = vadd.f32 %v6784_v27, %v1858_v35 }
 0x3dc   : > { %v5066_v8 = vor.u32 %v5394_v47, %v5065_v9  ;;  %v2252_v17 = vadd.f32 %v6794_v25, %v2093_v31  ;;  %v8053_v47 = vld [vmem:[#allocation30_spill] sm:$0xff] }
 0x3dd   : > { %v2095_v7 = vadd.f32 %v6788_v21, %v1992_v5 }
 0x3de   : > { %2860 = vrot.lane.b32.xlu2 %v5066_v8, %s5537_s24 }
 0x3e2   : > { %v6798_v53 = vpop.f32.mrf.mxu2  ;;  %v6800_v44 = vpop.f32.mrf.mxu3 }
 0x3e3   : > { %v6806_v10 = vpop.f32.mrf.mxu0  ;;  %v6808_v37 = vpop.f32.mrf.mxu1  ;;  %v2386_v54 = vadd.f32 %v6798_v53, %v2252_v17 }
 0x3e4   : > { %v2254_v20 = vadd.f32 %v6806_v10, %v2095_v7 }
 0x3ea   : > { %v6810_v19 = vpop.f32.mrf.mxu2  ;;  %v6812_v51 = vpop.f32.mrf.mxu3 }
 0x3eb   : > { %v2388_v21 = vadd.f32 %v6810_v19, %v2254_v20 }
 0x3ed   : > { %v2488_v45 = vpop.f32.mrf.mxu0  ;;  %v2507_v49 = vpop.f32.mrf.mxu1 }
 0x3ee   : > { %v2517_v57 = vadd.f32 %v2488_v45, %v2382_v14  ;;  %v2518_v3 = vadd.f32 %v2507_v49, %v2383_v13  ;;  %v2253_v49 = vadd.f32 %v6796_v26, %v2094_v29  ;;  %v2717_v26 = vpop.permute.xlu2 %2716 }
 0x3f0   : > { %v2387_v25 = vadd.f32 %v6800_v44, %v2253_v49  ;;  %v2741_v44 = vpop.permute.xlu1 %2740 }
 0x3f2   : > { %v2622_v39 = vpop.f32.mrf.mxu2  ;;  %v2641_v38 = vpop.f32.mrf.mxu3 }
 0x3f3   : > { %v2651_v50 = vadd.f32 %v2622_v39, %v2517_v57  ;;  %v2652_v60 = vadd.f32 %v2641_v38, %v2518_v3 }
 0x3f5   : > { %v2679_v16 = vadd.f32 %v2662_v56, %v2651_v50  ;;  %v2680_v40 = vadd.f32 %v2662_v56, %v2652_v60  ;;  %v2490_v23 = vpop.f32.mrf.mxu0  ;;  %v2509_v59 = vpop.f32.mrf.mxu1 }
 0x3f6   : > { %v2519_v2 = vadd.f32 %v2490_v23, %v2384_v36  ;;  %v2520_v12 = vadd.f32 %v2509_v59, %v2385_v33  ;;  %v2096_v36 = vadd.f32 %v6790_v0, %v1993_v15  ;;  %v8056_v15 = vld [vmem:[#allocation14_spill] sm:$0xff] }
 0x3f7   : > { %v2695_v46 = vmul.f32 0.01, %v2679_v16  ;;  %v2696_v22 = vmul.f32 0.01, %v2680_v40  ;;  %vm2687_vm2 = vcmp.ge.f32.partialorder %v2679_v16, 0.0  ;;  %vm2688_vm8 = vcmp.ge.f32.partialorder %v2680_v40, 0.0 }
 0x3f8   : > { %v2255_v31 = vadd.f32 %v6808_v37, %v2096_v36 }
 0x3f9   : > { %v2703_v62 = vsel %vm2687_vm2, %v2679_v16, %v2695_v46  ;;  %v2704_v61 = vsel %vm2688_vm8, %v2680_v40, %v2696_v22  ;;  %vm2874_vm2 = vcmask 261120  }
 0x3fa   : > { %v2727_v24 = vmul.f32 %v2713_v4, %v2703_v62  ;;  %v2728_v56 = vmul.f32 %v2713_v4, %v2704_v61  ;;  %v2624_v14 = vpop.f32.mrf.mxu2  ;;  %v2643_v13 = vpop.f32.mrf.mxu3  ;;  %v2389_v0 = vadd.f32 %v6812_v51, %v2255_v31 }
 0x3fb   : > { %v2653_v55 = vadd.f32 %v2624_v14, %v2519_v2  ;;  %v2654_v45 = vadd.f32 %v2643_v13, %v2520_v12 }
 0x3fc   : > { %v2751_v57 = vadd.f32 %v2737_v6, %v2727_v24  ;;  %v2752_v3 = vadd.f32 %v2737_v6, %v2728_v56 }
 0x3fd   : > { %v2681_v39 = vadd.f32 %v6802_v30, %v2653_v55  ;;  %v2682_v38 = vadd.f32 %v6802_v30, %v2654_v45  ;;  %v2493_v30 = vpop.f32.mrf.mxu0  ;;  %v2512_v16 = vpop.f32.mrf.mxu1 }
 0x3fe   : > { %v6842_v50 = vpack.c.bf16 %v2752_v3, %v2751_v57  ;;  %v2521_v18 = vadd.f32 %v2493_v30, %v2386_v54  ;;  %v2522_v40 = vadd.f32 %v2512_v16, %v2387_v25 }
 0x3ff   : > { %vm2689_vm9 = vcmp.ge.f32.partialorder %v2681_v39, 0.0  ;;  %vm2690_vm10 = vcmp.ge.f32.partialorder %v2682_v38, 0.0  ;;  %v2697_v60 = vmul.f32 0.01, %v2681_v39  ;;  %v2698_v1 = vmul.f32 0.01, %v2682_v38 }
 0x400   : > { %2763 = vst [vmem:[#allocation2 + $0x4] sm:$0xff] %v6842_v50  ;;  %v6874_v54 = vunpack.c.l.bf16 %v6842_v50 }
 0x401   : > { %v2705_v53 = vsel %vm2689_vm9, %v2681_v39, %v2697_v60  ;;  %v2706_v52 = vsel %vm2690_vm10, %v2682_v38, %v2698_v1  ;;  %v8055_v60 = vld [vmem:[#allocation5_spill] sm:$0xff] }
 0x402   : > { %v2729_v33 = vmul.f32 %v2717_v26, %v2705_v53  ;;  %v2730_v46 = vmul.f32 %v2717_v26, %v2706_v52  ;;  %v2627_v22 = vpop.f32.mrf.mxu2  ;;  %v2646_v4 = vpop.f32.mrf.mxu3  ;;  %v6890_v53 = vmul.f32 %v8056_v15, %v6874_v54 }
 0x403   : > { %v2655_v27 = vadd.f32 %v2627_v22, %v2521_v18  ;;  %v2656_v34 = vadd.f32 %v2646_v4, %v2522_v40  ;;  %v8057_v22 = vld [vmem:[#allocation17_spill] sm:$0xff] }
 0x404   : > { %v2753_v29 = vadd.f32 %v2741_v44, %v2729_v33  ;;  %v2754_v23 = vadd.f32 %v2741_v44, %v2730_v46 }
 0x405   : > { %v2683_v59 = vadd.f32 %v6804_v32, %v2655_v27  ;;  %v2684_v58 = vadd.f32 %v6804_v32, %v2656_v34  ;;  %v2495_v12 = vpop.f32.mrf.mxu0  ;;  %v2514_v10 = vpop.f32.mrf.mxu1  ;;  %v8058_v27 = vld [vmem:[#allocation16_spill] sm:$0xff] }
 0x406   : > { %v2760_v11 = vpack.c.bf16 %v2754_v23, %v2753_v29  ;;  %v2523_v61 = vadd.f32 %v2495_v12, %v2388_v21  ;;  %v2524_v6 = vadd.f32 %v2514_v10, %v2389_v0  ;;  %v6922_v23 = vmul.f32 %v8058_v27, %v6874_v54 }
 0x407   : > { %vm2691_vm14 = vcmp.ge.f32.partialorder %v2683_v59, 0.0  ;;  %v2699_v9 = vmul.f32 0.01, %v2683_v59  ;;  %vm2692_vm0 = vcmp.ge.f32.partialorder %v2684_v58, 0.0  ;;  %v2700_v2 = vmul.f32 0.01, %v2684_v58 }
 0x408   : > { %2764 = vst [vmem:[#allocation2 + $0x14] sm:$0xff] %v2760_v11  ;;  %v6857_v13 = vld [vmem:[#allocation2] sm:$0xff]  ;;  %v6868_v57 = vunpack.c.l.bf16 %v2760_v11  ;;  %v6898_v44 = vunpack.c.h.bf16 %v2760_v11 }
 0x409   : > { %v2707_v62 = vsel %vm2691_vm14, %v2683_v59, %v2699_v9  ;;  %v2708_v37 = vsel %vm2692_vm0, %v2684_v58, %v2700_v2  ;;  %v6866_v49 = vunpack.c.l.bf16 %v6857_v13 }
 0x40a   : > { %v2731_v24 = vmul.f32 %v8053_v47, %v2707_v62  ;;  %v2732_v32 = vmul.f32 %v8053_v47, %v2708_v37  ;;  %v2629_v56 = vpop.f32.mrf.mxu2  ;;  %v2648_v19 = vpop.f32.mrf.mxu3  ;;  %v6884_v30 = vmul.f32 %v8056_v15, %v6868_v57  ;;  %v6910_v4 = vmul.f32 %v6898_v44, %v8057_v22  ;;  %v6941_v47 = vld [vmem:[#allocation2 + $0x8] sm:$0xff]  }
 0x40b   : > { %v2657_v14 = vadd.f32 %v2629_v56, %v2523_v61  ;;  %v2658_v51 = vadd.f32 %v2648_v19, %v2524_v6  ;;  %v2791_v1 = vmul.f32 %v8055_v60, %v6866_v49  ;;  %v6914_v34 = vmul.f32 %v8058_v27, %v6868_v57 }
 0x40c   : > { %v2755_v43 = vadd.f32 %v6818_v28, %v2731_v24  ;;  %v2756_v8 = vadd.f32 %v6818_v28, %v2732_v32  ;;  %v3344_v52 = vpack.c.bf16 %v6884_v30, %v6890_v53  ;;  %v5061_v24 = vld [vmem:[#allocation2 + $0x8] sm:$0xf]  ;;  %v5390_v32 = vld [vmem:[#allocation2 + $0x4] sm:$0xf] }
 0x40d   : > { %v2685_v17 = vadd.f32 %v8054_v42, %v2657_v14  ;;  %v2686_v55 = vadd.f32 %v8054_v42, %v2658_v51  ;;  %v3455_v11 = vpack.c.bf16 %v6914_v34, %v6922_v23 }
 0x40e   : > { %v6863_v45 = vpack.c.bf16 %v2756_v8, %v2755_v43  ;;  %v8059_v8 = vld [vmem:[#allocation8_spill] sm:$0xff] }
 0x40f   : > { %vm2693_vm6 = vcmp.ge.f32.partialorder %v2685_v17, 0.0  ;;  %v2701_v3 = vmul.f32 0.01, %v2685_v17  ;;  %vm2694_vm7 = vcmp.ge.f32.partialorder %v2686_v55, 0.0  ;;  %v2702_v35 = vmul.f32 0.01, %v2686_v55 }
 0x410   : > { %2765 = vst [vmem:[#allocation2 + $0x24] sm:$0xff] %v6863_v45  ;;  %v2773_v39 = vld [vmem:[#allocation2 + $0x10] sm:$0xff]  ;;  %v3327_v12 = vunpack.c.h.bf16 %v6863_v45  ;;  %v6938_v37 = vld [vmem:[#allocation2 + $0x18] sm:$0xff]  }
 0x411   : > { %v2709_v38 = vsel %vm2693_vm6, %v2685_v17, %v2701_v3  ;;  %v2710_v28 = vsel %vm2694_vm7, %v2686_v55, %v2702_v35  ;;  %v6871_v63 = vunpack.c.l.bf16 %v2773_v39  ;;  %v5392_v61 = vld [vmem:[#allocation2 + $0x14] sm:$0xf0]  ;;  %v5055_v6 = vld [vmem:[#allocation2 + $0x10] sm:$0xf0]  ;;  %v6944_v56 = vunpack.c.l.bf16 %v6938_v37  ;;  %v8060_v35 = vld [vmem:[#allocation18_spill] sm:$0xff] }
 0x412   : > { %v2733_v25 = vmul.f32 %v6820_v41, %v2709_v38  ;;  %v2734_v26 = vmul.f32 %v6820_v41, %v2710_v28  ;;  %v6947_v19 = vmul.f32 %v3327_v12, %v8057_v22  ;;  %v5062_v51 = vor.u32 %v5392_v61, %v5061_v24 }
 0x413   : > { %v2794_v5 = vmul.f32 %v8055_v60, %v6871_v63  ;;  %v5058_v43 = vor.u32 %v5390_v32, %v5055_v6  ;;  %v6954_v17 = vunpack.c.h.bf16 %v2773_v39  ;;  %v6957_v55 = vunpack.c.l.bf16 %v6941_v47 }
 0x414   : > { %v2757_v16 = vadd.f32 %v6822_v48, %v2733_v25  ;;  %v2758_v18 = vadd.f32 %v6822_v48, %v2734_v26  ;;  %v6903_v48 = vunpack.c.h.bf16 %v6842_v50  ;;  %v6962_v38 = vmul.f32 %v3327_v12, %v8060_v35  ;;  %v8061_v26 = vld [vmem:[#allocation4_spill] sm:$0xff] }
 0x415   : > { %v2803_v40 = vpack.c.bf16 %v2794_v5, %v2791_v1  ;;  %v6972_v25 = vunpack.c.h.bf16 %v6857_v13  ;;  %v2796_v1 = vmul.f32 %v8061_v26, %v6944_v56  ;;  %v8063_v13 = vld [vmem:[#allocation22_spill] sm:$0xff]  ;;  %v3002_v24 = vmul.f32 %v8059_v8, %v6871_v63 }
 0x416   : > { %v6892_v41 = vpack.c.bf16 %v2758_v18, %v2757_v16  ;;  %v6918_v50 = vmul.f32 %v6903_v48, %v8057_v22  ;;  %v6980_v16 = vmul.f32 %v6903_v48, %v8060_v35  ;;  %v6984_v18 = vmul.f32 %v6898_v44, %v8060_v35 }
 0x417   : > { %2935 = vrot.lane.b32.xlu0 %v2803_v40, %s5539_s26  ;;  %v6900_v7 = vld [vmem:[#allocation2 + $0x20] sm:$0xff]  ;;  %v5073_v36 = vld [vmem:[#allocation2 + $0x28] sm:$0xf] }
 0x418   : > { %2766 = vst [vmem:[#allocation2 + $0x34] sm:$0xff] %v6892_v41  ;;  %v5393_v33 = vld [vmem:[#allocation2 + $0x24] sm:$0xf]  ;;  %v6906_v46 = vunpack.c.l.bf16 %v6900_v7  ;;  %v3345_v0 = vpack.c.bf16 %v6910_v4, %v6918_v50  ;;  %v3330_v10 = vunpack.c.h.bf16 %v6892_v41  ;;  %v7015_v32 = vld [vmem:[#allocation2 + $0x28] sm:$0xff]  }
 0x419   : > { %v5213_v4 = vld [vmem:[#allocation2 + $0x24] sm:$0xf] }
 0x41a   : > { %v2797_v9 = vmul.f32 %v8055_v60, %v6906_v46  ;;  %v6950_v14 = vmul.f32 %v3330_v10, %v8057_v22  ;;  %v6965_v28 = vmul.f32 %v3330_v10, %v8060_v35  ;;  %v3005_v39 = vmul.f32 %v8059_v8, %v6906_v46 }
 0x41c   : > { %v3348_v3 = vpack.c.bf16 %v6950_v14, %v6947_v19  ;;  %v5201_v14 = vld [vmem:[#allocation2 + $0x4] sm:$0xf] }
 0x41f   : > { %v5395_v20 = vld [vmem:[#allocation2 + $0x34] sm:$0xf0]  ;;  %v5067_v31 = vld [vmem:[#allocation2 + $0x30] sm:$0xf0] }
 0x420   : > { %v2777_v29 = vld [vmem:[#allocation2 + $0x30] sm:$0xff]  ;;  %v5074_v59 = vor.u32 %v5395_v20, %v5073_v36  ;;  %v5070_v58 = vor.u32 %v5393_v33, %v5067_v31  ;;  %v8062_v36 = vld [vmem:[#allocation6_spill] sm:$0xff]  ;;  %v6990_v20 = vmul.f32 %v8063_v13, %v6874_v54  ;;  %v6994_v31 = vmul.f32 %v8063_v13, %v6868_v57 }
 0x421   : > { %v6924_v21 = vunpack.c.l.bf16 %v2777_v29  ;;  %v2795_v33 = vmul.f32 %v6954_v17, %v8062_v36 }
 0x422   : > { %2864 = vrot.lane.b32.xlu2 %v5074_v59, %s5537_s24  ;;  %2862 = vrot.lane.b32.xlu1 %v5070_v58, %s5537_s24  ;;  %v2793_v59 = vmul.f32 %v8061_v26, %v6957_v55  ;;  %v6998_v58 = vld [vmem:[#allocation2 + $0x38] sm:$0xff]  }
 0x423   : > { %v2800_v2 = vmul.f32 %v8055_v60, %v6924_v21  ;;  %v3008_v42 = vmul.f32 %v8059_v8, %v6924_v21 }
 0x424   : > { %v2805_v6 = vpack.c.bf16 %v2796_v1, %v2793_v59 }
 0x425   : > { %v2806_v62 = vpack.c.bf16 %v2800_v2, %v2797_v9  ;;  %v3014_v40 = vpack.c.bf16 %v3008_v42, %v3005_v39  ;;  %v2792_v2 = vmul.f32 %v6972_v25, %v8062_v36  ;;  %v2789_v39 = vunpack.c.h.bf16 %v2777_v29 }
 0x427   : > { %2941 = vrot.lane.b32.xlu0 %v2806_v62, %s5539_s26  ;;  %v8064_v62 = vld [vmem:[#allocation25_spill] sm:$0xff]  ;;  %v2804_v42 = vpack.c.bf16 %v2795_v33, %v2792_v2  ;;  %v2801_v59 = vmul.f32 %v2789_v39, %v8062_v36 }
 0x428   : > { %v7008_v61 = vmul.f32 %v3327_v12, %v8064_v62  ;;  %v7011_v57 = vmul.f32 %v3330_v10, %v8064_v62  ;;  %v2790_v12 = vunpack.c.l.bf16 %v6998_v58  ;;  %v8065_v10 = vld [vmem:[#allocation10_spill] sm:$0xff] }
 0x429   : > { %v3119_v54 = vmul.f32 %v8065_v10, %v6924_v21 }
 0x42a   : > { %2858 = vrot.lane.b32.xlu2 %v5062_v51, %s5537_s24  ;;  %2856 = vrot.lane.b32.xlu1 %v5058_v43, %s5537_s24  ;;  %v7019_v51 = vmul.f32 %v6903_v48, %v8064_v62  ;;  %v7023_v43 = vmul.f32 %v6898_v44, %v8064_v62  ;;  %v2999_v48 = vmul.f32 %v8059_v8, %v6866_v49  ;;  %v2787_v44 = vunpack.c.l.bf16 %v7015_v32 }
 0x42b   : > { %v2802_v29 = vmul.f32 %v8061_v26, %v2790_v12 }
 0x42c   : > { %v3011_v33 = vpack.c.bf16 %v3002_v24, %v2999_v48  ;;  %v2799_v2 = vmul.f32 %v8061_v26, %v2787_v44  ;;  %v8066_v48 = vld [vmem:[#allocation7_spill] sm:$0xff] }
 0x42d   : > { %v3010_v9 = vmul.f32 %v8066_v48, %v2790_v12 }
 0x42e   : > { %v2808_v1 = vpack.c.bf16 %v2802_v29, %v2799_v2  ;;  %v3007_v29 = vmul.f32 %v8066_v48, %v2787_v44 }
 0x42f   : > { %3044 = vrot.lane.b32.xlu0 %v3014_v40, %s5540_s27  ;;  %v2786_v40 = vunpack.c.h.bf16 %v6900_v7  ;;  %v3116_v7 = vmul.f32 %v8065_v10, %v6906_v46  ;;  %v3110_v46 = vmul.f32 %v8065_v10, %v6866_v49  ;;  %v8068_v49 = vld [vmem:[#allocation11_spill] sm:$0xff] }
 0x430   : > { %v3016_v2 = vpack.c.bf16 %v3010_v9, %v3007_v29  ;;  %v8069_v29 = vld [vmem:[#allocation12_spill] sm:$0xff]  ;;  %v3115_v30 = vmul.f32 %v8068_v49, %v6944_v56 }
 0x431   : > { %v3125_v24 = vpack.c.bf16 %v3119_v54, %v3116_v7  ;;  %v3114_v53 = vmul.f32 %v6954_v17, %v8069_v29 }
 0x432   : > { %2939 = vrot.lane.b32.xlu2 %v2805_v6, %s5539_s26  ;;  %2937 = vrot.lane.b32.xlu1 %v2804_v42, %s5539_s26  ;;  %v2798_v6 = vmul.f32 %v2786_v40, %v8062_v36 }
 0x434   : > { %v2807_v42 = vpack.c.bf16 %v2801_v59, %v2798_v6  ;;  %v3004_v6 = vmul.f32 %v8066_v48, %v6944_v56 }
 0x437   : > { %3038 = vrot.lane.b32.xlu0 %v3011_v33, %s5540_s27  ;;  %v8067_v33 = vld [vmem:[#allocation9_spill] sm:$0xff] }
 0x438   : > { %v3009_v5 = vmul.f32 %v2789_v39, %v8067_v33  ;;  %v3006_v59 = vmul.f32 %v2786_v40, %v8067_v33  ;;  %v2861_v19 = vpop.permute.xlu2 %2860 }
 0x43a   : > { %2945 = vrot.lane.b32.xlu2 %v2808_v1, %s5539_s26  ;;  %2943 = vrot.lane.b32.xlu1 %v2807_v42, %s5539_s26  ;;  %v3015_v21 = vpack.c.bf16 %v3009_v5, %v3006_v59  ;;  %v3113_v1 = vmul.f32 %v8065_v10, %v6871_v63  ;;  %v3003_v42 = vmul.f32 %v6954_v17, %v8067_v33  ;;  %v3328_v17 = vunpack.c.h.bf16 %v7015_v32 }
 0x43b   : > { %v3001_v5 = vmul.f32 %v8066_v48, %v6957_v55  ;;  %v3000_v63 = vmul.f32 %v6972_v25, %v8067_v33  ;;  %v3120_v59 = vmul.f32 %v2789_v39, %v8069_v29  ;;  %v7113_v32 = vunpack.c.h.bf16 %v6941_v47 }
 0x43c   : > { %v3122_v54 = vpack.c.bf16 %v3113_v1, %v3110_v46  ;;  %v3117_v1 = vmul.f32 %v2786_v40, %v8069_v29  ;;  %v3326_v46 = vunpack.c.l.bf16 %v6863_v45  ;;  %v3112_v45 = vmul.f32 %v8068_v49, %v6957_v55  ;;  %v8070_v55 = vld [vmem:[#allocation13_spill] sm:$0xff] }
 0x43d   : > { %v3013_v9 = vpack.c.bf16 %v3004_v6, %v3001_v5  ;;  %v3012_v7 = vpack.c.bf16 %v3003_v42, %v3000_v63  ;;  %v7094_v5 = vunpack.c.h.bf16 %v6998_v58  ;;  %v7105_v58 = vunpack.c.h.bf16 %v6938_v37 }
 0x43e   : > { %v3126_v6 = vpack.c.bf16 %v3120_v59, %v3117_v1  ;;  %v3124_v39 = vpack.c.bf16 %v3115_v30, %v3112_v45  ;;  %v3449_v56 = vmul.f32 %v8058_v27, %v3326_v46  ;;  %v3334_v37 = vmul.f32 %v8070_v55, %v7113_v32  ;;  %v5415_v30 = vld [vmem:[#allocation2 + $0x38] sm:$0xf0] }
 0x43f   : > { %3155 = vrot.lane.b32.xlu0 %v3125_v24, %s5541_s28  ;;  %v3121_v24 = vmul.f32 %v8068_v49, %v2790_v12  ;;  %v8072_v1 = vpack.c.bf16 %v6965_v28, %v6962_v38  ;;  %v8073_v38 = vpack.c.bf16 %v6984_v18, %v6980_v16  ;;  %v3673_v28 = vmul.f32 %v8063_v13, %v3326_v46  ;;  %v5203_v18 = vld [vmem:[#allocation2 + $0x14] sm:$0xf0] }
 0x442   : > { %3048 = vrot.lane.b32.xlu2 %v3016_v2, %s5540_s27  ;;  %3046 = vrot.lane.b32.xlu1 %v3015_v21, %s5540_s27  ;;  %v3329_v2 = vunpack.c.l.bf16 %v6892_v41  ;;  %v3118_v21 = vmul.f32 %v8068_v49, %v2787_v44  ;;  %v3338_v41 = vmul.f32 %v8056_v15, %v3326_v46  ;;  %v8074_v46 = vpack.c.bf16 %v6994_v31, %v6990_v20  ;;  %v2769_v31 = vld [vmem:[%s7859_s7 + $0x10] sm:$0xff] }
 0x443   : > { %v8076_v20 = vpack.c.bf16 %v7011_v57, %v7008_v61 }
 0x444   : > { %v3341_v42 = vmul.f32 %v8056_v15, %v3329_v2  ;;  %v3452_v40 = vmul.f32 %v8058_v27, %v3329_v2 }
 0x446   : > { %v3347_v12 = vpack.c.bf16 %v3341_v42, %v3338_v41  ;;  %v3458_v63 = vpack.c.bf16 %v3452_v40, %v3449_v56  ;;  %v3676_v41 = vmul.f32 %v8063_v13, %v3329_v2  ;;  %v5209_v2 = vld [vmem:[#allocation2 + $0xc] sm:$0xf]  ;;  %v5412_v56 = vld [vmem:[#allocation2 + $0x18] sm:$0xf0] }
 0x447   : > { %3149 = vrot.lane.b32.xlu0 %v3122_v54, %s5541_s28  ;;  %v3127_v54 = vpack.c.bf16 %v3121_v24, %v3118_v21  ;;  %v3337_v24 = vmul.f32 %v8070_v55, %v7105_v58  ;;  %v5414_v21 = vld [vmem:[#allocation2 + $0x30] sm:$0xf0] }
 0x448   : > { %v5214_v50 = vor.u32 %v5414_v21, %v5213_v4  ;;  %v3682_v45 = vpack.c.bf16 %v3676_v41, %v3673_v28  ;;  %v8079_v41 = vmov 2   ;;  %v7200_v28 = vld [vmem:[%s7859_s7 + $0x8] sm:$0xff] }
 0x449   : > { %v3346_v59 = vpack.c.bf16 %v3337_v24, %v3334_v37  ;;  %v8075_v37 = vld [vmem:[#allocation21_spill] sm:$0xff] }
 0x44a   : > { %3042 = vrot.lane.b32.xlu2 %v3013_v9, %s5540_s27  ;;  %3040 = vrot.lane.b32.xlu1 %v3012_v7, %s5540_s27  ;;  %v3343_v9 = vmul.f32 %v8070_v55, %v7094_v5  ;;  %v3675_v21 = vmul.f32 %v8075_v37, %v3328_v17  ;;  %v3669_v61 = vmul.f32 %v8075_v37, %v7113_v32 }
 0x44f   : > { %3371 = vrot.lane.b32.xlu0 %v3344_v52, %s5538_s25  ;;  %v3111_v52 = vmul.f32 %v6972_v25, %v8069_v29  ;;  %v3340_v25 = vmul.f32 %v8070_v55, %v3328_v17 }
 0x451   : > { %v3123_v44 = vpack.c.bf16 %v3114_v53, %v3111_v52  ;;  %v3349_v7 = vpack.c.bf16 %v3343_v9, %v3340_v25  ;;  %v5215_v52 = vld [vmem:[#allocation2 + $0x34] sm:$0xf0]  ;;  %v5210_v9 = vor.u32 %v5412_v56, %v5209_v2  ;;  %v5410_v25 = vld [vmem:[#allocation2 + $0x8] sm:$0xf] }
 0x452   : > { %3159 = vrot.lane.b32.xlu2 %v3127_v54, %s5541_s28  ;;  %3157 = vrot.lane.b32.xlu1 %v3126_v6, %s5541_s28  ;;  %v5396_v2 = vld [vmem:[%s7858_s6] sm:$0xff] }
 0x457   : > { %3377 = vrot.lane.b32.xlu0 %v3347_v12, %s5538_s25  ;;  %v5221_v12 = vld [vmem:[#allocation2 + $0x2c] sm:$0xf] }
 0x45a   : > { %3153 = vrot.lane.b32.xlu2 %v3124_v39, %s5541_s28  ;;  %3151 = vrot.lane.b32.xlu1 %v3123_v44, %s5541_s28  ;;  %v5222_v39 = vor.u32 %v5415_v30, %v5221_v12  ;;  %v5413_v44 = vld [vmem:[#allocation2 + $0x28] sm:$0xf] }
 0x45b   : > { %v5218_v40 = vor.u32 %v5413_v44, %v5215_v52  ;;  %v5399_v52 = vld [vmem:[%s7858_s6 + $0x18] sm:$0xff] }
 0x45f   : > { %3488 = vrot.lane.b32.xlu0 %v3458_v63, %s5536_s23  ;;  %v2855_v63 = vpop.permute.xlu0 %2854 }
 0x462   : > { %3381 = vrot.lane.b32.xlu2 %v3349_v7, %s5538_s25  ;;  %3373 = vrot.lane.b32.xlu1 %v3345_v0, %s5538_s25  ;;  %v8071_v0 = vld [vmem:[#allocation15_spill] sm:$0xff]  ;;  %v5206_v7 = vor.u32 %v5410_v25, %v5203_v18  ;;  %v5147_v25 = vld [vmem:[#allocation2 + $0x34] sm:$0xf0] }
 0x463   : > { %v3454_v47 = vmul.f32 %v8071_v0, %v7094_v5  ;;  %v3451_v34 = vmul.f32 %v8071_v0, %v3328_v17  ;;  %v3448_v54 = vmul.f32 %v8071_v0, %v7105_v58  ;;  %v3445_v6 = vmul.f32 %v8071_v0, %v7113_v32 }
 0x465   : > { %v3460_v23 = vpack.c.bf16 %v3454_v47, %v3451_v34  ;;  %v3457_v42 = vpack.c.bf16 %v3448_v54, %v3445_v6  ;;  %v5398_v6 = vld [vmem:[%s7858_s6 + $0x10] sm:$0xff] }
 0x467   : > { %3482 = vrot.lane.b32.xlu0 %v3455_v11, %s5536_s23  ;;  %v5411_v11 = vld [vmem:[#allocation2 + $0x10] sm:$0xf0] }
 0x46a   : > { %3375 = vrot.lane.b32.xlu2 %v3346_v59, %s5538_s25  ;;  %3379 = vrot.lane.b32.xlu1 %v3348_v3, %s5538_s25  ;;  %v5202_v3 = vor.u32 %v5411_v11, %v5201_v14  ;;  %v3678_v59 = vmul.f32 %v8075_v37, %v7094_v5  ;;  %v3672_v5 = vmul.f32 %v8075_v37, %v7105_v58  ;;  %v8078_v14 = vmov 1  }
 0x46c   : > { %v3681_v11 = vpack.c.bf16 %v3672_v5, %v3669_v61  ;;  %v5405_v5 = vld [vmem:[#allocation2 + $0x10] sm:$0xf0]  ;;  %v5404_v61 = vld [vmem:[#allocation2 + $0x8] sm:$0xf] }
 0x46f   : > { %3601 = vrot.lane.b32.xlu0 %v5214_v50, %s5543_s12  ;;  %v3684_v50 = vpack.c.bf16 %v3678_v59, %v3675_v21  ;;  %v5145_v21 = vld [vmem:[#allocation2 + $0x24] sm:$0xf] }
 0x472   : > { %3492 = vrot.lane.b32.xlu2 %v3460_v23, %s5536_s23  ;;  %3490 = vrot.lane.b32.xlu1 %v8072_v1, %s5536_s23  ;;  %v8077_v1 = vpack.c.bf16 %v7023_v43, %v7019_v51  ;;  %v2767_v43 = vld [vmem:[%s7859_s7] sm:$0xff] }
 0x477   : > { %3595 = vrot.lane.b32.xlu0 %v5202_v3, %s5543_s12 }
 0x47a   : > { %3486 = vrot.lane.b32.xlu2 %v3457_v42, %s5536_s23  ;;  %3484 = vrot.lane.b32.xlu1 %v8073_v38, %s5536_s23 }
 0x47c   : > { %v2865_v53 = vpop.permute.xlu2 %2864 }
 0x47f   : > { %3712 = vrot.lane.b32.xlu0 %v3682_v45, %s5535_s22 }
 0x482   : > { %3605 = vrot.lane.b32.xlu2 %v5222_v39, %s5543_s12  ;;  %3603 = vrot.lane.b32.xlu1 %v5218_v40, %s5543_s12  ;;  %v8080_v39 = vmov 0  }
 0x484   : > { %v2859_v16 = vpop.permute.xlu2 %2858 }
 0x487   : > { %3706 = vrot.lane.b32.xlu0 %v8074_v46, %s5535_s22 }
 0x489   : > { %v2936_v4 = vpop.permute.xlu0 %2935 }
 0x48a   : > { %3599 = vrot.lane.b32.xlu2 %v5210_v9, %s5543_s12  ;;  %3597 = vrot.lane.b32.xlu1 %v5206_v7, %s5543_s12  ;;  %v5407_v9 = vld [vmem:[#allocation2 + $0x30] sm:$0xf0] }
 0x48c   : > { %v7158_v24 = vpop.permute.xlu2 %2939 }
 0x48f   : > { %3790 = vperm.xlu0 %5513, %v2769_v31  }
 0x492   : > { %3716 = vrot.lane.b32.xlu2 %v3684_v50, %s5535_s22  ;;  %3714 = vrot.lane.b32.xlu1 %v8076_v20, %s5535_s22 }
 0x494   : > { %v2946_v47 = vpop.permute.xlu2 %2945  ;;  %v2863_v34 = vpop.permute.xlu1 %2862 }
 0x495   : > { %v2868_v17 = vsel %vm528_vm15, %v2861_v19, %v2863_v34  ;;  %v2869_v23 = vsel %vm528_vm15, %v2863_v34, %v2865_v53  ;;  %v2770_v19 = vld [vmem:[%s7859_s7 + $0x18] sm:$0xff]  ;;  %v5400_v34 = vld [vmem:[%s7858_s6 + $0x20] sm:$0xff] }
 0x496   : > { %2887 = vmatpush.bf16.msrb.mxu0 %v2868_v17  ;;  %2906 = vmatpush.bf16.msrb.mxu1 %v2869_v23  ;;  %v5139_v17 = vld [vmem:[#allocation2 + $0x14] sm:$0xf0]  ;;  %v5137_v23 = vld [vmem:[#allocation2 + $0x4] sm:$0xf] }
 0x497   : > { %5517 = vset.pattern.permute.xlu0 %v8078_v14 }
 0x498   : > { %3843 = vperm.xlu0 %5517, %v2770_v19  }
 0x499   : > { %v2942_v57 = vpop.permute.xlu0 %2941 }
 0x49a   : > { %3710 = vrot.lane.b32.xlu2 %v3681_v11, %s5535_s22  ;;  %3708 = vrot.lane.b32.xlu1 %v8077_v1, %s5535_s22  ;;  %v5142_v11 = vor.u32 %v5404_v61, %v5139_v17  ;;  %v5397_v1 = vld [vmem:[%s7858_s6 + $0x8] sm:$0xff] }
 0x49c   : > { %v2857_v58 = vpop.permute.xlu1 %2856  ;;  %v3049_v3 = vpop.permute.xlu2 %3048 }
 0x49d   : > { %v2866_v54 = vsel %vm528_vm15, %v2855_v63, %v2857_v58  ;;  %v2867_v32 = vsel %vm528_vm15, %v2857_v58, %v2859_v16 }
 0x49e   : > { %2888 = vmatpush.bf16.msrb.mxu0 %v2866_v54  ;;  %2907 = vmatpush.bf16.msrb.mxu1 %v2867_v32  ;;  %v8081_v32 = vld [vmem:[#allocation19_spill] sm:$0xff] }
 0x4a0   : > { %5522 = vset.pattern.permute.xlu0 %v8079_v41 }
 0x4a1   : > { %v3045_v51 = vpop.permute.xlu0 %3044  ;;  %5075 = vmatmul.msk.bf16.vlgmr.msrb.gmra.mxu0 %vm2874_vm2, %v5398_v6  ;;  %5077 = vmatmul.msk.bf16.vlgmr.msrb.gmra.mxu1 %vm2874_vm2, %v5398_v6  ;;  %v4297_v6 = vmul.f32 %v8070_v55, %v8081_v32 }
 0x4a2   : > { %3795 = vperm.xlu1 %5514, %v2770_v19   ;;  %3780 = vperm.xlu2 %5515, %v2767_v43  }
 0x4a3   : > { %3855 = vperm.xlu0 %5522, %v2767_v43  }
 0x4a4   : > { %v2938_v42 = vpop.permute.xlu1 %2937  ;;  %v3043_v38 = vpop.permute.xlu2 %3042 }
 0x4a5   : > { %v2947_v40 = vsel %vm605_vm1, %v2936_v4, %v2938_v42  ;;  %v2948_v16 = vsel %vm605_vm1, %v2938_v42, %v7158_v24  ;;  %v5406_v4 = vld [vmem:[#allocation2 + $0x28] sm:$0xf] }
 0x4a9   : > { %v3039_v12 = vpop.permute.xlu0 %3038 }
 0x4aa   : > { %3785 = vperm.xlu1 %5514, %v7200_v28   ;;  %5516 = vset.pattern.permute.xlu2 %v8078_v14 }
 0x4ab   : > { %3839 = vperm.xlu2 %5516, %v2769_v31   ;;  %5524 = vset.pattern.permute.xlu0 %v8080_v39 }
 0x4ac   : > { %v2944_v30 = vpop.permute.xlu1 %2943  ;;  %v3160_v44 = vpop.permute.xlu2 %3159 }
 0x4ad   : > { %v2949_v53 = vsel %vm605_vm1, %v2942_v57, %v2944_v30  ;;  %v2950_v45 = vsel %vm605_vm1, %v2944_v30, %v2946_v47  ;;  %v5150_v47 = vor.u32 %v5406_v4, %v5147_v25  ;;  %v5138_v57 = vor.u32 %v5405_v5, %v5137_v23 }
 0x4ae   : > { %2967 = vmatpush.bf16.msrb.mxu2 %v2949_v53  ;;  %2986 = vmatpush.bf16.msrb.mxu3 %v2950_v45  ;;  %v5402_v45 = vld [vmem:[%s7858_s6 + $0x30] sm:$0xff] }
 0x4b1   : > { %5076 = vmatmul.msk.bf16.gmra.mxu0 %vm2874_vm2, %v5399_v52  ;;  %5078 = vmatmul.msk.bf16.gmra.mxu1 %vm2874_vm2, %v5399_v52  ;;  %v3156_v56 = vpop.permute.xlu0 %3155 }
 0x4b2   : > { %5518 = vset.pattern.permute.xlu1 %v8079_v41  ;;  %2968 = vmatpush.bf16.msrb.mxu2 %v2947_v40 }
 0x4b3   : > { %2987 = vmatpush.bf16.msrb.mxu3 %v2948_v16  ;;  %3863 = vperm.xlu1 %5518, %v2769_v31   ;;  %v5146_v31 = vor.u32 %v5407_v9, %v5145_v21  ;;  %v5408_v16 = vld [vmem:[%s7858_s6 + $0x40] sm:$0xff] }
 0x4b4   : > { %v3047_v18 = vpop.permute.xlu1 %3046  ;;  %5519 = vset.pattern.permute.xlu2 %v8079_v41  ;;  %v3154_v7 = vpop.permute.xlu2 %3153 }
 0x4b5   : > { %v3052_v63 = vsel %vm701_vm3, %v3045_v51, %v3047_v18  ;;  %v3053_v46 = vsel %vm701_vm3, %v3047_v18, %v3049_v3  ;;  %5087 = vmatmul.msk.bf16.vlgmr.msrb.gmra.mxu2 %vm2874_vm2, %v5396_v2  ;;  %3867 = vperm.xlu2 %5519, %v2770_v19   ;;  %v8082_v51 = vld [vmem:[#allocation20_spill] sm:$0xff] }
 0x4b6   : > { %5089 = vmatmul.msk.bf16.vlgmr.msrb.gmra.mxu3 %vm2874_vm2, %v5396_v2  ;;  %3070 = vmatpush.bf16.msra.mxu0 %v3052_v63 }
 0x4b7   : > { %3089 = vmatpush.bf16.msra.mxu1 %v3053_v46  ;;  %v5403_v46 = vld [vmem:[%s7858_s6 + $0x38] sm:$0xff] }
 0x4b9   : > { %v3150_v24 = vpop.permute.xlu0 %3149 }
 0x4bb   : > { %5520 = vset.pattern.permute.xlu1 %v8078_v14 }
 0x4bc   : > { %3831 = vperm.xlu1 %5520, %v2767_v43   ;;  %v3041_v59 = vpop.permute.xlu1 %3040  ;;  %v3382_v19 = vpop.permute.xlu2 %3381  ;;  %v4300_v43 = vmul.f32 %v8070_v55, %v8082_v51 }
 0x4bd   : > { %v3050_v50 = vsel %vm701_vm3, %v3039_v12, %v3041_v59  ;;  %v3051_v20 = vsel %vm701_vm3, %v3041_v59, %v3043_v38  ;;  %5521 = vset.pattern.permute.xlu2 %v8078_v14  ;;  %v5401_v12 = vld [vmem:[%s7858_s6 + $0x28] sm:$0xff] }
 0x4be   : > { %3071 = vmatpush.bf16.msra.mxu0 %v3050_v50  ;;  %3090 = vmatpush.bf16.msra.mxu1 %v3051_v20  ;;  %v4306_v42 = vpack.c.bf16 %v4300_v43, %v4297_v6 }
 0x4bf   : > { %3835 = vperm.xlu2 %5521, %v7200_v28  }
 0x4c1   : > { %5103 = vmatmul.msk.bf16.vlgmr.msra.gmra.mxu0 %vm2874_vm2, %v5400_v34  ;;  %5105 = vmatmul.msk.bf16.vlgmr.msra.gmra.mxu1 %vm2874_vm2, %v5400_v34  ;;  %v3372_v54 = vpop.permute.xlu0 %3371  ;;  %v5416_v34 = vld [vmem:[%s7858_s6 + $0x50] sm:$0xff] }
 0x4c2   : > { %3272 = vmatpush.bf16.msrb.mxu0 %v5146_v31  ;;  %3291 = vmatpush.bf16.msrb.mxu1 %v5150_v47  ;;  %v5409_v31 = vld [vmem:[%s7858_s6 + $0x48] sm:$0xff] }
 0x4c4   : > { %5523 = vset.pattern.permute.xlu1 %v8079_v41  ;;  %v3158_v58 = vpop.permute.xlu1 %3157  ;;  %v3376_v30 = vpop.permute.xlu2 %3375 }
 0x4c5   : > { %v3163_v14 = vsel %vm801_vm4, %v3156_v56, %v3158_v58  ;;  %v3164_v3 = vsel %vm801_vm4, %v3158_v58, %v3160_v44  ;;  %3859 = vperm.xlu1 %5523, %v7200_v28   ;;  %5088 = vmatmul.msk.bf16.gmra.mxu2 %vm2874_vm2, %v5397_v1 }
 0x4c6   : > { %3273 = vmatpush.bf16.msrb.mxu0 %v5138_v57  ;;  %3292 = vmatpush.bf16.msrb.mxu1 %v5142_v11 }
 0x4c7   : > { %5090 = vmatmul.msk.bf16.gmra.mxu3 %vm2874_vm2, %v5397_v1  ;;  %3181 = vmatpush.bf16.msra.mxu2 %v3163_v14 }
 0x4c8   : > { %3200 = vmatpush.bf16.msra.mxu3 %v3164_v3  ;;  %v5417_v3 = vld [vmem:[%s7858_s6 + $0x58] sm:$0xff] }
 0x4c9   : > { %v3378_v53 = vpop.permute.xlu0 %3377 }
 0x4cc   : > { %v3152_v41 = vpop.permute.xlu1 %3151  ;;  %v3493_v39 = vpop.permute.xlu2 %3492 }
 0x4cd   : > { %4325 = vrot.lane.b32.xlu1 %v4306_v42, %s5538_s25  ;;  %v3161_v38 = vsel %vm801_vm4, %v3150_v24, %v3152_v41  ;;  %v3162_v28 = vsel %vm801_vm4, %v3152_v41, %v3154_v7 }
 0x4ce   : > { %3182 = vmatpush.bf16.msra.mxu2 %v3161_v38  ;;  %3201 = vmatpush.bf16.msra.mxu3 %v3162_v28 }
 0x4d1   : > { %5104 = vmatmul.msk.bf16.gmra.mxu0 %vm2874_vm2, %v5401_v12  ;;  %5106 = vmatmul.msk.bf16.gmra.mxu1 %vm2874_vm2, %v5401_v12  ;;  %v3489_v44 = vpop.permute.xlu0 %3488  ;;  %v5419_v12 = vld [vmem:[%s7858_s6 + $0x68] sm:$0xff] }
 0x4d4   : > { %v3374_v52 = vpop.permute.xlu1 %3373  ;;  %v3487_v9 = vpop.permute.xlu2 %3486 }
 0x4d5   : > { %5119 = vmatmul.msk.bf16.vlgmr.msra.gmra.mxu2 %vm2874_vm2, %v5402_v45  ;;  %v3383_v18 = vsel %vm766_vm13, %v3372_v54, %v3374_v52  ;;  %v3384_v63 = vsel %vm766_vm13, %v3374_v52, %v3376_v30  ;;  %v5420_v30 = vld [vmem:[%s7858_s6 + $0x70] sm:$0xff] }
 0x4d7   : > { %5121 = vmatmul.msk.bf16.vlgmr.msra.gmra.mxu3 %vm2874_vm2, %v5402_v45 }
 0x4d9   : > { %v3483_v25 = vpop.permute.xlu0 %3482 }
 0x4dc   : > { %v3380_v40 = vpop.permute.xlu1 %3379  ;;  %v3606_v4 = vpop.permute.xlu2 %3605 }
 0x4dd   : > { %v3385_v2 = vsel %vm766_vm13, %v3378_v53, %v3380_v40  ;;  %v3386_v56 = vsel %vm766_vm13, %v3380_v40, %v3382_v19  ;;  %v5418_v19 = vld [vmem:[%s7858_s6 + $0x60] sm:$0xff] }
 0x4de   : > { %3403 = vmatpush.bf16.msrb.mxu2 %v3385_v2  ;;  %3422 = vmatpush.bf16.msrb.mxu3 %v3386_v56  ;;  %v5422_v53 = vld [vmem:[%s7858_s6 + $0x80] sm:$0xff]  ;;  %v5423_v2 = vld [vmem:[%s7858_s6 + $0x88] sm:$0xff] }
 0x4e1   : > { %5151 = vmatmul.msk.bf16.vlgmr.msrb.gmra.mxu0 %vm2874_vm2, %v5408_v16  ;;  %5153 = vmatmul.msk.bf16.vlgmr.msrb.gmra.mxu1 %vm2874_vm2, %v5408_v16  ;;  %v3602_v47 = vpop.permute.xlu0 %3601 }
 0x4e2   : > { %3404 = vmatpush.bf16.msrb.mxu2 %v3383_v18  ;;  %3423 = vmatpush.bf16.msrb.mxu3 %v3384_v63 }
 0x4e4   : > { %v3491_v7 = vpop.permute.xlu1 %3490  ;;  %v3600_v61 = vpop.permute.xlu2 %3599 }
 0x4e5   : > { %v3496_v24 = vsel %vm666_vm12, %v3489_v44, %v3491_v7  ;;  %v3497_v59 = vsel %vm666_vm12, %v3491_v7, %v3493_v39  ;;  %5120 = vmatmul.msk.bf16.gmra.mxu2 %vm2874_vm2, %v5403_v46  ;;  %v5421_v39 = vld [vmem:[%s7858_s6 + $0x78] sm:$0xff] }
 0x4e6   : > { %3514 = vmatpush.bf16.msra.mxu0 %v3496_v24  ;;  %3533 = vmatpush.bf16.msra.mxu1 %v3497_v59 }
 0x4e7   : > { %5122 = vmatmul.msk.bf16.gmra.mxu3 %vm2874_vm2, %v5403_v46 }
 0x4e9   : > { %v3596_v57 = vpop.permute.xlu0 %3595 }
 0x4ec   : > { %v3485_v21 = vpop.permute.xlu1 %3484  ;;  %v3717_v14 = vpop.permute.xlu2 %3716 }
 0x4ed   : > { %v3494_v50 = vsel %vm666_vm12, %v3483_v25, %v3485_v21  ;;  %v3495_v20 = vsel %vm666_vm12, %v3485_v21, %v3487_v9 }
 0x4ee   : > { %3515 = vmatpush.bf16.msra.mxu0 %v3494_v50  ;;  %3534 = vmatpush.bf16.msra.mxu1 %v3495_v20 }
 0x4f1   : > { %5152 = vmatmul.msk.bf16.gmra.mxu0 %vm2874_vm2, %v5409_v31  ;;  %5154 = vmatmul.msk.bf16.gmra.mxu1 %vm2874_vm2, %v5409_v31  ;;  %v3713_v54 = vpop.permute.xlu0 %3712 }
 0x4f4   : > { %v3604_v5 = vpop.permute.xlu1 %3603  ;;  %v3711_v43 = vpop.permute.xlu2 %3710 }
 0x4f5   : > { %v3609_v17 = vsel %vm1175_vm5, %v3602_v47, %v3604_v5  ;;  %v3610_v23 = vsel %vm1175_vm5, %v3604_v5, %v3606_v4  ;;  %5167 = vmatmul.msk.bf16.vlgmr.msrb.gmra.mxu2 %vm2874_vm2, %v5416_v34 }
 0x4f6   : > { %3627 = vmatpush.bf16.msra.mxu2 %v3609_v17  ;;  %3646 = vmatpush.bf16.msra.mxu3 %v3610_v23 }
 0x4f7   : > { %5169 = vmatmul.msk.bf16.vlgmr.msrb.gmra.mxu3 %vm2874_vm2, %v5416_v34 }
 0x4f9   : > { %v3707_v42 = vpop.permute.xlu0 %3706 }
 0x4fc   : > { %v3598_v11 = vpop.permute.xlu1 %3597 }
 0x4fd   : > { %v3607_v1 = vsel %vm1175_vm5, %v3596_v57, %v3598_v11  ;;  %v3608_v58 = vsel %vm1175_vm5, %v3598_v11, %v3600_v61 }
 0x4fe   : > { %3628 = vmatpush.bf16.msra.mxu2 %v3607_v1  ;;  %3647 = vmatpush.bf16.msra.mxu3 %v3608_v58 }
 0x501   : > { %5183 = vmatmul.msk.bf16.vlgmr.msra.gmra.mxu0 %vm2874_vm2, %v5418_v19  ;;  %5185 = vmatmul.msk.bf16.vlgmr.msra.gmra.mxu1 %vm2874_vm2, %v5418_v19 }
 0x504   : > { %v3715_v32 = vpop.permute.xlu1 %3714 }
 0x505   : > { %v3720_v6 = vsel %vm484_vm11, %v3713_v54, %v3715_v32  ;;  %v3721_v51 = vsel %vm484_vm11, %v3715_v32, %v3717_v14  ;;  %5168 = vmatmul.msk.bf16.gmra.mxu2 %vm2874_vm2, %v5417_v3 }
 0x506   : > { %3738 = vmatpush.bf16.msrb.mxu0 %v3720_v6  ;;  %3757 = vmatpush.bf16.msrb.mxu1 %v3721_v51 }
 0x507   : > { %5170 = vmatmul.msk.bf16.gmra.mxu3 %vm2874_vm2, %v5417_v3 }
 0x50c   : > { %v3709_v41 = vpop.permute.xlu1 %3708 }
 0x50d   : > { %v3718_v38 = vsel %vm484_vm11, %v3707_v42, %v3709_v41  ;;  %v3719_v28 = vsel %vm484_vm11, %v3709_v41, %v3711_v43 }
 0x50e   : > { %3739 = vmatpush.bf16.msrb.mxu0 %v3718_v38  ;;  %3758 = vmatpush.bf16.msrb.mxu1 %v3719_v28 }
 0x511   : > { %5184 = vmatmul.msk.bf16.gmra.mxu0 %vm2874_vm2, %v5419_v12  ;;  %5186 = vmatmul.msk.bf16.gmra.mxu1 %vm2874_vm2, %v5419_v12 }
 0x515   : > { %5223 = vmatmul.msk.bf16.vlgmr.msra.gmra.mxu2 %vm2874_vm2, %v5420_v30 }
 0x517   : > { %5225 = vmatmul.msk.bf16.vlgmr.msra.gmra.mxu3 %vm2874_vm2, %v5420_v30 }
 0x51e   : > { %v2890_v45 = vpop.f32.mrf.mxu0  ;;  %v2909_v52 = vpop.f32.mrf.mxu1 }
 0x521   : > { %5239 = vmatmul.msk.bf16.vlgmr.msrb.gmra.mxu0 %vm2874_vm2, %v5422_v53  ;;  %5241 = vmatmul.msk.bf16.vlgmr.msrb.gmra.mxu1 %vm2874_vm2, %v5422_v53 }
 0x525   : > { %5224 = vmatmul.msk.bf16.gmra.mxu2 %vm2874_vm2, %v5421_v39 }
 0x526   : > { %v7326_v44 = vpop.f32.mrf.mxu0  ;;  %v7328_v40 = vpop.f32.mrf.mxu1 }
 0x527   : > { %5226 = vmatmul.msk.bf16.gmra.mxu3 %vm2874_vm2, %v5421_v39 }
 0x52e   : > { %v2895_v56 = vpop.f32.mrf.mxu0  ;;  %v2914_v16 = vpop.f32.mrf.mxu1 }
 0x531   : > { %5240 = vmatmul.msk.bf16.gmra.mxu0 %vm2874_vm2, %v5423_v2  ;;  %5242 = vmatmul.msk.bf16.gmra.mxu1 %vm2874_vm2, %v5423_v2 }
 0x536   : > { %v2897_v18 = vpop.f32.mrf.mxu0  ;;  %v2916_v63 = vpop.f32.mrf.mxu1 }
 0x538   : > { %v2970_v46 = vpop.f32.mrf.mxu2 }
 0x539   : > { %v2971_v9 = vadd.f32 %v2970_v46, %v2890_v45  ;;  %v2989_v25 = vpop.f32.mrf.mxu3 }
 0x53a   : > { %v2990_v7 = vadd.f32 %v2989_v25, %v2909_v52 }
 0x53e   : > { %v3073_v24 = vpop.f32.mrf.mxu0  ;;  %v3092_v59 = vpop.f32.mrf.mxu1 }
 0x53f   : > { %v3102_v21 = vadd.f32 %v3073_v24, %v2971_v9  ;;  %v3103_v4 = vadd.f32 %v3092_v59, %v2990_v7 }
 0x540   : > { %v2972_v50 = vpop.f32.mrf.mxu2 }
 0x541   : > { %v2991_v20 = vpop.f32.mrf.mxu3  ;;  %v2973_v10 = vadd.f32 %v2972_v50, %v7326_v44  ;;  %v5428_v44 = vld [vmem:[#allocation3 + $0x2c] sm:$0xf0] }
 0x542   : > { %v2992_v8 = vadd.f32 %v2991_v20, %v7328_v40 }
 0x546   : > { %v7335_v31 = vpop.f32.mrf.mxu0  ;;  %v7337_v47 = vpop.f32.mrf.mxu1 }
 0x547   : > { %v3104_v15 = vadd.f32 %v7335_v31, %v2973_v10 }
 0x548   : > { %v2975_v34 = vpop.f32.mrf.mxu2 }
 0x549   : > { %v2976_v5 = vadd.f32 %v2975_v34, %v2895_v56  ;;  %v7363_v34 = vpop.permute.xlu1 %3795 }
 0x54a   : > { %v2994_v17 = vpop.f32.mrf.mxu3 }
 0x54b   : > { %v2995_v23 = vadd.f32 %v2994_v17, %v2914_v16 }
 0x54e   : > { %v3078_v61 = vpop.f32.mrf.mxu0  ;;  %v3097_v57 = vpop.f32.mrf.mxu1 }
 0x54f   : > { %v7339_v11 = vadd.f32 %v3078_v61, %v2976_v5  ;;  %v7341_v1 = vadd.f32 %v3097_v57, %v2995_v23  ;;  %v3781_v57 = vpop.permute.xlu2 %3780 }
 0x550   : > { %v2977_v58 = vpop.f32.mrf.mxu2 }
 0x551   : > { %v2978_v14 = vadd.f32 %v2977_v58, %v2897_v18 }
 0x552   : > { %v2996_v19 = vpop.f32.mrf.mxu3 }
 0x553   : > { %v2997_v3 = vadd.f32 %v2996_v19, %v2916_v63 }
 0x556   : > { %v3080_v54 = vpop.f32.mrf.mxu0  ;;  %v3099_v32 = vpop.f32.mrf.mxu1 }
 0x557   : > { %v7343_v6 = vadd.f32 %v3080_v54, %v2978_v14  ;;  %v7345_v51 = vadd.f32 %v3099_v32, %v2997_v3  ;;  %v7373_v14 = vpop.permute.xlu1 %3785  ;;  %v7379_v32 = vpop.permute.xlu0 %3790 }
 0x558   : > { %v3184_v43 = vpop.f32.mrf.mxu2  ;;  %v7385_v49 = vpop.permute.xlu2 %3839 }
 0x559   : > { %v3213_v0 = vadd.f32 %v3184_v43, %v3102_v21  ;;  %v3105_v21 = vadd.f32 %v7337_v47, %v2992_v8 }
 0x55a   : > { %v3203_v42 = vpop.f32.mrf.mxu3 }
 0x55b   : > { %v3214_v55 = vadd.f32 %v3203_v42, %v3103_v4 }
 0x55e   : > { %v3275_v41 = vpop.f32.mrf.mxu0  ;;  %v3294_v38 = vpop.f32.mrf.mxu1 }
 0x55f   : > { %v3304_v62 = vadd.f32 %v3275_v41, %v3213_v0  ;;  %v3305_v29 = vadd.f32 %v3294_v38, %v3214_v55  ;;  %v7391_v4 = vpop.permute.xlu1 %3863  ;;  %v7393_v0 = vpop.permute.xlu0 %3843  ;;  %v5258_v38 = vld [vmem:[#allocation3 + $0x20] sm:$0xf] }
 0x560   : > { %v3186_v28 = vpop.f32.mrf.mxu2  ;;  %v5259_v20 = vor.u32 %v5428_v44, %v5258_v38 }
 0x561   : > { %v3215_v55 = vadd.f32 %v3186_v28, %v3104_v15  ;;  %v7396_v28 = vpop.permute.xlu2 %3867 }
 0x562   : > { %v3205_v12 = vpop.f32.mrf.mxu3  ;;  %3960 = vrot.lane.b32.xlu2 %v5259_v20, %s5537_s24 }
 0x563   : > { %v3216_v41 = vadd.f32 %v3205_v12, %v3105_v21  ;;  %v5425_v21 = vld [vmem:[#allocation3 + $0xc] sm:$0xf0] }
 0x566   : > { %v3277_v30 = vpop.f32.mrf.mxu0  ;;  %v3296_v53 = vpop.f32.mrf.mxu1 }
 0x568   : > { %v7347_v45 = vpop.f32.mrf.mxu2 }
 0x56a   : > { %v7349_v52 = vpop.f32.mrf.mxu3 }
 0x56e   : > { %v7351_v39 = vpop.f32.mrf.mxu0  ;;  %v7353_v2 = vpop.f32.mrf.mxu1 }
 0x570   : > { %v7355_v56 = vpop.f32.mrf.mxu2 }
 0x572   : > { %v7357_v16 = vpop.f32.mrf.mxu3 }
 0x576   : > { %v7359_v18 = vpop.f32.mrf.mxu0  ;;  %v7361_v63 = vpop.f32.mrf.mxu1 }
 0x578   : > { %v3406_v46 = vpop.f32.mrf.mxu2 }
 0x579   : > { %v3435_v48 = vadd.f32 %v3406_v46, %v3304_v62  ;;  %v3306_v62 = vadd.f32 %v3277_v30, %v3215_v55  ;;  %v3217_v30 = vadd.f32 %v7347_v45, %v7339_v11 }
 0x57a   : > { %v3425_v9 = vpop.f32.mrf.mxu3 }
 0x57b   : > { %v3436_v35 = vadd.f32 %v3425_v9, %v3305_v29  ;;  %v3307_v29 = vadd.f32 %v3296_v53, %v3216_v41  ;;  %v3218_v53 = vadd.f32 %v7349_v52, %v7341_v1 }
 0x57d   : > { %v3309_v38 = vadd.f32 %v7353_v2, %v3218_v53 }
 0x57e   : > { %v3517_v25 = vpop.f32.mrf.mxu0  ;;  %v3536_v7 = vpop.f32.mrf.mxu1 }
 0x57f   : > { %v3546_v43 = vadd.f32 %v3517_v25, %v3435_v48  ;;  %v3547_v42 = vadd.f32 %v3536_v7, %v3436_v35 }
 0x580   : > { %v3408_v24 = vpop.f32.mrf.mxu2 }
 0x581   : > { %v3437_v8 = vadd.f32 %v3408_v24, %v3306_v62 }
 0x582   : > { %v3427_v59 = vpop.f32.mrf.mxu3 }
 0x583   : > { %v3438_v48 = vadd.f32 %v3427_v59, %v3307_v29  ;;  %v5246_v59 = vld [vmem:[#allocation3] sm:$0xf] }
 0x586   : > { %v3519_v5 = vpop.f32.mrf.mxu0  ;;  %v3538_v17 = vpop.f32.mrf.mxu1 }
 0x587   : > { %v3548_v12 = vadd.f32 %v3519_v5, %v3437_v8  ;;  %v5247_v5 = vor.u32 %v5425_v21, %v5246_v59 }
 0x588   : > { %v7365_v23 = vpop.f32.mrf.mxu2 }
 0x589   : > { %3954 = vrot.lane.b32.xlu2 %v5247_v5, %s5537_s24 }
 0x58a   : > { %v7367_v61 = vpop.f32.mrf.mxu3 }
 0x58b   : > { %v3440_v52 = vadd.f32 %v7367_v61, %v3309_v38  ;;  %v3220_v61 = vadd.f32 %v7357_v16, %v7345_v51 }
 0x58e   : > { %v7369_v58 = vpop.f32.mrf.mxu0  ;;  %v7371_v19 = vpop.f32.mrf.mxu1 }
 0x590   : > { %v7375_v3 = vpop.f32.mrf.mxu2 }
 0x592   : > { %v7377_v54 = vpop.f32.mrf.mxu3 }
 0x596   : > { %v7381_v37 = vpop.f32.mrf.mxu0  ;;  %v7383_v13 = vpop.f32.mrf.mxu1 }
 0x598   : > { %v3630_v33 = vpop.f32.mrf.mxu2 }
 0x599   : > { %v3659_v50 = vadd.f32 %v3630_v33, %v3546_v43  ;;  %v3549_v33 = vadd.f32 %v3538_v17, %v3438_v48  ;;  %v3832_v43 = vpop.permute.xlu1 %3831  ;;  %v3308_v17 = vadd.f32 %v7351_v39, %v3217_v30 }
 0x59a   : > { %v3649_v27 = vpop.f32.mrf.mxu3 }
 0x59b   : > { %v3660_v40 = vadd.f32 %v3649_v27, %v3547_v42  ;;  %v3856_v42 = vpop.permute.xlu0 %3855  ;;  %v3439_v1 = vadd.f32 %v7365_v23, %v3308_v17  ;;  %v3219_v23 = vadd.f32 %v7355_v56, %v7343_v6 }
 0x59e   : > { %v3741_v46 = vpop.f32.mrf.mxu0  ;;  %v3760_v9 = vpop.f32.mrf.mxu1 }
 0x59f   : > { %v3770_v10 = vadd.f32 %v3741_v46, %v3659_v50  ;;  %v3771_v31 = vadd.f32 %v3760_v9, %v3660_v40 }
 0x5a0   : > { %v3632_v35 = vpop.f32.mrf.mxu2 }
 0x5a1   : > { %v3798_v47 = vadd.f32 %v3781_v57, %v3770_v10  ;;  %v3799_v25 = vadd.f32 %v3781_v57, %v3771_v31  ;;  %v3661_v24 = vadd.f32 %v3632_v35, %v3548_v12  ;;  %v3550_v10 = vadd.f32 %v7369_v58, %v3439_v1  ;;  %v3860_v53 = vpop.permute.xlu1 %3859 }
 0x5a2   : > { %v3651_v15 = vpop.f32.mrf.mxu3  ;;  %v3551_v31 = vadd.f32 %v7371_v19, %v3440_v52  ;;  %v3310_v19 = vadd.f32 %v7359_v18, %v3219_v23  ;;  %v3311_v12 = vadd.f32 %v7361_v63, %v3220_v61 }
 0x5a3   : > { %v3814_v27 = vmul.f32 0.01, %v3798_v47  ;;  %v3815_v7 = vmul.f32 0.01, %v3799_v25  ;;  %vm3806_vm8 = vcmp.ge.f32.partialorder %v3798_v47, 0.0  ;;  %vm3807_vm9 = vcmp.ge.f32.partialorder %v3799_v25, 0.0 }
 0x5a4   : > { %v3662_v57 = vadd.f32 %v3651_v15, %v3549_v33  ;;  %v3441_v56 = vadd.f32 %v7375_v3, %v3310_v19  ;;  %v3442_v51 = vadd.f32 %v7377_v54, %v3311_v12 }
 0x5a5   : > { %v3822_v55 = vsel %vm3806_vm8, %v3798_v47, %v3814_v27  ;;  %v3823_v41 = vsel %vm3807_vm9, %v3799_v25, %v3815_v7  ;;  %v3836_v47 = vpop.permute.xlu2 %3835 }
 0x5a6   : > { %v3743_v44 = vpop.f32.mrf.mxu0  ;;  %v3762_v50 = vpop.f32.mrf.mxu1  ;;  %v3846_v40 = vmul.f32 %v3832_v43, %v3822_v55  ;;  %v3847_v11 = vmul.f32 %v3832_v43, %v3823_v41  ;;  %v3552_v18 = vadd.f32 %v7381_v37, %v3441_v56  ;;  %v3553_v63 = vadd.f32 %v7383_v13, %v3442_v51 }
 0x5a7   : > { %v3772_v45 = vadd.f32 %v3743_v44, %v3661_v24  ;;  %v3773_v20 = vadd.f32 %v3762_v50, %v3662_v57 }
 0x5a8   : > { %v3870_v62 = vadd.f32 %v3856_v42, %v3846_v40  ;;  %v3871_v29 = vadd.f32 %v3856_v42, %v3847_v11  ;;  %v3635_v46 = vpop.f32.mrf.mxu2 }
 0x5a9   : > { %v3800_v9 = vadd.f32 %v7373_v14, %v3772_v45  ;;  %v3801_v39 = vadd.f32 %v7373_v14, %v3773_v20  ;;  %v3663_v14 = vadd.f32 %v3635_v46, %v3550_v10 }
 0x5aa   : > { %v3654_v2 = vpop.f32.mrf.mxu3  ;;  %v7411_v8 = vpack.c.bf16 %v3871_v29, %v3870_v62 }
 0x5ab   : > { %v3816_v48 = vmul.f32 0.01, %v3800_v9  ;;  %v3817_v35 = vmul.f32 0.01, %v3801_v39  ;;  %vm3808_vm10 = vcmp.ge.f32.partialorder %v3800_v9, 0.0  ;;  %vm3809_vm14 = vcmp.ge.f32.partialorder %v3801_v39, 0.0 }
 0x5ac   : > { %3882 = vst [vmem:[#allocation3 + $0x4] sm:$0xff] %v7411_v8  ;;  %v3664_v25 = vadd.f32 %v3654_v2, %v3551_v31 }
 0x5ad   : > { %v3824_v58 = vsel %vm3808_vm10, %v3800_v9, %v3816_v48  ;;  %v3825_v15 = vsel %vm3809_vm14, %v3801_v39, %v3817_v35 }
 0x5ae   : > { %v3848_v33 = vmul.f32 %v3836_v47, %v3824_v58  ;;  %v3849_v27 = vmul.f32 %v3836_v47, %v3825_v15  ;;  %v3746_v7 = vpop.f32.mrf.mxu0  ;;  %v3765_v30 = vpop.f32.mrf.mxu1 }
 0x5af   : > { %v3774_v24 = vadd.f32 %v3746_v7, %v3663_v14  ;;  %v3775_v6 = vadd.f32 %v3765_v30, %v3664_v25  ;;  %v7458_v30 = vunpack.c.h.bf16 %v7411_v8 }
 0x5b0   : > { %v3872_v16 = vadd.f32 %v3860_v53, %v3848_v33  ;;  %v3873_v59 = vadd.f32 %v3860_v53, %v3849_v27  ;;  %v3637_v42 = vpop.f32.mrf.mxu2  ;;  %v7461_v53 = vunpack.c.l.bf16 %v7411_v8 }
 0x5b1   : > { %v3802_v21 = vadd.f32 %v7379_v32, %v3774_v24  ;;  %v3803_v43 = vadd.f32 %v7379_v32, %v3775_v6  ;;  %v3665_v17 = vadd.f32 %v3637_v42, %v3552_v18  ;;  %v8084_v42 = vld [vmem:[#allocation16_spill] sm:$0xff] }
 0x5b2   : > { %v3879_v57 = vpack.c.bf16 %v3873_v59, %v3872_v16  ;;  %v3656_v55 = vpop.f32.mrf.mxu3  ;;  %v8083_v59 = vld [vmem:[#allocation14_spill] sm:$0xff] }
 0x5b3   : > { %vm3810_vm0 = vcmp.ge.f32.partialorder %v3802_v21, 0.0  ;;  %v3818_v41 = vmul.f32 0.01, %v3802_v21  ;;  %vm3811_vm6 = vcmp.ge.f32.partialorder %v3803_v43, 0.0  ;;  %v3819_v5 = vmul.f32 0.01, %v3803_v43 }
 0x5b4   : > { %3883 = vst [vmem:[#allocation3 + $0x14] sm:$0xff] %v3879_v57  ;;  %v3666_v38 = vadd.f32 %v3656_v55, %v3553_v63  ;;  %v3887_v11 = vld [vmem:[#allocation3] sm:$0xff]  ;;  %v7432_v62 = vld [vmem:[#allocation3 + $0x8] sm:$0xff]   ;;  %v7444_v35 = vunpack.c.h.bf16 %v3879_v57  ;;  %v7446_v47 = vunpack.c.l.bf16 %v3879_v57  ;;  %v7482_v63 = vmul.f32 %v7458_v30, %v8057_v22 }
 0x5b5   : > { %v3826_v3 = vsel %vm3810_vm0, %v3802_v21, %v3818_v41  ;;  %v3827_v54 = vsel %vm3811_vm6, %v3803_v43, %v3819_v5  ;;  %v5254_v46 = vld [vmem:[#allocation3 + $0x8] sm:$0xf]  ;;  %v5424_v9 = vld [vmem:[#allocation3 + $0x4] sm:$0xf]  ;;  %v7440_v48 = vunpack.c.l.bf16 %v7432_v62  ;;  %v7486_v57 = vmul.f32 %v8083_v59, %v7461_v53 }
 0x5b6   : > { %v3850_v44 = vmul.f32 %v7385_v49, %v3826_v3  ;;  %v3851_v32 = vmul.f32 %v7385_v49, %v3827_v54  ;;  %v3748_v50 = vpop.f32.mrf.mxu0  ;;  %v3767_v37 = vpop.f32.mrf.mxu1  ;;  %v7436_v49 = vunpack.c.l.bf16 %v3887_v11  ;;  %v7470_v16 = vmul.f32 %v7444_v35, %v8057_v22  ;;  %v8085_v3 = vld [vmem:[#allocation18_spill] sm:$0xff] }
 0x5b7   : > { %v3776_v40 = vadd.f32 %v3748_v50, %v3665_v17  ;;  %v3777_v13 = vadd.f32 %v3767_v37, %v3666_v38  ;;  %v7474_v21 = vmul.f32 %v8083_v59, %v7446_v47  ;;  %v3909_v18 = vmul.f32 %v8061_v26, %v7440_v48  ;;  %v8086_v50 = vld [vmem:[#allocation7_spill] sm:$0xff] }
 0x5b8   : > { %v3874_v45 = vadd.f32 %v7391_v4, %v3850_v44  ;;  %v3875_v20 = vadd.f32 %v7391_v4, %v3851_v32  ;;  %v3907_v27 = vmul.f32 %v8055_v60, %v7436_v49  ;;  %v7490_v55 = vmul.f32 %v8084_v42, %v7461_v53 }
 0x5b9   : > { %v3804_v1 = vadd.f32 %v7363_v34, %v3776_v40  ;;  %v3805_v52 = vadd.f32 %v7363_v34, %v3777_v13  ;;  %v7442_v34 = vunpack.c.h.bf16 %v3887_v11  ;;  %v7495_v54 = vmul.f32 %v7458_v30, %v8085_v3 }
 0x5ba   : > { %v7434_v29 = vpack.c.bf16 %v3875_v20, %v3874_v45  ;;  %v4302_v17 = vpack.c.bf16 %v7470_v16, %v7482_v63  ;;  %v4301_v38 = vpack.c.bf16 %v7474_v21, %v7486_v57  ;;  %v7503_v44 = vmul.f32 %v8084_v42, %v7446_v47  ;;  %v8087_v45 = vld [vmem:[#allocation9_spill] sm:$0xff] }
 0x5bb   : > { %vm3812_vm7 = vcmp.ge.f32.partialorder %v3804_v1, 0.0  ;;  %v3820_v39 = vmul.f32 0.01, %v3804_v1  ;;  %vm3813_vm8 = vcmp.ge.f32.partialorder %v3805_v52, 0.0  ;;  %v3821_v2 = vmul.f32 0.01, %v3805_v52 }
 0x5bc   : > { %3884 = vst [vmem:[#allocation3 + $0x24] sm:$0xff] %v7434_v29  ;;  %v5426_v10 = vld [vmem:[#allocation3 + $0x14] sm:$0xf0]  ;;  %v5248_v4 = vld [vmem:[#allocation3 + $0x10] sm:$0xf0]  ;;  %v7507_v32 = vmul.f32 %v7444_v35, %v8085_v3  ;;  %v4378_v40 = vpack.c.bf16 %v7503_v44, %v7490_v55  ;;  %v4060_v11 = vmul.f32 %v8086_v50, %v7440_v48 }
 0x5bd   : > { %v3889_v31 = vld [vmem:[#allocation3 + $0x10] sm:$0xff]  ;;  %v3828_v23 = vsel %vm3812_vm7, %v3804_v1, %v3820_v39  ;;  %v3829_v61 = vsel %vm3813_vm8, %v3805_v52, %v3821_v2  ;;  %v5255_v14 = vor.u32 %v5426_v10, %v5254_v46  ;;  %v5251_v25 = vor.u32 %v5424_v9, %v5248_v4  ;;  %v7448_v58 = vld [vmem:[#allocation3 + $0x18] sm:$0xff]  }
 0x5be   : > { %v3852_v15 = vmul.f32 %v7393_v0, %v3828_v23  ;;  %v3853_v19 = vmul.f32 %v7393_v0, %v3829_v61  ;;  %v3898_v12 = vunpack.c.l.bf16 %v3889_v31  ;;  %v3900_v33 = vunpack.c.l.bf16 %v7448_v58  ;;  %v8088_v1 = vld [vmem:[#allocation8_spill] sm:$0xff] }
 0x5bf   : > { %3958 = vrot.lane.b32.xlu1 %v5255_v14, %s5537_s24  ;;  %3956 = vrot.lane.b32.xlu0 %v5251_v25, %s5537_s24  ;;  %v3899_v7 = vunpack.c.h.bf16 %v3889_v31  ;;  %v4379_v13 = vpack.c.bf16 %v7507_v32, %v7495_v54  ;;  %v4284_v46 = vunpack.c.h.bf16 %v7434_v29  ;;  %v4283_v2 = vunpack.c.l.bf16 %v7434_v29  ;;  %v8089_v14 = vld [vmem:[#allocation10_spill] sm:$0xff] }
 0x5c0   : > { %v3876_v24 = vadd.f32 %v7396_v28, %v3852_v15  ;;  %v3877_v0 = vadd.f32 %v7396_v28, %v3853_v19  ;;  %v3910_v6 = vmul.f32 %v8055_v60, %v3898_v12  ;;  %v3912_v56 = vmul.f32 %v8061_v26, %v3900_v33 }
 0x5c1   : > { %v3911_v51 = vmul.f32 %v3899_v7, %v8062_v36  ;;  %v3908_v28 = vmul.f32 %v7442_v34, %v8062_v36  ;;  %v4063_v37 = vmul.f32 %v8086_v50, %v3900_v33  ;;  %v4062_v20 = vmul.f32 %v3899_v7, %v8087_v45 }
 0x5c2   : > { %v3881_v8 = vpack.c.bf16 %v3877_v0, %v3876_v24  ;;  %v3919_v43 = vpack.c.bf16 %v3910_v6, %v3907_v27  ;;  %v3921_v41 = vpack.c.bf16 %v3912_v56, %v3909_v18  ;;  %v4061_v52 = vmul.f32 %v8088_v1, %v3898_v12 }
 0x5c3   : > { %v3920_v5 = vpack.c.bf16 %v3911_v51, %v3908_v28  ;;  %v4072_v9 = vpack.c.bf16 %v4063_v37, %v4060_v11  ;;  %v4059_v4 = vmul.f32 %v7442_v34, %v8087_v45  ;;  %v4058_v31 = vmul.f32 %v8088_v1, %v7436_v49  ;;  %v8092_v11 = vld [vmem:[#allocation25_spill] sm:$0xff] }
 0x5c4   : > { %3885 = vst [vmem:[#allocation3 + $0x34] sm:$0xff] %v3881_v8  ;;  %4009 = vrot.lane.b32.xlu2 %v3919_v43, %s5539_s26  ;;  %v4287_v39 = vunpack.c.h.bf16 %v3881_v8  ;;  %v4286_v10 = vunpack.c.l.bf16 %v3881_v8  ;;  %v4138_v25 = vmul.f32 %v8089_v14, %v3898_v12  ;;  %v7529_v15 = vmul.f32 %v4284_v46, %v8057_v22  ;;  %v8091_v43 = vld [vmem:[#allocation12_spill] sm:$0xff] }
 0x5c5   : > { %v4071_v23 = vpack.c.bf16 %v4062_v20, %v4059_v4  ;;  %v4070_v61 = vpack.c.bf16 %v4061_v52, %v4058_v31  ;;  %v7535_v29 = vmul.f32 %v8083_v59, %v4283_v2  ;;  %v7546_v12 = vmul.f32 %v4284_v46, %v8085_v3 }
 0x5c6   : > { %v7532_v19 = vmul.f32 %v4287_v39, %v8057_v22  ;;  %v7538_v27 = vmul.f32 %v8083_v59, %v4286_v10  ;;  %v7541_v24 = vmul.f32 %v4287_v39, %v8085_v3  ;;  %v7549_v0 = vmul.f32 %v8084_v42, %v4283_v2  ;;  %v8090_v59 = vld [vmem:[#allocation11_spill] sm:$0xff] }
 0x5c7   : > { %4013 = vrot.lane.b32.xlu1 %v3921_v41, %s5539_s26  ;;  %4011 = vrot.lane.b32.xlu0 %v3920_v5, %s5539_s26  ;;  %v7552_v22 = vmul.f32 %v8084_v42, %v4286_v10  ;;  %v4135_v6 = vmul.f32 %v8089_v14, %v7436_v49  ;;  %v4140_v8 = vmul.f32 %v8090_v59, %v3900_v33  ;;  %v7572_v3 = vunpack.c.h.bf16 %v7432_v62 }
 0x5c8   : > { %v4305_v56 = vpack.c.bf16 %v7532_v19, %v7529_v15  ;;  %v4304_v51 = vpack.c.bf16 %v7538_v27, %v7535_v29  ;;  %v4139_v18 = vmul.f32 %v3899_v7, %v8091_v43  ;;  %v4382_v28 = vpack.c.bf16 %v7541_v24, %v7546_v12  ;;  %v5436_v15 = vld [vmem:[#allocation3 + $0x18] sm:$0xf0]  ;;  %v5318_v19 = vld [vmem:[#allocation3 + $0x24] sm:$0xf]  ;;  %v5434_v29 = vld [vmem:[#allocation3 + $0x8] sm:$0xf] }
 0x5c9   : > { %v4381_v42 = vpack.c.bf16 %v7552_v22, %v7549_v0  ;;  %v4147_v41 = vpack.c.bf16 %v4138_v25, %v4135_v6  ;;  %v4137_v49 = vmul.f32 %v8090_v59, %v7440_v48  ;;  %v4136_v5 = vmul.f32 %v7442_v34, %v8091_v43  ;;  %v8093_v34 = vld [vmem:[#allocation22_spill] sm:$0xff]  ;;  %v5435_v24 = vld [vmem:[#allocation3 + $0x10] sm:$0xf0] }
 0x5ca   : > { %v7575_v33 = vunpack.c.h.bf16 %v7448_v58  ;;  %v7579_v20 = vmul.f32 %v7458_v30, %v8092_v11  ;;  %v7582_v52 = vmul.f32 %v4284_v46, %v8092_v11  ;;  %v7585_v48 = vmul.f32 %v4287_v39, %v8092_v11  ;;  %v5306_v12 = vld [vmem:[#allocation3 + $0x4] sm:$0xf] }
 0x5cb   : > { %v4149_v7 = vpack.c.bf16 %v4140_v8, %v4137_v49  ;;  %v4148_v37 = vpack.c.bf16 %v4139_v18, %v4136_v5  ;;  %v7592_v62 = vmul.f32 %v8093_v34, %v7461_v53  ;;  %v5260_v58 = vld [vmem:[#allocation3 + $0x30] sm:$0xf0]  ;;  %v7597_v30 = vmul.f32 %v8093_v34, %v4286_v10  ;;  %v5427_v10 = vld [vmem:[#allocation3 + $0x24] sm:$0xf]  ;;  %v5429_v25 = vld [vmem:[#allocation3 + $0x34] sm:$0xf0] }
 0x5cc   : > { %4088 = vrot.lane.b32.xlu2 %v4072_v9, %s5540_s27  ;;  %v7588_v9 = vmul.f32 %v8093_v34, %v4283_v2  ;;  %v7601_v46 = vmul.f32 %v7444_v35, %v8092_v11  ;;  %v7605_v39 = vmul.f32 %v8093_v34, %v7446_v47  ;;  %v4538_v53 = vpack.c.bf16 %v7585_v48, %v7582_v52  ;;  %v8094_v2 = vld [vmem:[#allocation21_spill] sm:$0xff]  ;;  %v5266_v8 = vld [vmem:[#allocation3 + $0x28] sm:$0xf]  ;;  %v3891_v34 = vld [vmem:[#allocation3 + $0x20] sm:$0xff] }
 0x5cd   : > { %v7611_v4 = vmul.f32 %v8094_v2, %v7572_v3  ;;  %v7615_v31 = vmul.f32 %v8094_v2, %v7575_v33  ;;  %v5267_v18 = vor.u32 %v5429_v25, %v5266_v8  ;;  %v3894_v5 = vld [vmem:[#allocation3 + $0x38] sm:$0xf]  ;;  %v3892_v11 = vld [vmem:[#allocation3 + $0x28] sm:$0xf]  ;;  %v3902_v63 = vunpack.c.h.bf16 %v3891_v34  ;;  %v8096_v25 = vld [vmem:[#allocation24_spill] sm:$0xff] }
 0x5ce   : > { %v4537_v35 = vpack.c.bf16 %v7597_v30, %v7588_v9  ;;  %v4534_v47 = vpack.c.bf16 %v7605_v39, %v7592_v62  ;;  %v3906_v2 = vunpack.c.l.bf16 %v3894_v5  ;;  %v3903_v16 = vunpack.c.l.bf16 %v3892_v11  ;;  %v8097_v8 = vld [vmem:[#allocation23_spill] sm:$0xff]  ;;  %v5438_v32 = vld [vmem:[#allocation3 + $0x30] sm:$0xf0]  ;;  %v5243_v62 = vld [vmem:[%s7860_s8 + $0x2] sm:$0x3] }
 0x5cf   : > { %4086 = vrot.lane.b32.xlu1 %v4071_v23, %s5540_s27  ;;  %4084 = vrot.lane.b32.xlu0 %v4070_v61, %s5540_s27  ;;  %v4535_v23 = vpack.c.bf16 %v7601_v46, %v7579_v20  ;;  %v5263_v61 = vor.u32 %v5427_v10, %v5260_v58  ;;  %v4536_v6 = vpack.c.bf16 %v7615_v31, %v7611_v4 }
 0x5d0   : > { %v3915_v57 = vmul.f32 %v8061_v26, %v3903_v16  ;;  %v5307_v0 = vor.u32 %v5435_v24, %v5306_v12  ;;  %v5275_v12 = vld [vmem:[%s7860_s8 + $0x6] sm:$0x3] }
 0x5d4   : > { %4161 = vrot.lane.b32.xlu2 %v4147_v41, %s5541_s28  ;;  %v8095_v41 = vld [vmem:[#allocation13_spill] sm:$0xff] }
 0x5d5   : > { %v4294_v49 = vmul.f32 %v8095_v41, %v7575_v33 }
 0x5d7   : > { %4165 = vrot.lane.b32.xlu1 %v4149_v7, %s5541_s28  ;;  %4163 = vrot.lane.b32.xlu0 %v4148_v37, %s5541_s28  ;;  %v3893_v7 = vld [vmem:[#allocation3 + $0x30] sm:$0xff]  ;;  %v4291_v37 = vmul.f32 %v8095_v41, %v7572_v3  ;;  %v3901_v41 = vunpack.c.l.bf16 %v3891_v34 }
 0x5d8   : > { %v3905_v10 = vunpack.c.h.bf16 %v3893_v7  ;;  %v3904_v21 = vunpack.c.l.bf16 %v3893_v7  ;;  %v4065_v7 = vmul.f32 %v3902_v63, %v8087_v45 }
 0x5d9   : > { %v4303_v58 = vpack.c.bf16 %v4294_v49, %v4291_v37  ;;  %v4064_v37 = vmul.f32 %v8088_v1, %v3901_v41 }
 0x5da   : > { %v3916_v44 = vmul.f32 %v8055_v60, %v3904_v21 }
 0x5dc   : > { %3962 = vrot.lane.b32.xlu2 %v5263_v61, %s5537_s24  ;;  %v3917_v61 = vmul.f32 %v3905_v10, %v8062_v36 }
 0x5df   : > { %3964 = vrot.lane.b32.xlu1 %v5267_v18, %s5537_s24  ;;  %4317 = vrot.lane.b32.xlu0 %v4302_v17, %s5538_s25  ;;  %v3918_v17 = vmul.f32 %v8061_v26, %v3906_v2  ;;  %v8098_v18 = vpack.c.bf16 %v8096_v25, %v8097_v8  ;;  %v4068_v26 = vmul.f32 %v3905_v10, %v8087_v45 }
 0x5e0   : > { %v4143_v45 = vmul.f32 %v8090_v59, %v3903_v16  ;;  %v4144_v8 = vmul.f32 %v8089_v14, %v3904_v21 }
 0x5e1   : > { %v3924_v49 = vpack.c.bf16 %v3918_v17, %v3915_v57  ;;  %v4074_v11 = vpack.c.bf16 %v4068_v26, %v4065_v7  ;;  %v4146_v17 = vmul.f32 %v8090_v59, %v3906_v2 }
 0x5e4   : > { %4315 = vrot.lane.b32.xlu2 %v4301_v38, %s5538_s25  ;;  %v3914_v38 = vmul.f32 %v3902_v63, %v8062_v36  ;;  %v4067_v36 = vmul.f32 %v8088_v1, %v3904_v21  ;;  %v4142_v1 = vmul.f32 %v3902_v63, %v8091_v43  ;;  %v5439_v21 = vld [vmem:[#allocation3 + $0x38] sm:$0xf0] }
 0x5e6   : > { %v3923_v55 = vpack.c.bf16 %v3917_v61, %v3914_v38  ;;  %v4073_v34 = vpack.c.bf16 %v4067_v36, %v4064_v37  ;;  %v4145_v61 = vmul.f32 %v3905_v10, %v8091_v43  ;;  %v4152_v38 = vpack.c.bf16 %v4146_v17, %v4143_v45  ;;  %v5437_v10 = vld [vmem:[#allocation3 + $0x28] sm:$0xf] }
 0x5e7   : > { %4319 = vrot.lane.b32.xlu1 %v4303_v58, %s5538_s25  ;;  %4392 = vrot.lane.b32.xlu0 %v4378_v40, %s5536_s23  ;;  %v3913_v40 = vmul.f32 %v8055_v60, %v3901_v41  ;;  %v4069_v58 = vmul.f32 %v8086_v50, %v3906_v2  ;;  %v4066_v60 = vmul.f32 %v8086_v50, %v3903_v16  ;;  %v8099_v43 = vld [vmem:[#allocation15_spill] sm:$0xff] }
 0x5e8   : > { %v4151_v25 = vpack.c.bf16 %v4145_v61, %v4142_v1  ;;  %v4141_v50 = vmul.f32 %v8089_v14, %v3901_v41  ;;  %v4371_v16 = vmul.f32 %v8099_v43, %v7575_v33  ;;  %v4368_v63 = vmul.f32 %v8099_v43, %v7572_v3  ;;  %v5326_v14 = vld [vmem:[#allocation3 + $0x2c] sm:$0xf]  ;;  %v5308_v3 = vld [vmem:[#allocation3 + $0x14] sm:$0xf0]  ;;  %v5289_v43 = vld [vmem:[#allocation3 + $0x24] sm:$0xf] }
 0x5e9   : > { %v3922_v5 = vpack.c.bf16 %v3916_v44, %v3913_v40  ;;  %v4075_v57 = vpack.c.bf16 %v4069_v58, %v4066_v60  ;;  %v5311_v27 = vor.u32 %v5434_v29, %v5308_v3  ;;  %v8101_v44 = vld [vmem:[#allocation26_spill] sm:$0xff]  ;;  %v5430_v3 = vld [vmem:[#allocation3 + $0x8] sm:$0xf] }
 0x5ea   : > { %v4150_v2 = vpack.c.bf16 %v4144_v8, %v4141_v50  ;;  %v4380_v41 = vpack.c.bf16 %v4371_v16, %v4368_v63  ;;  %v5432_v16 = vld [vmem:[#allocation3 + $0x28] sm:$0xf] }
 0x5ec   : > { %4402 = vrot.lane.b32.xlu2 %v8098_v18, %s5536_s23  ;;  %v5320_v18 = vld [vmem:[#allocation3 + $0x34] sm:$0xf0] }
 0x5ed   : > { %v5323_v59 = vor.u32 %v5437_v10, %v5320_v18  ;;  %v5433_v10 = vld [vmem:[#allocation3 + $0x30] sm:$0xf0] }
 0x5ef   : > { %4019 = vrot.lane.b32.xlu1 %v3924_v49, %s5539_s26  ;;  %4017 = vrot.lane.b32.xlu0 %v3923_v55, %s5539_s26  ;;  %v3961_v49 = vpop.permute.xlu2 %3960  ;;  %v5327_v55 = vor.u32 %v5439_v21, %v5326_v14 }
 0x5f4   : > { %4015 = vrot.lane.b32.xlu2 %v3922_v5, %s5539_s26  ;;  %s379_s26 = scalar_lea.vmem %s7862_s10, %s5615_s15 }
 0x5f7   : > { %4092 = vrot.lane.b32.xlu1 %v4074_v11, %s5540_s27  ;;  %4090 = vrot.lane.b32.xlu0 %v4073_v34, %s5540_s27  ;;  %v3955_v54 = vpop.permute.xlu2 %3954 }
 0x5fc   : > { %4094 = vrot.lane.b32.xlu2 %v4075_v57, %s5540_s27 }
 0x5ff   : > { %4171 = vrot.lane.b32.xlu1 %v4152_v38, %s5541_s28  ;;  %4169 = vrot.lane.b32.xlu0 %v4151_v25, %s5541_s28  ;;  %v3925_v25 = vld [vmem:[%s7860_s8] sm:$0x3] }
 0x604   : > { %4167 = vrot.lane.b32.xlu2 %v4150_v2, %s5541_s28 }
 0x607   : > { %4394 = vrot.lane.b32.xlu1 %v4379_v13, %s5536_s23  ;;  %4479 = vrot.lane.b32.xlu0 %v5323_v59, %s5543_s12  ;;  %v5314_v13 = vld [vmem:[#allocation3 + $0xc] sm:$0xf]  ;;  %v5291_v59 = vld [vmem:[#allocation3 + $0x34] sm:$0xf0] }
 0x608   : > { %v5315_v33 = vor.u32 %v5436_v15, %v5314_v13  ;;  %v5281_v13 = vld [vmem:[#allocation3 + $0x4] sm:$0xf] }
 0x60c   : > { %4396 = vrot.lane.b32.xlu2 %v4380_v41, %s5536_s23  ;;  %v5290_v41 = vor.u32 %v5433_v10, %v5289_v43 }
 0x60f   : > { %4481 = vrot.lane.b32.xlu1 %v5327_v55, %s5543_s12  ;;  %4323 = vrot.lane.b32.xlu0 %v4305_v56, %s5538_s25  ;;  %v5319_v56 = vor.u32 %v5438_v32, %v5318_v19  ;;  %v5431_v55 = vld [vmem:[#allocation3 + $0x10] sm:$0xf0]  ;;  %v5283_v32 = vld [vmem:[#allocation3 + $0x14] sm:$0xf0] }
 0x614   : > { %4321 = vrot.lane.b32.xlu2 %v4304_v51, %s5538_s25 }
 0x617   : > { %4400 = vrot.lane.b32.xlu1 %v4382_v28, %s5536_s23  ;;  %4398 = vrot.lane.b32.xlu0 %v4381_v42, %s5536_s23  ;;  %v7716_v28 = vpop.permute.xlu1 %4325  ;;  %v8100_v42 = vld [vmem:[#allocation27_spill] sm:$0xff] }
 0x618   : > { %v8102_v40 = vpack.c.bf16 %v8100_v42, %v8101_v44  ;;  %v5278_v44 = vld [vmem:[%s7860_s8 + $0x8] sm:$0x3] }
 0x61c   : > { %4477 = vrot.lane.b32.xlu2 %v5319_v56, %s5543_s12  ;;  %v5282_v56 = vor.u32 %v5431_v55, %v5281_v13 }
 0x61e   : > { %v4010_v51 = vpop.permute.xlu2 %4009 }
 0x61f   : > { %4475 = vrot.lane.b32.xlu1 %v5315_v33, %s5543_s12  ;;  %4473 = vrot.lane.b32.xlu0 %v5311_v27, %s5543_s12  ;;  %v5286_v27 = vor.u32 %v5430_v3, %v5283_v32 }
 0x624   : > { %4471 = vrot.lane.b32.xlu2 %v5307_v0, %s5543_s12 }
 0x626   : > { %v7706_v22 = vpop.permute.xlu2 %4088 }
 0x627   : > { %4556 = vrot.lane.b32.xlu1 %v4538_v53, %s5535_s22  ;;  %4554 = vrot.lane.b32.xlu0 %v4537_v35, %s5535_s22 }
 0x62c   : > { %4558 = vrot.lane.b32.xlu2 %v8102_v40, %s5535_s22 }
 0x62e   : > { %v7722_v26 = vpop.permute.xlu2 %4161 }
 0x62f   : > { %4550 = vrot.lane.b32.xlu1 %v4535_v23, %s5535_s22  ;;  %4548 = vrot.lane.b32.xlu0 %v4534_v47, %s5535_s22 }
 0x631   : > { %v3957_v52 = vpop.permute.xlu0 %3956  ;;  %v3959_v48 = vpop.permute.xlu1 %3958 }
 0x632   : > { %v3966_v20 = vsel %vm528_vm15, %v3955_v54, %v3957_v52  ;;  %v3967_v37 = vsel %vm528_vm15, %v3957_v52, %v3959_v48  ;;  %v5272_v54 = vld [vmem:[%s7860_s8 + $0x4] sm:$0x3] }
 0x634   : > { %4552 = vrot.lane.b32.xlu2 %v4536_v6, %s5535_s22 }
 0x636   : > { %v3963_v9 = vpop.permute.xlu2 %3962 }
 0x637   : > { %v3968_v30 = vsel %vm528_vm15, %v3961_v49, %v3963_v9  ;;  %v5294_v49 = vor.u32 %v5432_v16, %v5291_v59 }
 0x638   : > { %3983 = vmatpush.bf16.msrb.mxu2 %v3968_v30 }
 0x639   : > { %v4012_v53 = vpop.permute.xlu0 %4011  ;;  %v4014_v35 = vpop.permute.xlu1 %4013 }
 0x63a   : > { %v4021_v1 = vsel %vm605_vm1, %v4010_v51, %v4012_v53  ;;  %v4022_v38 = vsel %vm605_vm1, %v4012_v53, %v4014_v35  ;;  %v3886_v35 = vld [vmem:[%s7861_s9] sm:$0x7] }
 0x63b   : > { %4601 = vperm.xlu0 %5524, %v3886_v35  }
 0x63c   : > { %3984 = vmatpush.bf16.msrb.mxu2 %v3966_v20 }
 0x63e   : > { %v7741_v46 = vpop.permute.xlu2 %4315 }
 0x63f   : > { %5268 = vmatmul.msk.bf16.vlgmr.msrb.gmra.mxu2 %vm2874_vm2, %v5243_v62 }
 0x641   : > { %v4085_v39 = vpop.permute.xlu0 %4084  ;;  %v4087_v4 = vpop.permute.xlu1 %4086 }
 0x642   : > { %v4096_v14 = vsel %vm701_vm3, %v4085_v39, %v4087_v4  ;;  %v4097_v21 = vsel %vm701_vm3, %v4087_v4, %v7706_v22 }
 0x646   : > { %v7744_v31 = vpop.permute.xlu2 %4402 }
 0x649   : > { %v7746_v23 = vpop.permute.xlu0 %4163  ;;  %v7748_v47 = vpop.permute.xlu1 %4165 }
 0x64a   : > { %v4173_v51 = vsel %vm801_vm4, %v7722_v26, %v7746_v23  ;;  %v4174_v24 = vsel %vm801_vm4, %v7746_v23, %v7748_v47 }
 0x64e   : > { %v4016_v6 = vpop.permute.xlu2 %4015 }
 0x651   : > { %v7750_v36 = vpop.permute.xlu0 %4317  ;;  %v3965_v5 = vpop.permute.xlu1 %3964 }
 0x652   : > { %v3969_v7 = vsel %vm528_vm15, %v3963_v9, %v3965_v5  ;;  %v4327_v30 = vsel %vm766_vm13, %v7741_v46, %v7750_v36  ;;  %v5300_v5 = vld [vmem:[%s7860_s8 + $0xc] sm:$0x3] }
 0x653   : > { %3996 = vmatpush.bf16.msrb.mxu3 %v3969_v7 }
 0x656   : > { %v4095_v58 = vpop.permute.xlu2 %4094 }
 0x657   : > { %3997 = vmatpush.bf16.msrb.mxu3 %v3967_v37 }
 0x659   : > { %v7754_v11 = vpop.permute.xlu0 %4392  ;;  %v7756_v34 = vpop.permute.xlu1 %4319 }
 0x65a   : > { %5269 = vmatmul.msk.bf16.vlgmr.msrb.gmra.mxu3 %vm2874_vm2, %v5243_v62  ;;  %v4328_v53 = vsel %vm766_vm13, %v7750_v36, %v7756_v34  ;;  %v5297_v62 = vld [vmem:[%s7860_s8 + $0xa] sm:$0x3] }
 0x65e   : > { %v4168_v45 = vpop.permute.xlu2 %4167 }
 0x661   : > { %v4018_v60 = vpop.permute.xlu0 %4017  ;;  %v4020_v17 = vpop.permute.xlu1 %4019 }
 0x662   : > { %v4023_v61 = vsel %vm605_vm1, %v4016_v6, %v4018_v60  ;;  %v4024_v57 = vsel %vm605_vm1, %v4018_v60, %v4020_v17 }
 0x663   : > { %4038 = vmatpush.bf16.msra.mxu2 %v4023_v61  ;;  %4051 = vmatpush.bf16.msra.mxu3 %v4024_v57 }
 0x666   : > { %v7770_v63 = vpop.permute.xlu2 %4396 }
 0x667   : > { %4039 = vmatpush.bf16.msra.mxu2 %v4021_v1  ;;  %4052 = vmatpush.bf16.msra.mxu3 %v4022_v38 }
 0x669   : > { %v4091_v8 = vpop.permute.xlu0 %4090  ;;  %v4093_v50 = vpop.permute.xlu1 %4092 }
 0x66a   : > { %v4098_v2 = vsel %vm701_vm3, %v4091_v8, %v4093_v50  ;;  %v4099_v18 = vsel %vm701_vm3, %v4093_v50, %v4095_v58  ;;  %5270 = vmatmul.msk.bf16.vlgmr.msra.gmra.mxu2 %vm2874_vm2, %v3925_v25  ;;  %5271 = vmatmul.msk.bf16.vlgmr.msra.gmra.mxu3 %vm2874_vm2, %v3925_v25  ;;  %v5303_v58 = vld [vmem:[%s7860_s8 + $0xe] sm:$0x3]  ;;  %v5330_v50 = vld [vmem:[%s7860_s8 + $0x10] sm:$0x3] }
 0x66b   : > { %4113 = vmatpush.bf16.msra.mxu0 %v4098_v2  ;;  %4126 = vmatpush.bf16.msra.mxu1 %v4099_v18 }
 0x66e   : > { %v4322_v0 = vpop.permute.xlu2 %4321 }
 0x66f   : > { %4114 = vmatpush.bf16.msra.mxu0 %v4096_v14  ;;  %4127 = vmatpush.bf16.msra.mxu1 %v4097_v21 }
 0x671   : > { %v4170_v15 = vpop.permute.xlu0 %4169  ;;  %v4172_v19 = vpop.permute.xlu1 %4171 }
 0x672   : > { %v4175_v33 = vsel %vm801_vm4, %v4168_v45, %v4170_v15  ;;  %v4176_v29 = vsel %vm801_vm4, %v4170_v15, %v4172_v19  ;;  %5273 = vmatmul.msk.bf16.vlgmr.msra.gmra.mxu0 %vm2874_vm2, %v5272_v54  ;;  %5274 = vmatmul.msk.bf16.vlgmr.msra.gmra.mxu1 %vm2874_vm2, %v5272_v54 }
 0x673   : > { %4247 = vmatpush.bf16.msrb.mxu0 %v5290_v41  ;;  %4260 = vmatpush.bf16.msrb.mxu1 %v5294_v49 }
 0x674   : > { %4190 = vmatpush.bf16.msrb.mxu2 %v4175_v33  ;;  %4203 = vmatpush.bf16.msrb.mxu3 %v4176_v29 }
 0x676   : > { %v4478_v52 = vpop.permute.xlu2 %4477 }
 0x677   : > { %4248 = vmatpush.bf16.msrb.mxu0 %v5282_v56  ;;  %4261 = vmatpush.bf16.msrb.mxu1 %v5286_v27 }
 0x678   : > { %4191 = vmatpush.bf16.msrb.mxu2 %v4173_v51  ;;  %4204 = vmatpush.bf16.msrb.mxu3 %v4174_v24 }
 0x679   : > { %v4480_v22 = vpop.permute.xlu0 %4479  ;;  %v4395_v42 = vpop.permute.xlu1 %4394 }
 0x67a   : > { %v4404_v6 = vsel %vm666_vm12, %v7754_v11, %v4395_v42  ;;  %v4405_v36 = vsel %vm666_vm12, %v4395_v42, %v7770_v63 }
 0x67b   : > { %5276 = vmatmul.msk.bf16.vlgmr.msrb.gmra.mxu2 %vm2874_vm2, %v5275_v12  ;;  %5277 = vmatmul.msk.bf16.vlgmr.msrb.gmra.mxu3 %vm2874_vm2, %v5275_v12 }
 0x67e   : > { %v4472_v47 = vpop.permute.xlu2 %4471 }
 0x681   : > { %v4324_v40 = vpop.permute.xlu0 %4323  ;;  %v4482_v26 = vpop.permute.xlu1 %4481 }
 0x682   : > { %v4329_v48 = vsel %vm766_vm13, %v4322_v0, %v4324_v40  ;;  %v4330_v9 = vsel %vm766_vm13, %v4324_v40, %v7716_v28  ;;  %5295 = vmatmul.msk.bf16.vlgmr.msrb.gmra.mxu0 %vm2874_vm2, %v5278_v44  ;;  %5296 = vmatmul.msk.bf16.vlgmr.msrb.gmra.mxu1 %vm2874_vm2, %v5278_v44  ;;  %v4485_v28 = vsel %vm1175_vm5, %v4478_v52, %v4480_v22 }
 0x683   : > { %4344 = vmatpush.bf16.msra.mxu2 %v4329_v48  ;;  %4357 = vmatpush.bf16.msra.mxu3 %v4330_v9  ;;  %v4486_v20 = vsel %vm1175_vm5, %v4480_v22, %v4482_v26 }
 0x686   : > { %v4559_v11 = vpop.permute.xlu2 %4558 }
 0x687   : > { %4345 = vmatpush.bf16.msra.mxu2 %v4327_v30  ;;  %4358 = vmatpush.bf16.msra.mxu3 %v4328_v53 }
 0x689   : > { %v4399_v46 = vpop.permute.xlu0 %4398  ;;  %v4401_v39 = vpop.permute.xlu1 %4400 }
 0x68a   : > { %v4406_v4 = vsel %vm666_vm12, %v4399_v46, %v4401_v39  ;;  %v4407_v23 = vsel %vm666_vm12, %v4401_v39, %v7744_v31 }
 0x68b   : > { %4500 = vmatpush.bf16.msrb.mxu2 %v4485_v28  ;;  %4513 = vmatpush.bf16.msrb.mxu3 %v4486_v20 }
 0x68c   : > { %5298 = vmatmul.msk.bf16.vlgmr.msra.gmra.mxu2 %vm2874_vm2, %v5297_v62  ;;  %5299 = vmatmul.msk.bf16.vlgmr.msra.gmra.mxu3 %vm2874_vm2, %v5297_v62 }
 0x68d   : > { %4421 = vmatpush.bf16.msra.mxu0 %v4406_v4  ;;  %4434 = vmatpush.bf16.msra.mxu1 %v4407_v23 }
 0x68e   : > { %v4553_v45 = vpop.permute.xlu2 %4552 }
 0x691   : > { %4422 = vmatpush.bf16.msra.mxu0 %v4404_v6  ;;  %4435 = vmatpush.bf16.msra.mxu1 %v4405_v36  ;;  %v4474_v31 = vpop.permute.xlu0 %4473  ;;  %v4476_v7 = vpop.permute.xlu1 %4475 }
 0x692   : > { %v4483_v37 = vsel %vm1175_vm5, %v4472_v47, %v4474_v31  ;;  %v4484_v34 = vsel %vm1175_vm5, %v4474_v31, %v4476_v7 }
 0x693   : > { %4501 = vmatpush.bf16.msrb.mxu2 %v4483_v37  ;;  %4514 = vmatpush.bf16.msrb.mxu3 %v4484_v34 }
 0x694   : > { %5301 = vmatmul.msk.bf16.vlgmr.msra.gmra.mxu0 %vm2874_vm2, %v5300_v5  ;;  %5302 = vmatmul.msk.bf16.vlgmr.msra.gmra.mxu1 %vm2874_vm2, %v5300_v5 }
 0x699   : > { %v4555_v60 = vpop.permute.xlu0 %4554  ;;  %v4557_v17 = vpop.permute.xlu1 %4556 }
 0x69a   : > { %v4562_v61 = vsel %vm484_vm11, %v4555_v60, %v4557_v17  ;;  %v4563_v57 = vsel %vm484_vm11, %v4557_v17, %v4559_v11 }
 0x69b   : > { %4577 = vmatpush.bf16.msrb.mxu0 %v4562_v61  ;;  %4590 = vmatpush.bf16.msrb.mxu1 %v4563_v57 }
 0x69c   : > { %5328 = vmatmul.msk.bf16.vlgmr.msrb.gmra.mxu2 %vm2874_vm2, %v5303_v58  ;;  %5329 = vmatmul.msk.bf16.vlgmr.msrb.gmra.mxu3 %vm2874_vm2, %v5303_v58 }
 0x6a1   : > { %v4549_v1 = vpop.permute.xlu0 %4548  ;;  %v4551_v38 = vpop.permute.xlu1 %4550 }
 0x6a2   : > { %v4560_v25 = vsel %vm484_vm11, %v4549_v1, %v4551_v38  ;;  %v4561_v8 = vsel %vm484_vm11, %v4551_v38, %v4553_v45  ;;  %vm4609_vm11 = vcmask 1043456  }
 0x6a3   : > { %4578 = vmatpush.bf16.msrb.mxu0 %v4560_v25  ;;  %4591 = vmatpush.bf16.msrb.mxu1 %v4561_v8 }
 0x6a6   : > { %5331 = vmatmul.msk.bf16.vlgmr.msrb.gmra.mxu0 %vm2874_vm2, %v5330_v50  ;;  %5332 = vmatmul.msk.bf16.vlgmr.msrb.gmra.mxu1 %vm2874_vm2, %v5330_v50 }
 0x6ad   : > { %v4602_v47 = vpop.permute.xlu0 %4601 }
 0x6c2   : > { %v3986_v2 = vpop.f32.mrf.mxu2 }
 0x6ca   : > { %v3988_v18 = vpop.f32.mrf.mxu2 }
 0x6dd   : > { %v3999_v10 = vpop.f32.mrf.mxu3 }
 0x6e5   : > { %v4001_v59 = vpop.f32.mrf.mxu3 }
 0x6ed   : > { %v4041_v43 = vpop.f32.mrf.mxu2  ;;  %v4054_v16 = vpop.f32.mrf.mxu3 }
 0x6ee   : > { %v4042_v12 = vadd.f32 %v4041_v43, %v3986_v2  ;;  %v4055_v0 = vadd.f32 %v4054_v16, %v3999_v10 }
 0x6ef   : > { %v4116_v63 = vpop.f32.mrf.mxu0  ;;  %v4129_v14 = vpop.f32.mrf.mxu1 }
 0x6f0   : > { %v4133_v22 = vadd.f32 %v4116_v63, %v4042_v12  ;;  %v4134_v42 = vadd.f32 %v4129_v14, %v4055_v0 }
 0x6f5   : > { %v4043_v21 = vpop.f32.mrf.mxu2  ;;  %v4056_v41 = vpop.f32.mrf.mxu3 }
 0x6f7   : > { %v4118_v49 = vpop.f32.mrf.mxu0  ;;  %v4131_v55 = vpop.f32.mrf.mxu1 }
 0x6fe   : > { %v4193_v54 = vpop.f32.mrf.mxu2  ;;  %v4206_v32 = vpop.f32.mrf.mxu3 }
 0x6ff   : > { %v4250_v13 = vpop.f32.mrf.mxu0  ;;  %v4263_v15 = vpop.f32.mrf.mxu1  ;;  %v4210_v26 = vadd.f32 %v4193_v54, %v4133_v22  ;;  %v4211_v52 = vadd.f32 %v4206_v32, %v4134_v42 }
 0x701   : > { %v4267_v30 = vadd.f32 %v4250_v13, %v4210_v26  ;;  %v4268_v53 = vadd.f32 %v4263_v15, %v4211_v52 }
 0x706   : > { %v4195_v19 = vpop.f32.mrf.mxu2  ;;  %v4208_v56 = vpop.f32.mrf.mxu3 }
 0x707   : > { %v4252_v3 = vpop.f32.mrf.mxu0  ;;  %v4265_v33 = vpop.f32.mrf.mxu1 }
 0x70f   : > { %v4347_v29 = vpop.f32.mrf.mxu2  ;;  %v4360_v27 = vpop.f32.mrf.mxu3 }
 0x710   : > { %v4364_v35 = vadd.f32 %v4347_v29, %v4267_v30  ;;  %v4365_v28 = vadd.f32 %v4360_v27, %v4268_v53 }
 0x711   : > { %v4424_v51 = vpop.f32.mrf.mxu0  ;;  %v4437_v24 = vpop.f32.mrf.mxu1 }
 0x712   : > { %v4441_v46 = vadd.f32 %v4424_v51, %v4364_v35  ;;  %v4442_v39 = vadd.f32 %v4437_v24, %v4365_v28 }
 0x717   : > { %v4349_v44 = vpop.f32.mrf.mxu2  ;;  %v4362_v40 = vpop.f32.mrf.mxu3 }
 0x719   : > { %v4426_v48 = vpop.f32.mrf.mxu0  ;;  %v4439_v9 = vpop.f32.mrf.mxu1 }
 0x71f   : > { %v4503_v20 = vpop.f32.mrf.mxu2  ;;  %v4516_v62 = vpop.f32.mrf.mxu3 }
 0x720   : > { %v4520_v4 = vadd.f32 %v4503_v20, %v4441_v46  ;;  %v4521_v23 = vadd.f32 %v4516_v62, %v4442_v39 }
 0x723   : > { %v4580_v6 = vpop.f32.mrf.mxu0  ;;  %v4593_v36 = vpop.f32.mrf.mxu1 }
 0x724   : > { %v4597_v5 = vadd.f32 %v4580_v6, %v4520_v4  ;;  %v4598_v31 = vadd.f32 %v4593_v36, %v4521_v23 }
 0x726   : > { %v4605_v34 = vadd.f32 %v4602_v47, %v4598_v31  ;;  %v4604_v11 = vadd.f32 %v4602_v47, %v4597_v5 }
 0x727   : > { %v4518_v7 = vpop.f32.mrf.mxu3  ;;  %v4505_v37 = vpop.f32.mrf.mxu2 }
 0x728   : > { %v4608_v58 = vrot.slane %v4605_v34, 4 }
 0x72a   : > { %v4610_v60 = vsel %vm4609_vm11, %v4604_v11, %v4608_v58 }
 0x72b   : > { %4612 = vst [vmem:[%s379_s26] sm:$0x77] %v4610_v60  ;;  %v4582_v17 = vpop.f32.mrf.mxu0  ;;  %v4595_v61 = vpop.f32.mrf.mxu1 }
 0x72c PF: > { %s20_s13 = sadd.s32 1, %s5531_s13  }
 0x72d   : > { %p17_p4 = scmp.ge.s32.totalorder %s20_s13, 4  }
 0x72f   :  { %19 = sbr.rel (!%p17_p4) target bundleno = 1 (0x1), region = 125 }

</bundles_post_ra>
